<compile_context>
chip_gen: v6e
topology: v6e:2x2x1
jax: 0.10.0
libtpu: 0.0.40
codegen_flags: <defaults>
</compile_context>

<pallas_src>
import math

import jax
import jax.numpy as jnp
from jax.experimental import pallas as pl
from jax.experimental.pallas import tpu as pltpu  # noqa: F401  (kept for TPU-specific tuning hooks)

# ----------------------------- config (small) -----------------------------
B = 2
N_TOK = 8                     # number of tokens (patches)
PATCH = 2
C_IN = 4
HIDDEN = 32
DEPTH = 2
HEADS = 4
HEAD_DIM = HIDDEN // HEADS    # 8
MLP_RATIO = 4.0
MLP_HIDDEN = int(HIDDEN * MLP_RATIO)
NUM_CLASSES = 10
LEARN_SIGMA = True
C_OUT = C_IN * 2 if LEARN_SIGMA else C_IN
IN_DIM = C_IN * PATCH * PATCH        # 16
OUT_DIM = C_OUT * PATCH * PATCH      # 32
FREQ_DIM = 256
EPS = 1e-6
ROPE_THETA = 10000.0
TIME_SHIFTING = 1.0
BN = B * N_TOK


# ------------------------------ Pallas kernel ------------------------------
def _layernorm(x):
    mu = jnp.mean(x, axis=-1, keepdims=True)
    xc = x - mu
    var = jnp.mean(xc * xc, axis=-1, keepdims=True)
    return xc * jax.lax.rsqrt(var + EPS)


def _fit_fused_kernel(
    xs_ref, tfreq_ref, yemb_ref, cos2_ref, sina2_ref, sinb2_ref,
    bias_ref, maskc_ref,
    xw_ref, xb_ref, tw1_ref, tb1_ref, tw2_ref, tb2_ref,
    wada_ref, bada_ref, wqkv_ref, bqkv_ref, wproj_ref, bproj_ref,
    wfc1_ref, bfc1_ref, wfc2_ref, bfc2_ref,
    fada_ref, fadab_ref, flin_ref, flinb_ref,
    o_ref,
):
    H = HIDDEN
    HD = HEAD_DIM

    # ---- patch embedder: (BN, IN_DIM) @ (IN_DIM, H) ----
    x = jnp.dot(xs_ref[...], xw_ref[...], preferred_element_type=jnp.float32) + xb_ref[...]

    # ---- timestep embedder (SiLU MLP) + label embedding; rows already
    #      replicated per token in the wrapper, so c is directly (BN, H) ----
    h = jnp.dot(tfreq_ref[...], tw1_ref[...], preferred_element_type=jnp.float32) + tb1_ref[...]
    h = h * jax.nn.sigmoid(h)                        # SiLU
    t_emb = jnp.dot(h, tw2_ref[...], preferred_element_type=jnp.float32) + tb2_ref[...]
    c_bn = t_emb + yemb_ref[...]                     # (BN, H)
    cs = c_bn * jax.nn.sigmoid(c_bn)                 # SiLU(c), per-token rows

    cos2 = cos2_ref[...]                             # (BN, 2H)
    sa2 = sina2_ref[...]                             # sign/parity folded sin (even lanes)
    sb2 = sinb2_ref[...]                             # sign/parity folded sin (odd lanes)
    bias = bias_ref[...]                             # (BN, BN) batch-block + key mask
    maskc = maskc_ref[...]                           # (BN, 1)
    zero_col = jnp.zeros((BN, 1), jnp.float32)
    inv_sqrt_d = 1.0 / math.sqrt(HD)

    # ---- transformer blocks (static unroll; stacked weights stay in VMEM) ----
    for d in range(DEPTH):
        w_ada = wada_ref[d]
        b_ada = bada_ref[d]
        w_qkv = wqkv_ref[d]
        b_qkv = bqkv_ref[d]
        w_proj = wproj_ref[d]
        b_proj = bproj_ref[d]
        w_fc1 = wfc1_ref[d]
        b_fc1 = bfc1_ref[d]
        w_fc2 = wfc2_ref[d]
        b_fc2 = bfc2_ref[d]

        # adaLN modulation: Linear(SiLU(c)) -> 6H, already per-token rows
        mod = jnp.dot(cs, w_ada, preferred_element_type=jnp.float32) + b_ada
        shift_msa = mod[:, 0 * H:1 * H]
        scale_msa = mod[:, 1 * H:2 * H]
        gate_msa = mod[:, 2 * H:3 * H]
        shift_mlp = mod[:, 3 * H:4 * H]
        scale_mlp = mod[:, 4 * H:5 * H]
        gate_mlp = mod[:, 5 * H:6 * H]

        # ---- attention branch ----
        xn = _layernorm(x) * (1.0 + scale_msa) + shift_msa
        qkv = jnp.dot(xn, w_qkv, preferred_element_type=jnp.float32) + b_qkv   # (BN, 3H)
        qk = qkv[:, :2 * H]
        v = qkv[:, 2 * H:]

        # RoPE: q*cos + rotate_half(q)*sin  done with two lane-shifts; the
        # interleaved-pair sign pattern is folded into sa2/sb2 in the wrapper,
        # so wrap/boundary lanes are multiplied by exact zeros.
        shl = jnp.concatenate([qk[:, 1:], zero_col], axis=1)     # qk[j+1]
        shr = jnp.concatenate([zero_col, qk[:, :-1]], axis=1)    # qk[j-1]
        qk = qk * cos2 + shl * sa2 + shr * sb2
        q = qk[:, :H]
        k = qk[:, H:]

        # per-head attention; output projection folded into each head's PV
        # result (no lane concat of head outputs).
        attn = b_proj                                            # (1, H) broadcast
        for hh in range(HEADS):
            lo, hi = hh * HD, (hh + 1) * HD
            qh, kh, vh = q[:, lo:hi], k[:, lo:hi], v[:, lo:hi]
            s = jax.lax.dot_general(qh, kh, (((1,), (1,)), ((), ())),
                                    preferred_element_type=jnp.float32)
            s = s * inv_sqrt_d + bias
            m = jnp.max(s, axis=-1, keepdims=True)
            e = jnp.exp(s - m)
            p = e * pl.reciprocal(jnp.sum(e, axis=-1, keepdims=True), approx=True)
            oh = jnp.dot(p, vh, preferred_element_type=jnp.float32)          # (BN, HD)
            attn = attn + jnp.dot(oh, w_proj[lo:hi, :],
                                  preferred_element_type=jnp.float32)        # (BN, H)
        x = x + gate_msa * attn

        # ---- MLP branch ----
        xn2 = _layernorm(x) * (1.0 + scale_mlp) + shift_mlp
        h1 = jnp.dot(xn2, w_fc1, preferred_element_type=jnp.float32) + b_fc1
        h1 = jax.nn.gelu(h1, approximate=True)
        h2 = jnp.dot(h1, w_fc2, preferred_element_type=jnp.float32) + b_fc2
        x = x + gate_mlp * h2

    # ---- final adaLN layer ----
    fmod = jnp.dot(cs, fada_ref[...], preferred_element_type=jnp.float32) + fadab_ref[...]
    fshift = fmod[:, :H]
    fscale = fmod[:, H:2 * H]
    xn = _layernorm(x) * (1.0 + fscale) + fshift
    y = jnp.dot(xn, flin_ref[...], preferred_element_type=jnp.float32) + flinb_ref[...]
    o_ref[...] = y * maskc


# ----------------------------------- glue -----------------------------------
def timestep_embedding(t, dim=FREQ_DIM, max_period=10000.0):
    half = dim // 2
    freqs = jnp.exp(-math.log(max_period) * jnp.arange(half, dtype=jnp.float32) / half)
    args = t[:, None] * freqs[None, :]
    return jnp.concatenate([jnp.cos(args), jnp.sin(args)], axis=-1)


def rope_2d_from_grid(grid):
    """grid: (B, 2, N) -> cos, sin of shape (B, N, HEAD_DIM)."""
    dim = HEAD_DIM // 2  # per-axis rotary dim
    freqs = 1.0 / (ROPE_THETA ** (jnp.arange(0, dim, 2, dtype=jnp.float32) / dim))

    def axis_freqs(pos):  # (B, N)
        f = pos[..., None] * freqs         # (B, N, dim//2)
        return jnp.repeat(f, 2, axis=-1)   # interleaved pairs -> (B, N, dim)

    fh = axis_freqs(grid[:, 0, :])
    fw = axis_freqs(grid[:, 1, :])
    f = jnp.concatenate([fh, fw], axis=-1)  # (B, N, HEAD_DIM)
    return jnp.cos(f), jnp.sin(f)


def make_rotate_half_matrix():
    """rotate_half(x) == x @ R (used only by the pure-JAX reference)."""
    r = jnp.zeros((HEAD_DIM, HEAD_DIM), jnp.float32)
    idx = jnp.arange(0, HEAD_DIM, 2)
    r = r.at[idx + 1, idx].set(-1.0)
    r = r.at[idx, idx + 1].set(1.0)
    return jnp.kron(jnp.eye(HEADS, dtype=jnp.float32), r)


def init_params(key):
    keys = jax.random.split(key, 12 + 12 * DEPTH)
    it = iter(keys)

    def w(shape, scale=0.1):
        return jax.random.normal(next(it), shape, jnp.float32) * scale

    p = {
        'x_emb_w_t': w((IN_DIM, HIDDEN)), 'x_emb_b': w((1, HIDDEN)),
        't_w1_t': w((FREQ_DIM, HIDDEN)), 't_b1': w((1, HIDDEN)),
        't_w2_t': w((HIDDEN, HIDDEN)), 't_b2': w((1, HIDDEN)),
        # +1 row: CFG null class (class_dropout_prob > 0 in the module)
        'y_table': w((NUM_CLASSES + 1, HIDDEN)),
        'f_ada_t': w((HIDDEN, 2 * HIDDEN)), 'f_ada_b': w((1, 2 * HIDDEN)),
        'f_lin_t': w((HIDDEN, OUT_DIM)), 'f_lin_b': w((1, OUT_DIM)),
        'blocks': [],
    }
    for _ in range(DEPTH):
        p['blocks'].append({
            'w_ada_t': w((HIDDEN, 6 * HIDDEN)), 'b_ada': w((1, 6 * HIDDEN)),
            'w_qkv_t': w((HIDDEN, 3 * HIDDEN)), 'b_qkv': w((1, 3 * HIDDEN)),
            'w_proj_t': w((HIDDEN, HIDDEN)), 'b_proj': w((1, HIDDEN)),
            'w_fc1_t': w((HIDDEN, MLP_HIDDEN)), 'b_fc1': w((1, MLP_HIDDEN)),
            'w_fc2_t': w((MLP_HIDDEN, HIDDEN)), 'b_fc2': w((1, HIDDEN)),
        })
    return p


def fit_forward(params, x, t, y, grid, mask):
    """x: (B, p^2*C_in, N), t: (B,), y: (B,) int, grid: (B,2,N), mask: (B,N)."""
    t = jnp.minimum(TIME_SHIFTING * t / (1.0 + (TIME_SHIFTING - 1.0) * t), 1.0)
    xs = jnp.transpose(x, (0, 2, 1)).reshape(BN, IN_DIM)   # B C N -> (B*N, C)

    # per-token replicated conditioning inputs (sinusoid + label gather = glue)
    t_freq = jnp.repeat(timestep_embedding(t), N_TOK, axis=0)              # (BN, 256)
    y_emb = jnp.repeat(jnp.take(params['y_table'], y, axis=0), N_TOK, 0)   # (BN, H)

    # RoPE tables: cos over full hidden; sin folded with the rotate_half sign
    # (+/-1 interleaved) and split into even/odd parity lanes so the kernel
    # only needs two lane shifts and multiplies.
    cos, sin = rope_2d_from_grid(grid.astype(jnp.float32))                 # (B,N,HEAD_DIM)
    cosf = jnp.tile(cos, (1, 1, HEADS)).reshape(BN, HIDDEN)
    sinf = jnp.tile(sin, (1, 1, HEADS)).reshape(BN, HIDDEN)
    parity = jnp.arange(HIDDEN) % 2
    sin_a = jnp.where(parity[None, :] == 0, -sinf, 0.0)   # multiplies x[j+1] at even j
    sin_b = jnp.where(parity[None, :] == 1, sinf, 0.0)    # multiplies x[j-1] at odd j
    cos2 = jnp.concatenate([cosf, cosf], axis=-1)          # applied to the (q|k) slab
    sa2 = jnp.concatenate([sin_a, sin_a], axis=-1)
    sb2 = jnp.concatenate([sin_b, sin_b], axis=-1)

    # combined additive attention bias: block-diagonal over batches + key mask
    maskf = mask.astype(jnp.float32).reshape(BN)
    rows = jnp.arange(BN)
    same_b = (rows[:, None] // N_TOK) == (rows[None, :] // N_TOK)
    allowed = same_b & (maskf[None, :] > 0.5)
    attn_bias = jnp.where(allowed, 0.0, -1e9).astype(jnp.float32)          # (BN, BN)
    mask_col = maskf.reshape(BN, 1)

    def stk(name):
        return jnp.stack([bp[name] for bp in params['blocks']], axis=0)

    out = pl.pallas_call(
        _fit_fused_kernel,
        out_shape=jax.ShapeDtypeStruct((BN, OUT_DIM), jnp.float32),
    )(xs, t_freq, y_emb, cos2, sa2, sb2, attn_bias, mask_col,
      params['x_emb_w_t'], params['x_emb_b'],
      params['t_w1_t'], params['t_b1'], params['t_w2_t'], params['t_b2'],
      stk('w_ada_t'), stk('b_ada'), stk('w_qkv_t'), stk('b_qkv'),
      stk('w_proj_t'), stk('b_proj'), stk('w_fc1_t'), stk('b_fc1'),
      stk('w_fc2_t'), stk('b_fc2'),
      params['f_ada_t'], params['f_ada_b'], params['f_lin_t'], params['f_lin_b'])

    out = out.reshape(B, N_TOK, OUT_DIM)
    return jnp.transpose(out, (0, 2, 1))  # B N C -> B C N


# -------------------------- pure-JAX reference ------------------------------
def fit_forward_ref(params, x, t, y, grid, mask):
    t = jnp.minimum(TIME_SHIFTING * t / (1.0 + (TIME_SHIFTING - 1.0) * t), 1.0)
    xs = jnp.transpose(x, (0, 2, 1))
    hx = xs @ params['x_emb_w_t'] + params['x_emb_b']
    h = jax.nn.silu(timestep_embedding(t) @ params['t_w1_t'] + params['t_b1'])
    t_emb = h @ params['t_w2_t'] + params['t_b2']
    c = t_emb + jnp.take(params['y_table'], y, axis=0)
    cos, sin = rope_2d_from_grid(grid.astype(jnp.float32))
    cosf, sinf = jnp.tile(cos, (1, 1, HEADS)), jnp.tile(sin, (1, 1, HEADS))
    rt = make_rotate_half_matrix()
    maskf = mask.astype(jnp.float32)

    def ln(v):
        mu = v.mean(-1, keepdims=True)
        var = ((v - mu) ** 2).mean(-1, keepdims=True)
        return (v - mu) / jnp.sqrt(var + EPS)

    for bp in params['blocks']:
        mod = jax.nn.silu(c) @ bp['w_ada_t'] + bp['b_ada']
        sm, scm, gm, sp, scp, gp = [mod[:, i * HIDDEN:(i + 1) * HIDDEN][:, None, :]
                                    for i in range(6)]
        xn = ln(hx) * (1 + scm) + sm
        qkv = xn @ bp['w_qkv_t'] + bp['b_qkv']
        q, k, v = (qkv[..., :HIDDEN], qkv[..., HIDDEN:2 * HIDDEN], qkv[..., 2 * HIDDEN:])
        q = q * cosf + (q @ rt) * sinf
        k = k * cosf + (k @ rt) * sinf
        qh = q.reshape(B, N_TOK, HEADS, HEAD_DIM).transpose(0, 2, 1, 3)
        kh = k.reshape(B, N_TOK, HEADS, HEAD_DIM).transpose(0, 2, 1, 3)
        vh = v.reshape(B, N_TOK, HEADS, HEAD_DIM).transpose(0, 2, 1, 3)
        s = jnp.einsum('bhqd,bhkd->bhqk', qh, kh) / math.sqrt(HEAD_DIM)
        s = s + jnp.where(maskf[:, None, None, :] > 0.5, 0.0, -1e9)
        p = jax.nn.softmax(s, axis=-1)
        o = jnp.einsum('bhqk,bhkd->bhqd', p, vh).transpose(0, 2, 1, 3)
        o = o.reshape(B, N_TOK, HIDDEN) @ bp['w_proj_t'] + bp['b_proj']
        hx = hx + gm * o
        xn2 = ln(hx) * (1 + scp) + sp
        m1 = jax.nn.gelu(xn2 @ bp['w_fc1_t'] + bp['b_fc1'], approximate=True)
        hx = hx + gp * (m1 @ bp['w_fc2_t'] + bp['b_fc2'])

    mod = jax.nn.silu(c) @ params['f_ada_t'] + params['f_ada_b']
    sh, sc = mod[:, :HIDDEN][:, None, :], mod[:, HIDDEN:][:, None, :]
    out = (ln(hx) * (1 + sc) + sh) @ params['f_lin_t'] + params['f_lin_b']
    out = out * maskf[..., None]
    return jnp.transpose(out, (0, 2, 1))


# ----------------------------------- main -----------------------------------
if __name__ == "__main__":
    key = jax.random.PRNGKey(0)
    kx, kt, ky, kp = jax.random.split(key, 4)

    x = jax.random.normal(kx, (B, IN_DIM, N_TOK), jnp.float32)
    t = jax.random.uniform(kt, (B,), jnp.float32)
    y = jax.random.randint(ky, (B,), 0, NUM_CLASSES)

    # grid of (h, w) patch indices for a 4x2 patch layout, flattened row-major
    hs = (jnp.arange(N_TOK) // 2).astype(jnp.float32)
    ws = (jnp.arange(N_TOK) % 2).astype(jnp.float32)
    grid = jnp.broadcast_to(jnp.stack([hs, ws], axis=0), (B, 2, N_TOK))

    mask = jnp.ones((B, N_TOK), jnp.float32).at[1, -2:].set(0.0)

    params = init_params(kp)

    fwd = jax.jit(fit_forward)
    out = fwd(params, x, t, y, grid, mask)
    out = jax.block_until_ready(out)
    assert out.shape == (B, OUT_DIM, N_TOK), out.shape

    ref = fit_forward_ref(params, x, t, y, grid, mask)
    err = float(jnp.max(jnp.abs(out - ref)))
    assert err < 5e-2, f"mismatch vs reference: {err}"

    print("KERNEL_OK")
</pallas_src>

<mosaic_0001>
module attributes {stable_mosaic.version = 11 : i64} {
  func.func @_fit_fused_kernel(%arg0: memref<16x16xf32, #tpu.memory_space<vmem>>, %arg1: memref<16x256xf32, #tpu.memory_space<vmem>>, %arg2: memref<16x32xf32, #tpu.memory_space<vmem>>, %arg3: memref<16x64xf32, #tpu.memory_space<vmem>>, %arg4: memref<16x64xf32, #tpu.memory_space<vmem>>, %arg5: memref<16x64xf32, #tpu.memory_space<vmem>>, %arg6: memref<16x16xf32, #tpu.memory_space<vmem>>, %arg7: memref<16x1xf32, #tpu.memory_space<vmem>>, %arg8: memref<16x32xf32, #tpu.memory_space<vmem>>, %arg9: memref<1x32xf32, #tpu.memory_space<vmem>>, %arg10: memref<256x32xf32, #tpu.memory_space<vmem>>, %arg11: memref<1x32xf32, #tpu.memory_space<vmem>>, %arg12: memref<32x32xf32, #tpu.memory_space<vmem>>, %arg13: memref<1x32xf32, #tpu.memory_space<vmem>>, %arg14: memref<2x32x192xf32, #tpu.memory_space<vmem>>, %arg15: memref<2x1x192xf32, #tpu.memory_space<vmem>>, %arg16: memref<2x32x96xf32, #tpu.memory_space<vmem>>, %arg17: memref<2x1x96xf32, #tpu.memory_space<vmem>>, %arg18: memref<2x32x32xf32, #tpu.memory_space<vmem>>, %arg19: memref<2x1x32xf32, #tpu.memory_space<vmem>>, %arg20: memref<2x32x128xf32, #tpu.memory_space<vmem>>, %arg21: memref<2x1x128xf32, #tpu.memory_space<vmem>>, %arg22: memref<2x128x32xf32, #tpu.memory_space<vmem>>, %arg23: memref<2x1x32xf32, #tpu.memory_space<vmem>>, %arg24: memref<32x64xf32, #tpu.memory_space<vmem>>, %arg25: memref<1x64xf32, #tpu.memory_space<vmem>>, %arg26: memref<32x32xf32, #tpu.memory_space<vmem>>, %arg27: memref<1x32xf32, #tpu.memory_space<vmem>>, %arg28: memref<16x32xf32, #tpu.memory_space<vmem>>) attributes {dimension_semantics = [], scalar_prefetch = 0 : i64, scratch_operands = 0 : i64, tpu.core_type = #tpu.core_type<tc>} {
    %c0 = arith.constant 0 : index
    %c0_0 = arith.constant 0 : index
    %0 = vector.load %arg0[%c0, %c0_0] : memref<16x16xf32, #tpu.memory_space<vmem>>, vector<16x16xf32>
    %c0_1 = arith.constant 0 : index
    %c0_2 = arith.constant 0 : index
    %1 = vector.load %arg8[%c0_1, %c0_2] : memref<16x32xf32, #tpu.memory_space<vmem>>, vector<16x32xf32>
    %cst = arith.constant dense<0.000000e+00> : vector<16x32xf32>
    %2 = tpu.matmul %0, %1, %cst {dimension_numbers = #tpu.dot_dimension_numbers<[1], [0], [0], [1], [0, 0, 1, 1], [], []>} : vector<16x16xf32>, vector<16x32xf32>, vector<16x32xf32> -> vector<16x32xf32>
    %c0_3 = arith.constant 0 : index
    %c0_4 = arith.constant 0 : index
    %3 = vector.load %arg9[%c0_3, %c0_4] : memref<1x32xf32, #tpu.memory_space<vmem>>, vector<1x32xf32>
    %4 = vector.broadcast %3 : vector<1x32xf32> to vector<16x32xf32>
    %5 = arith.addf %2, %4 : vector<16x32xf32>
    %c0_5 = arith.constant 0 : index
    %c0_6 = arith.constant 0 : index
    %6 = vector.load %arg1[%c0_5, %c0_6] : memref<16x256xf32, #tpu.memory_space<vmem>>, vector<16x256xf32>
    %c0_7 = arith.constant 0 : index
    %c0_8 = arith.constant 0 : index
    %7 = vector.load %arg10[%c0_7, %c0_8] : memref<256x32xf32, #tpu.memory_space<vmem>>, vector<256x32xf32>
    %cst_9 = arith.constant dense<0.000000e+00> : vector<16x32xf32>
    %8 = tpu.matmul %6, %7, %cst_9 {dimension_numbers = #tpu.dot_dimension_numbers<[1], [0], [0], [1], [0, 0, 1, 1], [], []>} : vector<16x256xf32>, vector<256x32xf32>, vector<16x32xf32> -> vector<16x32xf32>
    %c0_10 = arith.constant 0 : index
    %c0_11 = arith.constant 0 : index
    %9 = vector.load %arg11[%c0_10, %c0_11] : memref<1x32xf32, #tpu.memory_space<vmem>>, vector<1x32xf32>
    %10 = vector.broadcast %9 : vector<1x32xf32> to vector<16x32xf32>
    %11 = arith.addf %8, %10 : vector<16x32xf32>
    %12 = arith.negf %11 : vector<16x32xf32>
    %13 = math.exp %12 : vector<16x32xf32>
    %cst_12 = arith.constant 1.000000e+00 : f32
    %14 = vector.broadcast %cst_12 : f32 to vector<16x32xf32>
    %15 = arith.addf %14, %13 : vector<16x32xf32>
    %16 = arith.divf %14, %15 : vector<16x32xf32>
    %17 = arith.mulf %11, %16 : vector<16x32xf32>
    %c0_13 = arith.constant 0 : index
    %c0_14 = arith.constant 0 : index
    %18 = vector.load %arg12[%c0_13, %c0_14] : memref<32x32xf32, #tpu.memory_space<vmem>>, vector<32x32xf32>
    %cst_15 = arith.constant dense<0.000000e+00> : vector<16x32xf32>
    %19 = tpu.matmul %17, %18, %cst_15 {dimension_numbers = #tpu.dot_dimension_numbers<[1], [0], [0], [1], [0, 0, 1, 1], [], []>} : vector<16x32xf32>, vector<32x32xf32>, vector<16x32xf32> -> vector<16x32xf32>
    %c0_16 = arith.constant 0 : index
    %c0_17 = arith.constant 0 : index
    %20 = vector.load %arg13[%c0_16, %c0_17] : memref<1x32xf32, #tpu.memory_space<vmem>>, vector<1x32xf32>
    %21 = vector.broadcast %20 : vector<1x32xf32> to vector<16x32xf32>
    %22 = arith.addf %19, %21 : vector<16x32xf32>
    %c0_18 = arith.constant 0 : index
    %c0_19 = arith.constant 0 : index
    %23 = vector.load %arg2[%c0_18, %c0_19] : memref<16x32xf32, #tpu.memory_space<vmem>>, vector<16x32xf32>
    %24 = arith.addf %22, %23 : vector<16x32xf32>
    %25 = arith.negf %24 : vector<16x32xf32>
    %26 = math.exp %25 : vector<16x32xf32>
    %cst_20 = arith.constant 1.000000e+00 : f32
    %27 = vector.broadcast %cst_20 : f32 to vector<16x32xf32>
    %28 = arith.addf %27, %26 : vector<16x32xf32>
    %29 = arith.divf %27, %28 : vector<16x32xf32>
    %30 = arith.mulf %24, %29 : vector<16x32xf32>
    %c0_21 = arith.constant 0 : index
    %c0_22 = arith.constant 0 : index
    %31 = vector.load %arg3[%c0_21, %c0_22] : memref<16x64xf32, #tpu.memory_space<vmem>>, vector<16x64xf32>
    %c0_23 = arith.constant 0 : index
    %c0_24 = arith.constant 0 : index
    %32 = vector.load %arg4[%c0_23, %c0_24] : memref<16x64xf32, #tpu.memory_space<vmem>>, vector<16x64xf32>
    %c0_25 = arith.constant 0 : index
    %c0_26 = arith.constant 0 : index
    %33 = vector.load %arg5[%c0_25, %c0_26] : memref<16x64xf32, #tpu.memory_space<vmem>>, vector<16x64xf32>
    %c0_27 = arith.constant 0 : index
    %c0_28 = arith.constant 0 : index
    %34 = vector.load %arg6[%c0_27, %c0_28] : memref<16x16xf32, #tpu.memory_space<vmem>>, vector<16x16xf32>
    %c0_29 = arith.constant 0 : index
    %c0_30 = arith.constant 0 : index
    %35 = vector.load %arg7[%c0_29, %c0_30] : memref<16x1xf32, #tpu.memory_space<vmem>>, vector<16x1xf32>
    %cst_31 = arith.constant 0.000000e+00 : f32
    %36 = vector.broadcast %cst_31 : f32 to vector<16x1xf32>
    %c0_32 = arith.constant 0 : index
    %c0_33 = arith.constant 0 : index
    %c0_34 = arith.constant 0 : index
    %37 = vector.load %arg14[%c0_32, %c0_33, %c0_34] : memref<2x32x192xf32, #tpu.memory_space<vmem>>, vector<1x32x192xf32>
    %38 = vector.shape_cast %37 : vector<1x32x192xf32> to vector<32x192xf32>
    %c0_35 = arith.constant 0 : index
    %c0_36 = arith.constant 0 : index
    %c0_37 = arith.constant 0 : index
    %39 = vector.load %arg15[%c0_35, %c0_36, %c0_37] : memref<2x1x192xf32, #tpu.memory_space<vmem>>, vector<1x1x192xf32>
    %40 = vector.shape_cast %39 : vector<1x1x192xf32> to vector<1x192xf32>
    %c0_38 = arith.constant 0 : index
    %c0_39 = arith.constant 0 : index
    %c0_40 = arith.constant 0 : index
    %41 = vector.load %arg16[%c0_38, %c0_39, %c0_40] : memref<2x32x96xf32, #tpu.memory_space<vmem>>, vector<1x32x96xf32>
    %42 = vector.shape_cast %41 : vector<1x32x96xf32> to vector<32x96xf32>
    %c0_41 = arith.constant 0 : index
    %c0_42 = arith.constant 0 : index
    %c0_43 = arith.constant 0 : index
    %43 = vector.load %arg17[%c0_41, %c0_42, %c0_43] : memref<2x1x96xf32, #tpu.memory_space<vmem>>, vector<1x1x96xf32>
    %44 = vector.shape_cast %43 : vector<1x1x96xf32> to vector<1x96xf32>
    %c0_44 = arith.constant 0 : index
    %c0_45 = arith.constant 0 : index
    %c0_46 = arith.constant 0 : index
    %45 = vector.load %arg18[%c0_44, %c0_45, %c0_46] : memref<2x32x32xf32, #tpu.memory_space<vmem>>, vector<1x32x32xf32>
    %46 = vector.shape_cast %45 : vector<1x32x32xf32> to vector<32x32xf32>
    %c0_47 = arith.constant 0 : index
    %c0_48 = arith.constant 0 : index
    %c0_49 = arith.constant 0 : index
    %47 = vector.load %arg19[%c0_47, %c0_48, %c0_49] : memref<2x1x32xf32, #tpu.memory_space<vmem>>, vector<1x1x32xf32>
    %48 = vector.shape_cast %47 : vector<1x1x32xf32> to vector<1x32xf32>
    %c0_50 = arith.constant 0 : index
    %c0_51 = arith.constant 0 : index
    %c0_52 = arith.constant 0 : index
    %49 = vector.load %arg20[%c0_50, %c0_51, %c0_52] : memref<2x32x128xf32, #tpu.memory_space<vmem>>, vector<1x32x128xf32>
    %50 = vector.shape_cast %49 : vector<1x32x128xf32> to vector<32x128xf32>
    %c0_53 = arith.constant 0 : index
    %c0_54 = arith.constant 0 : index
    %c0_55 = arith.constant 0 : index
    %51 = vector.load %arg21[%c0_53, %c0_54, %c0_55] : memref<2x1x128xf32, #tpu.memory_space<vmem>>, vector<1x1x128xf32>
    %52 = vector.shape_cast %51 : vector<1x1x128xf32> to vector<1x128xf32>
    %c0_56 = arith.constant 0 : index
    %c0_57 = arith.constant 0 : index
    %c0_58 = arith.constant 0 : index
    %53 = vector.load %arg22[%c0_56, %c0_57, %c0_58] : memref<2x128x32xf32, #tpu.memory_space<vmem>>, vector<1x128x32xf32>
    %54 = vector.shape_cast %53 : vector<1x128x32xf32> to vector<128x32xf32>
    %c0_59 = arith.constant 0 : index
    %c0_60 = arith.constant 0 : index
    %c0_61 = arith.constant 0 : index
    %55 = vector.load %arg23[%c0_59, %c0_60, %c0_61] : memref<2x1x32xf32, #tpu.memory_space<vmem>>, vector<1x1x32xf32>
    %56 = vector.shape_cast %55 : vector<1x1x32xf32> to vector<1x32xf32>
    %cst_62 = arith.constant dense<0.000000e+00> : vector<16x192xf32>
    %57 = tpu.matmul %30, %38, %cst_62 {dimension_numbers = #tpu.dot_dimension_numbers<[1], [0], [0], [1], [0, 0, 1, 1], [], []>} : vector<16x32xf32>, vector<32x192xf32>, vector<16x192xf32> -> vector<16x192xf32>
    %58 = vector.broadcast %40 : vector<1x192xf32> to vector<16x192xf32>
    %59 = arith.addf %57, %58 : vector<16x192xf32>
    %60 = vector.extract_strided_slice %59 {offsets = [0, 0], sizes = [16, 32], strides = [1, 1]} : vector<16x192xf32> to vector<16x32xf32>
    %61 = vector.extract_strided_slice %59 {offsets = [0, 32], sizes = [16, 32], strides = [1, 1]} : vector<16x192xf32> to vector<16x32xf32>
    %62 = vector.extract_strided_slice %59 {offsets = [0, 64], sizes = [16, 32], strides = [1, 1]} : vector<16x192xf32> to vector<16x32xf32>
    %63 = vector.extract_strided_slice %59 {offsets = [0, 96], sizes = [16, 32], strides = [1, 1]} : vector<16x192xf32> to vector<16x32xf32>
    %64 = vector.extract_strided_slice %59 {offsets = [0, 128], sizes = [16, 32], strides = [1, 1]} : vector<16x192xf32> to vector<16x32xf32>
    %65 = vector.extract_strided_slice %59 {offsets = [0, 160], sizes = [16, 32], strides = [1, 1]} : vector<16x192xf32> to vector<16x32xf32>
    %cst_63 = arith.constant dense<0.000000e+00> : vector<16xf32>
    %66 = vector.multi_reduction <add>, %5, %cst_63 [1] : vector<16x32xf32> to vector<16xf32>
    %67 = vector.shape_cast %66 : vector<16xf32> to vector<16x1xf32>
    %cst_64 = arith.constant 3.200000e+01 : f32
    %68 = vector.broadcast %cst_64 : f32 to vector<16x1xf32>
    %69 = arith.divf %67, %68 : vector<16x1xf32>
    %70 = vector.broadcast %69 : vector<16x1xf32> to vector<16x32xf32>
    %71 = arith.subf %5, %70 : vector<16x32xf32>
    %72 = arith.mulf %71, %71 : vector<16x32xf32>
    %cst_65 = arith.constant dense<0.000000e+00> : vector<16xf32>
    %73 = vector.multi_reduction <add>, %72, %cst_65 [1] : vector<16x32xf32> to vector<16xf32>
    %74 = vector.shape_cast %73 : vector<16xf32> to vector<16x1xf32>
    %cst_66 = arith.constant 3.200000e+01 : f32
    %75 = vector.broadcast %cst_66 : f32 to vector<16x1xf32>
    %76 = arith.divf %74, %75 : vector<16x1xf32>
    %cst_67 = arith.constant 9.99999997E-7 : f32
    %77 = vector.broadcast %cst_67 : f32 to vector<16x1xf32>
    %78 = arith.addf %76, %77 : vector<16x1xf32>
    %79 = math.rsqrt %78 : vector<16x1xf32>
    %80 = vector.broadcast %79 : vector<16x1xf32> to vector<16x32xf32>
    %81 = arith.mulf %71, %80 : vector<16x32xf32>
    %cst_68 = arith.constant 1.000000e+00 : f32
    %82 = vector.broadcast %cst_68 : f32 to vector<16x32xf32>
    %83 = arith.addf %82, %61 : vector<16x32xf32>
    %84 = arith.mulf %81, %83 : vector<16x32xf32>
    %85 = arith.addf %84, %60 : vector<16x32xf32>
    %cst_69 = arith.constant dense<0.000000e+00> : vector<16x96xf32>
    %86 = tpu.matmul %85, %42, %cst_69 {dimension_numbers = #tpu.dot_dimension_numbers<[1], [0], [0], [1], [0, 0, 1, 1], [], []>} : vector<16x32xf32>, vector<32x96xf32>, vector<16x96xf32> -> vector<16x96xf32>
    %87 = vector.broadcast %44 : vector<1x96xf32> to vector<16x96xf32>
    %88 = arith.addf %86, %87 : vector<16x96xf32>
    %89 = vector.extract_strided_slice %88 {offsets = [0, 0], sizes = [16, 64], strides = [1, 1]} : vector<16x96xf32> to vector<16x64xf32>
    %90 = vector.extract_strided_slice %88 {offsets = [0, 64], sizes = [16, 32], strides = [1, 1]} : vector<16x96xf32> to vector<16x32xf32>
    %91 = vector.extract_strided_slice %89 {offsets = [0, 1], sizes = [16, 63], strides = [1, 1]} : vector<16x64xf32> to vector<16x63xf32>
    %92 = tpu.concatenate %91, %36 in 1 : vector<16x63xf32>, vector<16x1xf32> -> vector<16x64xf32>
    %93 = vector.extract_strided_slice %89 {offsets = [0, 0], sizes = [16, 63], strides = [1, 1]} : vector<16x64xf32> to vector<16x63xf32>
    %94 = tpu.concatenate %36, %93 in 1 : vector<16x1xf32>, vector<16x63xf32> -> vector<16x64xf32>
    %95 = arith.mulf %89, %31 : vector<16x64xf32>
    %96 = arith.mulf %92, %32 : vector<16x64xf32>
    %97 = arith.addf %95, %96 : vector<16x64xf32>
    %98 = arith.mulf %94, %33 : vector<16x64xf32>
    %99 = arith.addf %97, %98 : vector<16x64xf32>
    %100 = vector.extract_strided_slice %99 {offsets = [0, 0], sizes = [16, 32], strides = [1, 1]} : vector<16x64xf32> to vector<16x32xf32>
    %101 = vector.extract_strided_slice %99 {offsets = [0, 32], sizes = [16, 32], strides = [1, 1]} : vector<16x64xf32> to vector<16x32xf32>
    %102 = vector.extract_strided_slice %100 {offsets = [0, 0], sizes = [16, 8], strides = [1, 1]} : vector<16x32xf32> to vector<16x8xf32>
    %103 = vector.extract_strided_slice %101 {offsets = [0, 0], sizes = [16, 8], strides = [1, 1]} : vector<16x32xf32> to vector<16x8xf32>
    %104 = vector.extract_strided_slice %90 {offsets = [0, 0], sizes = [16, 8], strides = [1, 1]} : vector<16x32xf32> to vector<16x8xf32>
    %cst_70 = arith.constant dense<0.000000e+00> : vector<16x16xf32>
    %105 = tpu.matmul %102, %103, %cst_70 {dimension_numbers = #tpu.dot_dimension_numbers<[1], [1], [0], [0], [0, 0, 1, 0], [], []>} : vector<16x8xf32>, vector<16x8xf32>, vector<16x16xf32> -> vector<16x16xf32>
    %cst_71 = arith.constant 0.353553385 : f32
    %106 = vector.broadcast %cst_71 : f32 to vector<16x16xf32>
    %107 = arith.mulf %105, %106 : vector<16x16xf32>
    %108 = arith.addf %107, %34 : vector<16x16xf32>
    %cst_72 = arith.constant dense<0xFF800000> : vector<16xf32>
    %109 = vector.multi_reduction <maximumf>, %108, %cst_72 [1] : vector<16x16xf32> to vector<16xf32>
    %110 = vector.shape_cast %109 : vector<16xf32> to vector<16x1xf32>
    %111 = vector.broadcast %110 : vector<16x1xf32> to vector<16x16xf32>
    %112 = arith.subf %108, %111 : vector<16x16xf32>
    %113 = math.exp %112 : vector<16x16xf32>
    %cst_73 = arith.constant dense<0.000000e+00> : vector<16xf32>
    %114 = vector.multi_reduction <add>, %113, %cst_73 [1] : vector<16x16xf32> to vector<16xf32>
    %115 = vector.shape_cast %114 : vector<16xf32> to vector<16x1xf32>
    %116 = tpu.reciprocal %115 {approx = true} : vector<16x1xf32> -> vector<16x1xf32>
    %117 = vector.broadcast %116 : vector<16x1xf32> to vector<16x16xf32>
    %118 = arith.mulf %113, %117 : vector<16x16xf32>
    %cst_74 = arith.constant dense<0.000000e+00> : vector<16x8xf32>
    %119 = tpu.matmul %118, %104, %cst_74 {dimension_numbers = #tpu.dot_dimension_numbers<[1], [0], [0], [1], [0, 0, 1, 1], [], []>} : vector<16x16xf32>, vector<16x8xf32>, vector<16x8xf32> -> vector<16x8xf32>
    %120 = vector.extract_strided_slice %46 {offsets = [0, 0], sizes = [8, 32], strides = [1, 1]} : vector<32x32xf32> to vector<8x32xf32>
    %cst_75 = arith.constant dense<0.000000e+00> : vector<16x32xf32>
    %121 = tpu.matmul %119, %120, %cst_75 {dimension_numbers = #tpu.dot_dimension_numbers<[1], [0], [0], [1], [0, 0, 1, 1], [], []>} : vector<16x8xf32>, vector<8x32xf32>, vector<16x32xf32> -> vector<16x32xf32>
    %122 = vector.broadcast %48 : vector<1x32xf32> to vector<16x32xf32>
    %123 = arith.addf %122, %121 : vector<16x32xf32>
    %124 = vector.extract_strided_slice %100 {offsets = [0, 8], sizes = [16, 8], strides = [1, 1]} : vector<16x32xf32> to vector<16x8xf32>
    %125 = vector.extract_strided_slice %101 {offsets = [0, 8], sizes = [16, 8], strides = [1, 1]} : vector<16x32xf32> to vector<16x8xf32>
    %126 = vector.extract_strided_slice %90 {offsets = [0, 8], sizes = [16, 8], strides = [1, 1]} : vector<16x32xf32> to vector<16x8xf32>
    %cst_76 = arith.constant dense<0.000000e+00> : vector<16x16xf32>
    %127 = tpu.matmul %124, %125, %cst_76 {dimension_numbers = #tpu.dot_dimension_numbers<[1], [1], [0], [0], [0, 0, 1, 0], [], []>} : vector<16x8xf32>, vector<16x8xf32>, vector<16x16xf32> -> vector<16x16xf32>
    %cst_77 = arith.constant 0.353553385 : f32
    %128 = vector.broadcast %cst_77 : f32 to vector<16x16xf32>
    %129 = arith.mulf %127, %128 : vector<16x16xf32>
    %130 = arith.addf %129, %34 : vector<16x16xf32>
    %cst_78 = arith.constant dense<0xFF800000> : vector<16xf32>
    %131 = vector.multi_reduction <maximumf>, %130, %cst_78 [1] : vector<16x16xf32> to vector<16xf32>
    %132 = vector.shape_cast %131 : vector<16xf32> to vector<16x1xf32>
    %133 = vector.broadcast %132 : vector<16x1xf32> to vector<16x16xf32>
    %134 = arith.subf %130, %133 : vector<16x16xf32>
    %135 = math.exp %134 : vector<16x16xf32>
    %cst_79 = arith.constant dense<0.000000e+00> : vector<16xf32>
    %136 = vector.multi_reduction <add>, %135, %cst_79 [1] : vector<16x16xf32> to vector<16xf32>
    %137 = vector.shape_cast %136 : vector<16xf32> to vector<16x1xf32>
    %138 = tpu.reciprocal %137 {approx = true} : vector<16x1xf32> -> vector<16x1xf32>
    %139 = vector.broadcast %138 : vector<16x1xf32> to vector<16x16xf32>
    %140 = arith.mulf %135, %139 : vector<16x16xf32>
    %cst_80 = arith.constant dense<0.000000e+00> : vector<16x8xf32>
    %141 = tpu.matmul %140, %126, %cst_80 {dimension_numbers = #tpu.dot_dimension_numbers<[1], [0], [0], [1], [0, 0, 1, 1], [], []>} : vector<16x16xf32>, vector<16x8xf32>, vector<16x8xf32> -> vector<16x8xf32>
    %142 = vector.extract_strided_slice %46 {offsets = [8, 0], sizes = [8, 32], strides = [1, 1]} : vector<32x32xf32> to vector<8x32xf32>
    %cst_81 = arith.constant dense<0.000000e+00> : vector<16x32xf32>
    %143 = tpu.matmul %141, %142, %cst_81 {dimension_numbers = #tpu.dot_dimension_numbers<[1], [0], [0], [1], [0, 0, 1, 1], [], []>} : vector<16x8xf32>, vector<8x32xf32>, vector<16x32xf32> -> vector<16x32xf32>
    %144 = arith.addf %123, %143 : vector<16x32xf32>
    %145 = vector.extract_strided_slice %100 {offsets = [0, 16], sizes = [16, 8], strides = [1, 1]} : vector<16x32xf32> to vector<16x8xf32>
    %146 = vector.extract_strided_slice %101 {offsets = [0, 16], sizes = [16, 8], strides = [1, 1]} : vector<16x32xf32> to vector<16x8xf32>
    %147 = vector.extract_strided_slice %90 {offsets = [0, 16], sizes = [16, 8], strides = [1, 1]} : vector<16x32xf32> to vector<16x8xf32>
    %cst_82 = arith.constant dense<0.000000e+00> : vector<16x16xf32>
    %148 = tpu.matmul %145, %146, %cst_82 {dimension_numbers = #tpu.dot_dimension_numbers<[1], [1], [0], [0], [0, 0, 1, 0], [], []>} : vector<16x8xf32>, vector<16x8xf32>, vector<16x16xf32> -> vector<16x16xf32>
    %cst_83 = arith.constant 0.353553385 : f32
    %149 = vector.broadcast %cst_83 : f32 to vector<16x16xf32>
    %150 = arith.mulf %148, %149 : vector<16x16xf32>
    %151 = arith.addf %150, %34 : vector<16x16xf32>
    %cst_84 = arith.constant dense<0xFF800000> : vector<16xf32>
    %152 = vector.multi_reduction <maximumf>, %151, %cst_84 [1] : vector<16x16xf32> to vector<16xf32>
    %153 = vector.shape_cast %152 : vector<16xf32> to vector<16x1xf32>
    %154 = vector.broadcast %153 : vector<16x1xf32> to vector<16x16xf32>
    %155 = arith.subf %151, %154 : vector<16x16xf32>
    %156 = math.exp %155 : vector<16x16xf32>
    %cst_85 = arith.constant dense<0.000000e+00> : vector<16xf32>
    %157 = vector.multi_reduction <add>, %156, %cst_85 [1] : vector<16x16xf32> to vector<16xf32>
    %158 = vector.shape_cast %157 : vector<16xf32> to vector<16x1xf32>
    %159 = tpu.reciprocal %158 {approx = true} : vector<16x1xf32> -> vector<16x1xf32>
    %160 = vector.broadcast %159 : vector<16x1xf32> to vector<16x16xf32>
    %161 = arith.mulf %156, %160 : vector<16x16xf32>
    %cst_86 = arith.constant dense<0.000000e+00> : vector<16x8xf32>
    %162 = tpu.matmul %161, %147, %cst_86 {dimension_numbers = #tpu.dot_dimension_numbers<[1], [0], [0], [1], [0, 0, 1, 1], [], []>} : vector<16x16xf32>, vector<16x8xf32>, vector<16x8xf32> -> vector<16x8xf32>
    %163 = vector.extract_strided_slice %46 {offsets = [16, 0], sizes = [8, 32], strides = [1, 1]} : vector<32x32xf32> to vector<8x32xf32>
    %cst_87 = arith.constant dense<0.000000e+00> : vector<16x32xf32>
    %164 = tpu.matmul %162, %163, %cst_87 {dimension_numbers = #tpu.dot_dimension_numbers<[1], [0], [0], [1], [0, 0, 1, 1], [], []>} : vector<16x8xf32>, vector<8x32xf32>, vector<16x32xf32> -> vector<16x32xf32>
    %165 = arith.addf %144, %164 : vector<16x32xf32>
    %166 = vector.extract_strided_slice %100 {offsets = [0, 24], sizes = [16, 8], strides = [1, 1]} : vector<16x32xf32> to vector<16x8xf32>
    %167 = vector.extract_strided_slice %101 {offsets = [0, 24], sizes = [16, 8], strides = [1, 1]} : vector<16x32xf32> to vector<16x8xf32>
    %168 = vector.extract_strided_slice %90 {offsets = [0, 24], sizes = [16, 8], strides = [1, 1]} : vector<16x32xf32> to vector<16x8xf32>
    %cst_88 = arith.constant dense<0.000000e+00> : vector<16x16xf32>
    %169 = tpu.matmul %166, %167, %cst_88 {dimension_numbers = #tpu.dot_dimension_numbers<[1], [1], [0], [0], [0, 0, 1, 0], [], []>} : vector<16x8xf32>, vector<16x8xf32>, vector<16x16xf32> -> vector<16x16xf32>
    %cst_89 = arith.constant 0.353553385 : f32
    %170 = vector.broadcast %cst_89 : f32 to vector<16x16xf32>
    %171 = arith.mulf %169, %170 : vector<16x16xf32>
    %172 = arith.addf %171, %34 : vector<16x16xf32>
    %cst_90 = arith.constant dense<0xFF800000> : vector<16xf32>
    %173 = vector.multi_reduction <maximumf>, %172, %cst_90 [1] : vector<16x16xf32> to vector<16xf32>
    %174 = vector.shape_cast %173 : vector<16xf32> to vector<16x1xf32>
    %175 = vector.broadcast %174 : vector<16x1xf32> to vector<16x16xf32>
    %176 = arith.subf %172, %175 : vector<16x16xf32>
    %177 = math.exp %176 : vector<16x16xf32>
    %cst_91 = arith.constant dense<0.000000e+00> : vector<16xf32>
    %178 = vector.multi_reduction <add>, %177, %cst_91 [1] : vector<16x16xf32> to vector<16xf32>
    %179 = vector.shape_cast %178 : vector<16xf32> to vector<16x1xf32>
    %180 = tpu.reciprocal %179 {approx = true} : vector<16x1xf32> -> vector<16x1xf32>
    %181 = vector.broadcast %180 : vector<16x1xf32> to vector<16x16xf32>
    %182 = arith.mulf %177, %181 : vector<16x16xf32>
    %cst_92 = arith.constant dense<0.000000e+00> : vector<16x8xf32>
    %183 = tpu.matmul %182, %168, %cst_92 {dimension_numbers = #tpu.dot_dimension_numbers<[1], [0], [0], [1], [0, 0, 1, 1], [], []>} : vector<16x16xf32>, vector<16x8xf32>, vector<16x8xf32> -> vector<16x8xf32>
    %184 = vector.extract_strided_slice %46 {offsets = [24, 0], sizes = [8, 32], strides = [1, 1]} : vector<32x32xf32> to vector<8x32xf32>
    %cst_93 = arith.constant dense<0.000000e+00> : vector<16x32xf32>
    %185 = tpu.matmul %183, %184, %cst_93 {dimension_numbers = #tpu.dot_dimension_numbers<[1], [0], [0], [1], [0, 0, 1, 1], [], []>} : vector<16x8xf32>, vector<8x32xf32>, vector<16x32xf32> -> vector<16x32xf32>
    %186 = arith.addf %165, %185 : vector<16x32xf32>
    %187 = arith.mulf %62, %186 : vector<16x32xf32>
    %188 = arith.addf %5, %187 : vector<16x32xf32>
    %cst_94 = arith.constant dense<0.000000e+00> : vector<16xf32>
    %189 = vector.multi_reduction <add>, %188, %cst_94 [1] : vector<16x32xf32> to vector<16xf32>
    %190 = vector.shape_cast %189 : vector<16xf32> to vector<16x1xf32>
    %cst_95 = arith.constant 3.200000e+01 : f32
    %191 = vector.broadcast %cst_95 : f32 to vector<16x1xf32>
    %192 = arith.divf %190, %191 : vector<16x1xf32>
    %193 = vector.broadcast %192 : vector<16x1xf32> to vector<16x32xf32>
    %194 = arith.subf %188, %193 : vector<16x32xf32>
    %195 = arith.mulf %194, %194 : vector<16x32xf32>
    %cst_96 = arith.constant dense<0.000000e+00> : vector<16xf32>
    %196 = vector.multi_reduction <add>, %195, %cst_96 [1] : vector<16x32xf32> to vector<16xf32>
    %197 = vector.shape_cast %196 : vector<16xf32> to vector<16x1xf32>
    %cst_97 = arith.constant 3.200000e+01 : f32
    %198 = vector.broadcast %cst_97 : f32 to vector<16x1xf32>
    %199 = arith.divf %197, %198 : vector<16x1xf32>
    %cst_98 = arith.constant 9.99999997E-7 : f32
    %200 = vector.broadcast %cst_98 : f32 to vector<16x1xf32>
    %201 = arith.addf %199, %200 : vector<16x1xf32>
    %202 = math.rsqrt %201 : vector<16x1xf32>
    %203 = vector.broadcast %202 : vector<16x1xf32> to vector<16x32xf32>
    %204 = arith.mulf %194, %203 : vector<16x32xf32>
    %cst_99 = arith.constant 1.000000e+00 : f32
    %205 = vector.broadcast %cst_99 : f32 to vector<16x32xf32>
    %206 = arith.addf %205, %64 : vector<16x32xf32>
    %207 = arith.mulf %204, %206 : vector<16x32xf32>
    %208 = arith.addf %207, %63 : vector<16x32xf32>
    %cst_100 = arith.constant dense<0.000000e+00> : vector<16x128xf32>
    %209 = tpu.matmul %208, %50, %cst_100 {dimension_numbers = #tpu.dot_dimension_numbers<[1], [0], [0], [1], [0, 0, 1, 1], [], []>} : vector<16x32xf32>, vector<32x128xf32>, vector<16x128xf32> -> vector<16x128xf32>
    %210 = vector.broadcast %52 : vector<1x128xf32> to vector<16x128xf32>
    %211 = arith.addf %209, %210 : vector<16x128xf32>
    %212 = arith.mulf %211, %211 : vector<16x128xf32>
    %213 = arith.mulf %211, %212 : vector<16x128xf32>
    %cst_101 = arith.constant 4.471500e-02 : f32
    %214 = vector.broadcast %cst_101 : f32 to vector<16x128xf32>
    %215 = arith.mulf %214, %213 : vector<16x128xf32>
    %216 = arith.addf %211, %215 : vector<16x128xf32>
    %cst_102 = arith.constant 0.797884583 : f32
    %217 = vector.broadcast %cst_102 : f32 to vector<16x128xf32>
    %218 = arith.mulf %217, %216 : vector<16x128xf32>
    %219 = math.tanh %218 : vector<16x128xf32>
    %cst_103 = arith.constant 1.000000e+00 : f32
    %220 = vector.broadcast %cst_103 : f32 to vector<16x128xf32>
    %221 = arith.addf %220, %219 : vector<16x128xf32>
    %cst_104 = arith.constant 5.000000e-01 : f32
    %222 = vector.broadcast %cst_104 : f32 to vector<16x128xf32>
    %223 = arith.mulf %222, %221 : vector<16x128xf32>
    %224 = arith.mulf %211, %223 : vector<16x128xf32>
    %cst_105 = arith.constant dense<0.000000e+00> : vector<16x32xf32>
    %225 = tpu.matmul %224, %54, %cst_105 {dimension_numbers = #tpu.dot_dimension_numbers<[1], [0], [0], [1], [0, 0, 1, 1], [], []>} : vector<16x128xf32>, vector<128x32xf32>, vector<16x32xf32> -> vector<16x32xf32>
    %226 = vector.broadcast %56 : vector<1x32xf32> to vector<16x32xf32>
    %227 = arith.addf %225, %226 : vector<16x32xf32>
    %228 = arith.mulf %65, %227 : vector<16x32xf32>
    %229 = arith.addf %188, %228 : vector<16x32xf32>
    %c1 = arith.constant 1 : index
    %c0_106 = arith.constant 0 : index
    %c0_107 = arith.constant 0 : index
    %230 = vector.load %arg14[%c1, %c0_106, %c0_107] : memref<2x32x192xf32, #tpu.memory_space<vmem>>, vector<1x32x192xf32>
    %231 = vector.shape_cast %230 : vector<1x32x192xf32> to vector<32x192xf32>
    %c1_108 = arith.constant 1 : index
    %c0_109 = arith.constant 0 : index
    %c0_110 = arith.constant 0 : index
    %232 = vector.load %arg15[%c1_108, %c0_109, %c0_110] : memref<2x1x192xf32, #tpu.memory_space<vmem>>, vector<1x1x192xf32>
    %233 = vector.shape_cast %232 : vector<1x1x192xf32> to vector<1x192xf32>
    %c1_111 = arith.constant 1 : index
    %c0_112 = arith.constant 0 : index
    %c0_113 = arith.constant 0 : index
    %234 = vector.load %arg16[%c1_111, %c0_112, %c0_113] : memref<2x32x96xf32, #tpu.memory_space<vmem>>, vector<1x32x96xf32>
    %235 = vector.shape_cast %234 : vector<1x32x96xf32> to vector<32x96xf32>
    %c1_114 = arith.constant 1 : index
    %c0_115 = arith.constant 0 : index
    %c0_116 = arith.constant 0 : index
    %236 = vector.load %arg17[%c1_114, %c0_115, %c0_116] : memref<2x1x96xf32, #tpu.memory_space<vmem>>, vector<1x1x96xf32>
    %237 = vector.shape_cast %236 : vector<1x1x96xf32> to vector<1x96xf32>
    %c1_117 = arith.constant 1 : index
    %c0_118 = arith.constant 0 : index
    %c0_119 = arith.constant 0 : index
    %238 = vector.load %arg18[%c1_117, %c0_118, %c0_119] : memref<2x32x32xf32, #tpu.memory_space<vmem>>, vector<1x32x32xf32>
    %239 = vector.shape_cast %238 : vector<1x32x32xf32> to vector<32x32xf32>
    %c1_120 = arith.constant 1 : index
    %c0_121 = arith.constant 0 : index
    %c0_122 = arith.constant 0 : index
    %240 = vector.load %arg19[%c1_120, %c0_121, %c0_122] : memref<2x1x32xf32, #tpu.memory_space<vmem>>, vector<1x1x32xf32>
    %241 = vector.shape_cast %240 : vector<1x1x32xf32> to vector<1x32xf32>
    %c1_123 = arith.constant 1 : index
    %c0_124 = arith.constant 0 : index
    %c0_125 = arith.constant 0 : index
    %242 = vector.load %arg20[%c1_123, %c0_124, %c0_125] : memref<2x32x128xf32, #tpu.memory_space<vmem>>, vector<1x32x128xf32>
    %243 = vector.shape_cast %242 : vector<1x32x128xf32> to vector<32x128xf32>
    %c1_126 = arith.constant 1 : index
    %c0_127 = arith.constant 0 : index
    %c0_128 = arith.constant 0 : index
    %244 = vector.load %arg21[%c1_126, %c0_127, %c0_128] : memref<2x1x128xf32, #tpu.memory_space<vmem>>, vector<1x1x128xf32>
    %245 = vector.shape_cast %244 : vector<1x1x128xf32> to vector<1x128xf32>
    %c1_129 = arith.constant 1 : index
    %c0_130 = arith.constant 0 : index
    %c0_131 = arith.constant 0 : index
    %246 = vector.load %arg22[%c1_129, %c0_130, %c0_131] : memref<2x128x32xf32, #tpu.memory_space<vmem>>, vector<1x128x32xf32>
    %247 = vector.shape_cast %246 : vector<1x128x32xf32> to vector<128x32xf32>
    %c1_132 = arith.constant 1 : index
    %c0_133 = arith.constant 0 : index
    %c0_134 = arith.constant 0 : index
    %248 = vector.load %arg23[%c1_132, %c0_133, %c0_134] : memref<2x1x32xf32, #tpu.memory_space<vmem>>, vector<1x1x32xf32>
    %249 = vector.shape_cast %248 : vector<1x1x32xf32> to vector<1x32xf32>
    %cst_135 = arith.constant dense<0.000000e+00> : vector<16x192xf32>
    %250 = tpu.matmul %30, %231, %cst_135 {dimension_numbers = #tpu.dot_dimension_numbers<[1], [0], [0], [1], [0, 0, 1, 1], [], []>} : vector<16x32xf32>, vector<32x192xf32>, vector<16x192xf32> -> vector<16x192xf32>
    %251 = vector.broadcast %233 : vector<1x192xf32> to vector<16x192xf32>
    %252 = arith.addf %250, %251 : vector<16x192xf32>
    %253 = vector.extract_strided_slice %252 {offsets = [0, 0], sizes = [16, 32], strides = [1, 1]} : vector<16x192xf32> to vector<16x32xf32>
    %254 = vector.extract_strided_slice %252 {offsets = [0, 32], sizes = [16, 32], strides = [1, 1]} : vector<16x192xf32> to vector<16x32xf32>
    %255 = vector.extract_strided_slice %252 {offsets = [0, 64], sizes = [16, 32], strides = [1, 1]} : vector<16x192xf32> to vector<16x32xf32>
    %256 = vector.extract_strided_slice %252 {offsets = [0, 96], sizes = [16, 32], strides = [1, 1]} : vector<16x192xf32> to vector<16x32xf32>
    %257 = vector.extract_strided_slice %252 {offsets = [0, 128], sizes = [16, 32], strides = [1, 1]} : vector<16x192xf32> to vector<16x32xf32>
    %258 = vector.extract_strided_slice %252 {offsets = [0, 160], sizes = [16, 32], strides = [1, 1]} : vector<16x192xf32> to vector<16x32xf32>
    %cst_136 = arith.constant dense<0.000000e+00> : vector<16xf32>
    %259 = vector.multi_reduction <add>, %229, %cst_136 [1] : vector<16x32xf32> to vector<16xf32>
    %260 = vector.shape_cast %259 : vector<16xf32> to vector<16x1xf32>
    %cst_137 = arith.constant 3.200000e+01 : f32
    %261 = vector.broadcast %cst_137 : f32 to vector<16x1xf32>
    %262 = arith.divf %260, %261 : vector<16x1xf32>
    %263 = vector.broadcast %262 : vector<16x1xf32> to vector<16x32xf32>
    %264 = arith.subf %229, %263 : vector<16x32xf32>
    %265 = arith.mulf %264, %264 : vector<16x32xf32>
    %cst_138 = arith.constant dense<0.000000e+00> : vector<16xf32>
    %266 = vector.multi_reduction <add>, %265, %cst_138 [1] : vector<16x32xf32> to vector<16xf32>
    %267 = vector.shape_cast %266 : vector<16xf32> to vector<16x1xf32>
    %cst_139 = arith.constant 3.200000e+01 : f32
    %268 = vector.broadcast %cst_139 : f32 to vector<16x1xf32>
    %269 = arith.divf %267, %268 : vector<16x1xf32>
    %cst_140 = arith.constant 9.99999997E-7 : f32
    %270 = vector.broadcast %cst_140 : f32 to vector<16x1xf32>
    %271 = arith.addf %269, %270 : vector<16x1xf32>
    %272 = math.rsqrt %271 : vector<16x1xf32>
    %273 = vector.broadcast %272 : vector<16x1xf32> to vector<16x32xf32>
    %274 = arith.mulf %264, %273 : vector<16x32xf32>
    %cst_141 = arith.constant 1.000000e+00 : f32
    %275 = vector.broadcast %cst_141 : f32 to vector<16x32xf32>
    %276 = arith.addf %275, %254 : vector<16x32xf32>
    %277 = arith.mulf %274, %276 : vector<16x32xf32>
    %278 = arith.addf %277, %253 : vector<16x32xf32>
    %cst_142 = arith.constant dense<0.000000e+00> : vector<16x96xf32>
    %279 = tpu.matmul %278, %235, %cst_142 {dimension_numbers = #tpu.dot_dimension_numbers<[1], [0], [0], [1], [0, 0, 1, 1], [], []>} : vector<16x32xf32>, vector<32x96xf32>, vector<16x96xf32> -> vector<16x96xf32>
    %280 = vector.broadcast %237 : vector<1x96xf32> to vector<16x96xf32>
    %281 = arith.addf %279, %280 : vector<16x96xf32>
    %282 = vector.extract_strided_slice %281 {offsets = [0, 0], sizes = [16, 64], strides = [1, 1]} : vector<16x96xf32> to vector<16x64xf32>
    %283 = vector.extract_strided_slice %281 {offsets = [0, 64], sizes = [16, 32], strides = [1, 1]} : vector<16x96xf32> to vector<16x32xf32>
    %284 = vector.extract_strided_slice %282 {offsets = [0, 1], sizes = [16, 63], strides = [1, 1]} : vector<16x64xf32> to vector<16x63xf32>
    %285 = tpu.concatenate %284, %36 in 1 : vector<16x63xf32>, vector<16x1xf32> -> vector<16x64xf32>
    %286 = vector.extract_strided_slice %282 {offsets = [0, 0], sizes = [16, 63], strides = [1, 1]} : vector<16x64xf32> to vector<16x63xf32>
    %287 = tpu.concatenate %36, %286 in 1 : vector<16x1xf32>, vector<16x63xf32> -> vector<16x64xf32>
    %288 = arith.mulf %282, %31 : vector<16x64xf32>
    %289 = arith.mulf %285, %32 : vector<16x64xf32>
    %290 = arith.addf %288, %289 : vector<16x64xf32>
    %291 = arith.mulf %287, %33 : vector<16x64xf32>
    %292 = arith.addf %290, %291 : vector<16x64xf32>
    %293 = vector.extract_strided_slice %292 {offsets = [0, 0], sizes = [16, 32], strides = [1, 1]} : vector<16x64xf32> to vector<16x32xf32>
    %294 = vector.extract_strided_slice %292 {offsets = [0, 32], sizes = [16, 32], strides = [1, 1]} : vector<16x64xf32> to vector<16x32xf32>
    %295 = vector.extract_strided_slice %293 {offsets = [0, 0], sizes = [16, 8], strides = [1, 1]} : vector<16x32xf32> to vector<16x8xf32>
    %296 = vector.extract_strided_slice %294 {offsets = [0, 0], sizes = [16, 8], strides = [1, 1]} : vector<16x32xf32> to vector<16x8xf32>
    %297 = vector.extract_strided_slice %283 {offsets = [0, 0], sizes = [16, 8], strides = [1, 1]} : vector<16x32xf32> to vector<16x8xf32>
    %cst_143 = arith.constant dense<0.000000e+00> : vector<16x16xf32>
    %298 = tpu.matmul %295, %296, %cst_143 {dimension_numbers = #tpu.dot_dimension_numbers<[1], [1], [0], [0], [0, 0, 1, 0], [], []>} : vector<16x8xf32>, vector<16x8xf32>, vector<16x16xf32> -> vector<16x16xf32>
    %cst_144 = arith.constant 0.353553385 : f32
    %299 = vector.broadcast %cst_144 : f32 to vector<16x16xf32>
    %300 = arith.mulf %298, %299 : vector<16x16xf32>
    %301 = arith.addf %300, %34 : vector<16x16xf32>
    %cst_145 = arith.constant dense<0xFF800000> : vector<16xf32>
    %302 = vector.multi_reduction <maximumf>, %301, %cst_145 [1] : vector<16x16xf32> to vector<16xf32>
    %303 = vector.shape_cast %302 : vector<16xf32> to vector<16x1xf32>
    %304 = vector.broadcast %303 : vector<16x1xf32> to vector<16x16xf32>
    %305 = arith.subf %301, %304 : vector<16x16xf32>
    %306 = math.exp %305 : vector<16x16xf32>
    %cst_146 = arith.constant dense<0.000000e+00> : vector<16xf32>
    %307 = vector.multi_reduction <add>, %306, %cst_146 [1] : vector<16x16xf32> to vector<16xf32>
    %308 = vector.shape_cast %307 : vector<16xf32> to vector<16x1xf32>
    %309 = tpu.reciprocal %308 {approx = true} : vector<16x1xf32> -> vector<16x1xf32>
    %310 = vector.broadcast %309 : vector<16x1xf32> to vector<16x16xf32>
    %311 = arith.mulf %306, %310 : vector<16x16xf32>
    %cst_147 = arith.constant dense<0.000000e+00> : vector<16x8xf32>
    %312 = tpu.matmul %311, %297, %cst_147 {dimension_numbers = #tpu.dot_dimension_numbers<[1], [0], [0], [1], [0, 0, 1, 1], [], []>} : vector<16x16xf32>, vector<16x8xf32>, vector<16x8xf32> -> vector<16x8xf32>
    %313 = vector.extract_strided_slice %239 {offsets = [0, 0], sizes = [8, 32], strides = [1, 1]} : vector<32x32xf32> to vector<8x32xf32>
    %cst_148 = arith.constant dense<0.000000e+00> : vector<16x32xf32>
    %314 = tpu.matmul %312, %313, %cst_148 {dimension_numbers = #tpu.dot_dimension_numbers<[1], [0], [0], [1], [0, 0, 1, 1], [], []>} : vector<16x8xf32>, vector<8x32xf32>, vector<16x32xf32> -> vector<16x32xf32>
    %315 = vector.broadcast %241 : vector<1x32xf32> to vector<16x32xf32>
    %316 = arith.addf %315, %314 : vector<16x32xf32>
    %317 = vector.extract_strided_slice %293 {offsets = [0, 8], sizes = [16, 8], strides = [1, 1]} : vector<16x32xf32> to vector<16x8xf32>
    %318 = vector.extract_strided_slice %294 {offsets = [0, 8], sizes = [16, 8], strides = [1, 1]} : vector<16x32xf32> to vector<16x8xf32>
    %319 = vector.extract_strided_slice %283 {offsets = [0, 8], sizes = [16, 8], strides = [1, 1]} : vector<16x32xf32> to vector<16x8xf32>
    %cst_149 = arith.constant dense<0.000000e+00> : vector<16x16xf32>
    %320 = tpu.matmul %317, %318, %cst_149 {dimension_numbers = #tpu.dot_dimension_numbers<[1], [1], [0], [0], [0, 0, 1, 0], [], []>} : vector<16x8xf32>, vector<16x8xf32>, vector<16x16xf32> -> vector<16x16xf32>
    %cst_150 = arith.constant 0.353553385 : f32
    %321 = vector.broadcast %cst_150 : f32 to vector<16x16xf32>
    %322 = arith.mulf %320, %321 : vector<16x16xf32>
    %323 = arith.addf %322, %34 : vector<16x16xf32>
    %cst_151 = arith.constant dense<0xFF800000> : vector<16xf32>
    %324 = vector.multi_reduction <maximumf>, %323, %cst_151 [1] : vector<16x16xf32> to vector<16xf32>
    %325 = vector.shape_cast %324 : vector<16xf32> to vector<16x1xf32>
    %326 = vector.broadcast %325 : vector<16x1xf32> to vector<16x16xf32>
    %327 = arith.subf %323, %326 : vector<16x16xf32>
    %328 = math.exp %327 : vector<16x16xf32>
    %cst_152 = arith.constant dense<0.000000e+00> : vector<16xf32>
    %329 = vector.multi_reduction <add>, %328, %cst_152 [1] : vector<16x16xf32> to vector<16xf32>
    %330 = vector.shape_cast %329 : vector<16xf32> to vector<16x1xf32>
    %331 = tpu.reciprocal %330 {approx = true} : vector<16x1xf32> -> vector<16x1xf32>
    %332 = vector.broadcast %331 : vector<16x1xf32> to vector<16x16xf32>
    %333 = arith.mulf %328, %332 : vector<16x16xf32>
    %cst_153 = arith.constant dense<0.000000e+00> : vector<16x8xf32>
    %334 = tpu.matmul %333, %319, %cst_153 {dimension_numbers = #tpu.dot_dimension_numbers<[1], [0], [0], [1], [0, 0, 1, 1], [], []>} : vector<16x16xf32>, vector<16x8xf32>, vector<16x8xf32> -> vector<16x8xf32>
    %335 = vector.extract_strided_slice %239 {offsets = [8, 0], sizes = [8, 32], strides = [1, 1]} : vector<32x32xf32> to vector<8x32xf32>
    %cst_154 = arith.constant dense<0.000000e+00> : vector<16x32xf32>
    %336 = tpu.matmul %334, %335, %cst_154 {dimension_numbers = #tpu.dot_dimension_numbers<[1], [0], [0], [1], [0, 0, 1, 1], [], []>} : vector<16x8xf32>, vector<8x32xf32>, vector<16x32xf32> -> vector<16x32xf32>
    %337 = arith.addf %316, %336 : vector<16x32xf32>
    %338 = vector.extract_strided_slice %293 {offsets = [0, 16], sizes = [16, 8], strides = [1, 1]} : vector<16x32xf32> to vector<16x8xf32>
    %339 = vector.extract_strided_slice %294 {offsets = [0, 16], sizes = [16, 8], strides = [1, 1]} : vector<16x32xf32> to vector<16x8xf32>
    %340 = vector.extract_strided_slice %283 {offsets = [0, 16], sizes = [16, 8], strides = [1, 1]} : vector<16x32xf32> to vector<16x8xf32>
    %cst_155 = arith.constant dense<0.000000e+00> : vector<16x16xf32>
    %341 = tpu.matmul %338, %339, %cst_155 {dimension_numbers = #tpu.dot_dimension_numbers<[1], [1], [0], [0], [0, 0, 1, 0], [], []>} : vector<16x8xf32>, vector<16x8xf32>, vector<16x16xf32> -> vector<16x16xf32>
    %cst_156 = arith.constant 0.353553385 : f32
    %342 = vector.broadcast %cst_156 : f32 to vector<16x16xf32>
    %343 = arith.mulf %341, %342 : vector<16x16xf32>
    %344 = arith.addf %343, %34 : vector<16x16xf32>
    %cst_157 = arith.constant dense<0xFF800000> : vector<16xf32>
    %345 = vector.multi_reduction <maximumf>, %344, %cst_157 [1] : vector<16x16xf32> to vector<16xf32>
    %346 = vector.shape_cast %345 : vector<16xf32> to vector<16x1xf32>
    %347 = vector.broadcast %346 : vector<16x1xf32> to vector<16x16xf32>
    %348 = arith.subf %344, %347 : vector<16x16xf32>
    %349 = math.exp %348 : vector<16x16xf32>
    %cst_158 = arith.constant dense<0.000000e+00> : vector<16xf32>
    %350 = vector.multi_reduction <add>, %349, %cst_158 [1] : vector<16x16xf32> to vector<16xf32>
    %351 = vector.shape_cast %350 : vector<16xf32> to vector<16x1xf32>
    %352 = tpu.reciprocal %351 {approx = true} : vector<16x1xf32> -> vector<16x1xf32>
    %353 = vector.broadcast %352 : vector<16x1xf32> to vector<16x16xf32>
    %354 = arith.mulf %349, %353 : vector<16x16xf32>
    %cst_159 = arith.constant dense<0.000000e+00> : vector<16x8xf32>
    %355 = tpu.matmul %354, %340, %cst_159 {dimension_numbers = #tpu.dot_dimension_numbers<[1], [0], [0], [1], [0, 0, 1, 1], [], []>} : vector<16x16xf32>, vector<16x8xf32>, vector<16x8xf32> -> vector<16x8xf32>
    %356 = vector.extract_strided_slice %239 {offsets = [16, 0], sizes = [8, 32], strides = [1, 1]} : vector<32x32xf32> to vector<8x32xf32>
    %cst_160 = arith.constant dense<0.000000e+00> : vector<16x32xf32>
    %357 = tpu.matmul %355, %356, %cst_160 {dimension_numbers = #tpu.dot_dimension_numbers<[1], [0], [0], [1], [0, 0, 1, 1], [], []>} : vector<16x8xf32>, vector<8x32xf32>, vector<16x32xf32> -> vector<16x32xf32>
    %358 = arith.addf %337, %357 : vector<16x32xf32>
    %359 = vector.extract_strided_slice %293 {offsets = [0, 24], sizes = [16, 8], strides = [1, 1]} : vector<16x32xf32> to vector<16x8xf32>
    %360 = vector.extract_strided_slice %294 {offsets = [0, 24], sizes = [16, 8], strides = [1, 1]} : vector<16x32xf32> to vector<16x8xf32>
    %361 = vector.extract_strided_slice %283 {offsets = [0, 24], sizes = [16, 8], strides = [1, 1]} : vector<16x32xf32> to vector<16x8xf32>
    %cst_161 = arith.constant dense<0.000000e+00> : vector<16x16xf32>
    %362 = tpu.matmul %359, %360, %cst_161 {dimension_numbers = #tpu.dot_dimension_numbers<[1], [1], [0], [0], [0, 0, 1, 0], [], []>} : vector<16x8xf32>, vector<16x8xf32>, vector<16x16xf32> -> vector<16x16xf32>
    %cst_162 = arith.constant 0.353553385 : f32
    %363 = vector.broadcast %cst_162 : f32 to vector<16x16xf32>
    %364 = arith.mulf %362, %363 : vector<16x16xf32>
    %365 = arith.addf %364, %34 : vector<16x16xf32>
    %cst_163 = arith.constant dense<0xFF800000> : vector<16xf32>
    %366 = vector.multi_reduction <maximumf>, %365, %cst_163 [1] : vector<16x16xf32> to vector<16xf32>
    %367 = vector.shape_cast %366 : vector<16xf32> to vector<16x1xf32>
    %368 = vector.broadcast %367 : vector<16x1xf32> to vector<16x16xf32>
    %369 = arith.subf %365, %368 : vector<16x16xf32>
    %370 = math.exp %369 : vector<16x16xf32>
    %cst_164 = arith.constant dense<0.000000e+00> : vector<16xf32>
    %371 = vector.multi_reduction <add>, %370, %cst_164 [1] : vector<16x16xf32> to vector<16xf32>
    %372 = vector.shape_cast %371 : vector<16xf32> to vector<16x1xf32>
    %373 = tpu.reciprocal %372 {approx = true} : vector<16x1xf32> -> vector<16x1xf32>
    %374 = vector.broadcast %373 : vector<16x1xf32> to vector<16x16xf32>
    %375 = arith.mulf %370, %374 : vector<16x16xf32>
    %cst_165 = arith.constant dense<0.000000e+00> : vector<16x8xf32>
    %376 = tpu.matmul %375, %361, %cst_165 {dimension_numbers = #tpu.dot_dimension_numbers<[1], [0], [0], [1], [0, 0, 1, 1], [], []>} : vector<16x16xf32>, vector<16x8xf32>, vector<16x8xf32> -> vector<16x8xf32>
    %377 = vector.extract_strided_slice %239 {offsets = [24, 0], sizes = [8, 32], strides = [1, 1]} : vector<32x32xf32> to vector<8x32xf32>
    %cst_166 = arith.constant dense<0.000000e+00> : vector<16x32xf32>
    %378 = tpu.matmul %376, %377, %cst_166 {dimension_numbers = #tpu.dot_dimension_numbers<[1], [0], [0], [1], [0, 0, 1, 1], [], []>} : vector<16x8xf32>, vector<8x32xf32>, vector<16x32xf32> -> vector<16x32xf32>
    %379 = arith.addf %358, %378 : vector<16x32xf32>
    %380 = arith.mulf %255, %379 : vector<16x32xf32>
    %381 = arith.addf %229, %380 : vector<16x32xf32>
    %cst_167 = arith.constant dense<0.000000e+00> : vector<16xf32>
    %382 = vector.multi_reduction <add>, %381, %cst_167 [1] : vector<16x32xf32> to vector<16xf32>
    %383 = vector.shape_cast %382 : vector<16xf32> to vector<16x1xf32>
    %cst_168 = arith.constant 3.200000e+01 : f32
    %384 = vector.broadcast %cst_168 : f32 to vector<16x1xf32>
    %385 = arith.divf %383, %384 : vector<16x1xf32>
    %386 = vector.broadcast %385 : vector<16x1xf32> to vector<16x32xf32>
    %387 = arith.subf %381, %386 : vector<16x32xf32>
    %388 = arith.mulf %387, %387 : vector<16x32xf32>
    %cst_169 = arith.constant dense<0.000000e+00> : vector<16xf32>
    %389 = vector.multi_reduction <add>, %388, %cst_169 [1] : vector<16x32xf32> to vector<16xf32>
    %390 = vector.shape_cast %389 : vector<16xf32> to vector<16x1xf32>
    %cst_170 = arith.constant 3.200000e+01 : f32
    %391 = vector.broadcast %cst_170 : f32 to vector<16x1xf32>
    %392 = arith.divf %390, %391 : vector<16x1xf32>
    %cst_171 = arith.constant 9.99999997E-7 : f32
    %393 = vector.broadcast %cst_171 : f32 to vector<16x1xf32>
    %394 = arith.addf %392, %393 : vector<16x1xf32>
    %395 = math.rsqrt %394 : vector<16x1xf32>
    %396 = vector.broadcast %395 : vector<16x1xf32> to vector<16x32xf32>
    %397 = arith.mulf %387, %396 : vector<16x32xf32>
    %cst_172 = arith.constant 1.000000e+00 : f32
    %398 = vector.broadcast %cst_172 : f32 to vector<16x32xf32>
    %399 = arith.addf %398, %257 : vector<16x32xf32>
    %400 = arith.mulf %397, %399 : vector<16x32xf32>
    %401 = arith.addf %400, %256 : vector<16x32xf32>
    %cst_173 = arith.constant dense<0.000000e+00> : vector<16x128xf32>
    %402 = tpu.matmul %401, %243, %cst_173 {dimension_numbers = #tpu.dot_dimension_numbers<[1], [0], [0], [1], [0, 0, 1, 1], [], []>} : vector<16x32xf32>, vector<32x128xf32>, vector<16x128xf32> -> vector<16x128xf32>
    %403 = vector.broadcast %245 : vector<1x128xf32> to vector<16x128xf32>
    %404 = arith.addf %402, %403 : vector<16x128xf32>
    %405 = arith.mulf %404, %404 : vector<16x128xf32>
    %406 = arith.mulf %404, %405 : vector<16x128xf32>
    %cst_174 = arith.constant 4.471500e-02 : f32
    %407 = vector.broadcast %cst_174 : f32 to vector<16x128xf32>
    %408 = arith.mulf %407, %406 : vector<16x128xf32>
    %409 = arith.addf %404, %408 : vector<16x128xf32>
    %cst_175 = arith.constant 0.797884583 : f32
    %410 = vector.broadcast %cst_175 : f32 to vector<16x128xf32>
    %411 = arith.mulf %410, %409 : vector<16x128xf32>
    %412 = math.tanh %411 : vector<16x128xf32>
    %cst_176 = arith.constant 1.000000e+00 : f32
    %413 = vector.broadcast %cst_176 : f32 to vector<16x128xf32>
    %414 = arith.addf %413, %412 : vector<16x128xf32>
    %cst_177 = arith.constant 5.000000e-01 : f32
    %415 = vector.broadcast %cst_177 : f32 to vector<16x128xf32>
    %416 = arith.mulf %415, %414 : vector<16x128xf32>
    %417 = arith.mulf %404, %416 : vector<16x128xf32>
    %cst_178 = arith.constant dense<0.000000e+00> : vector<16x32xf32>
    %418 = tpu.matmul %417, %247, %cst_178 {dimension_numbers = #tpu.dot_dimension_numbers<[1], [0], [0], [1], [0, 0, 1, 1], [], []>} : vector<16x128xf32>, vector<128x32xf32>, vector<16x32xf32> -> vector<16x32xf32>
    %419 = vector.broadcast %249 : vector<1x32xf32> to vector<16x32xf32>
    %420 = arith.addf %418, %419 : vector<16x32xf32>
    %421 = arith.mulf %258, %420 : vector<16x32xf32>
    %422 = arith.addf %381, %421 : vector<16x32xf32>
    %c0_179 = arith.constant 0 : index
    %c0_180 = arith.constant 0 : index
    %423 = vector.load %arg24[%c0_179, %c0_180] : memref<32x64xf32, #tpu.memory_space<vmem>>, vector<32x64xf32>
    %cst_181 = arith.constant dense<0.000000e+00> : vector<16x64xf32>
    %424 = tpu.matmul %30, %423, %cst_181 {dimension_numbers = #tpu.dot_dimension_numbers<[1], [0], [0], [1], [0, 0, 1, 1], [], []>} : vector<16x32xf32>, vector<32x64xf32>, vector<16x64xf32> -> vector<16x64xf32>
    %c0_182 = arith.constant 0 : index
    %c0_183 = arith.constant 0 : index
    %425 = vector.load %arg25[%c0_182, %c0_183] : memref<1x64xf32, #tpu.memory_space<vmem>>, vector<1x64xf32>
    %426 = vector.broadcast %425 : vector<1x64xf32> to vector<16x64xf32>
    %427 = arith.addf %424, %426 : vector<16x64xf32>
    %428 = vector.extract_strided_slice %427 {offsets = [0, 0], sizes = [16, 32], strides = [1, 1]} : vector<16x64xf32> to vector<16x32xf32>
    %429 = vector.extract_strided_slice %427 {offsets = [0, 32], sizes = [16, 32], strides = [1, 1]} : vector<16x64xf32> to vector<16x32xf32>
    %cst_184 = arith.constant dense<0.000000e+00> : vector<16xf32>
    %430 = vector.multi_reduction <add>, %422, %cst_184 [1] : vector<16x32xf32> to vector<16xf32>
    %431 = vector.shape_cast %430 : vector<16xf32> to vector<16x1xf32>
    %cst_185 = arith.constant 3.200000e+01 : f32
    %432 = vector.broadcast %cst_185 : f32 to vector<16x1xf32>
    %433 = arith.divf %431, %432 : vector<16x1xf32>
    %434 = vector.broadcast %433 : vector<16x1xf32> to vector<16x32xf32>
    %435 = arith.subf %422, %434 : vector<16x32xf32>
    %436 = arith.mulf %435, %435 : vector<16x32xf32>
    %cst_186 = arith.constant dense<0.000000e+00> : vector<16xf32>
    %437 = vector.multi_reduction <add>, %436, %cst_186 [1] : vector<16x32xf32> to vector<16xf32>
    %438 = vector.shape_cast %437 : vector<16xf32> to vector<16x1xf32>
    %cst_187 = arith.constant 3.200000e+01 : f32
    %439 = vector.broadcast %cst_187 : f32 to vector<16x1xf32>
    %440 = arith.divf %438, %439 : vector<16x1xf32>
    %cst_188 = arith.constant 9.99999997E-7 : f32
    %441 = vector.broadcast %cst_188 : f32 to vector<16x1xf32>
    %442 = arith.addf %440, %441 : vector<16x1xf32>
    %443 = math.rsqrt %442 : vector<16x1xf32>
    %444 = vector.broadcast %443 : vector<16x1xf32> to vector<16x32xf32>
    %445 = arith.mulf %435, %444 : vector<16x32xf32>
    %cst_189 = arith.constant 1.000000e+00 : f32
    %446 = vector.broadcast %cst_189 : f32 to vector<16x32xf32>
    %447 = arith.addf %446, %429 : vector<16x32xf32>
    %448 = arith.mulf %445, %447 : vector<16x32xf32>
    %449 = arith.addf %448, %428 : vector<16x32xf32>
    %c0_190 = arith.constant 0 : index
    %c0_191 = arith.constant 0 : index
    %450 = vector.load %arg26[%c0_190, %c0_191] : memref<32x32xf32, #tpu.memory_space<vmem>>, vector<32x32xf32>
    %cst_192 = arith.constant dense<0.000000e+00> : vector<16x32xf32>
    %451 = tpu.matmul %449, %450, %cst_192 {dimension_numbers = #tpu.dot_dimension_numbers<[1], [0], [0], [1], [0, 0, 1, 1], [], []>} : vector<16x32xf32>, vector<32x32xf32>, vector<16x32xf32> -> vector<16x32xf32>
    %c0_193 = arith.constant 0 : index
    %c0_194 = arith.constant 0 : index
    %452 = vector.load %arg27[%c0_193, %c0_194] : memref<1x32xf32, #tpu.memory_space<vmem>>, vector<1x32xf32>
    %453 = vector.broadcast %452 : vector<1x32xf32> to vector<16x32xf32>
    %454 = arith.addf %451, %453 : vector<16x32xf32>
    %455 = vector.broadcast %35 : vector<16x1xf32> to vector<16x32xf32>
    %456 = arith.mulf %454, %455 : vector<16x32xf32>
    %c0_195 = arith.constant 0 : index
    %c0_196 = arith.constant 0 : index
    %457 = vector.load %arg28[%c0_195, %c0_196] : memref<16x32xf32, #tpu.memory_space<vmem>>, vector<16x32xf32>
    tpu.vector_store %arg28[%c0_195, %c0_196], %456 {strides = array<i32>} : memref<16x32xf32, #tpu.memory_space<vmem>>, vector<16x32xf32>,
    return
  }
}

</mosaic_0001>

<bundles_post_ra>
// kernel: tile.14
= control target key start
LH: loop header
LB: loop body
LE: loop exit
PB: predicated region body
PF: predicated region fallthrough
CT: control target
= control target key end

     0   :  { %vm83_vm0 = vcmask 1047556   ;;  %vm85_vm1 = vcmask 64512   ;;  %s196_s9 = smov 24   ;;  %s197_s14 = smov 8   ;;  %vm104_vm2 = vcmask 261312   ;;  %vm125_vm3 = vcmask 195712   ;;  %s290_s0 = inlined_call_operand.vmem [shape: f32[2,1,8,4,8], index: 0, kind: input, shape index: {}]   ;;  %s291_s1 = inlined_call_operand.vmem [shape: f32[16,32], index: 1, kind: output, shape index: {}]  }
   0x1   :  { %v181_v0 = vld [vmem:[%s290_s0 + $0x1c] sm:$0xf]  ;;  %v182_v1 = vld [vmem:[%s290_s0 + $0x18] sm:$0xf]  ;;  %v183_v2 = vld [vmem:[%s290_s0 + $0x14] sm:$0xf] }
   0x2   :  { %49 = vst [vmem:[#allocation0 + $0x38] sm:$0xf] %v181_v0  ;;  %54 = vst [vmem:[#allocation0 + $0x30] sm:$0xf] %v182_v1  ;;  %v184_v3 = vld [vmem:[%s290_s0 + $0x10] sm:$0xf] }
   0x3   :  { %59 = vst [vmem:[#allocation0 + $0x28] sm:$0xf] %v183_v2  ;;  %v185_v4 = vld [vmem:[%s290_s0 + $0xc] sm:$0xf]  ;;  %v186_v5 = vld [vmem:[%s290_s0 + $0x8] sm:$0xf] }
   0x4   :  { %64 = vst [vmem:[#allocation0 + $0x20] sm:$0xf] %v184_v3  ;;  %69 = vst [vmem:[#allocation0 + $0x18] sm:$0xf] %v185_v4  ;;  %v187_v6 = vld [vmem:[%s290_s0 + $0x4] sm:$0xf] }
   0x5   :  { %74 = vst [vmem:[#allocation0 + $0x10] sm:$0xf] %v186_v5  ;;  %v79_v7 = vld [vmem:[%s290_s0] sm:$0xf]  ;;  %78 = vst [vmem:[#allocation0 + $0x8] sm:$0xf] %v187_v6 }
   0x6   :  { %80 = vst [vmem:[#allocation0] sm:$0xf] %v79_v7  ;;  %v173_v8 = vld [vmem:[%s290_s0 + $0x3c] sm:$0xf]  ;;  %v174_v9 = vld [vmem:[%s290_s0 + $0x38] sm:$0xf] }
   0x7   :  { %9 = vst [vmem:[#allocation0 + $0x78] sm:$0xf] %v173_v8  ;;  %14 = vst [vmem:[#allocation0 + $0x70] sm:$0xf] %v174_v9  ;;  %v175_v10 = vld [vmem:[%s290_s0 + $0x34] sm:$0xf] }
   0x8   :  { %v176_v11 = vld [vmem:[%s290_s0 + $0x30] sm:$0xf]  ;;  %v177_v12 = vld [vmem:[%s290_s0 + $0x2c] sm:$0xf]  ;;  %19 = vst [vmem:[#allocation0 + $0x68] sm:$0xf] %v175_v10 }
   0x9   :  { %24 = vst [vmem:[#allocation0 + $0x60] sm:$0xf] %v176_v11  ;;  %29 = vst [vmem:[#allocation0 + $0x58] sm:$0xf] %v177_v12  ;;  %v178_v13 = vld [vmem:[%s290_s0 + $0x28] sm:$0xf] }
   0xa   :  { %v179_v14 = vld [vmem:[%s290_s0 + $0x24] sm:$0xf]  ;;  %v180_v15 = vld [vmem:[%s290_s0 + $0x20] sm:$0xf]  ;;  %34 = vst [vmem:[#allocation0 + $0x50] sm:$0xf] %v178_v13 }
   0xb   :  { %39 = vst [vmem:[#allocation0 + $0x48] sm:$0xf] %v179_v14  ;;  %44 = vst [vmem:[#allocation0 + $0x40] sm:$0xf] %v180_v15  ;;  %s195_s0 = smov 16   ;;  %vm146_vm4 = vcmask 130112  }
   0xc   :  { %v120_v16 = vld [vmem:[#allocation0 + $0x2] ss:$8 sm:$0xf0]   ;;  %v99_v17 = vld [vmem:[#allocation0 + $0x3] ss:$8 sm:$0xf0]  }
   0xd   :  { %v118_v18 = vld [vmem:[#allocation0 + $0x2] ss:$8 sm:$0xf]   ;;  %v97_v19 = vld [vmem:[#allocation0 + $0x3] ss:$8 sm:$0xf]  }
   0xe   :  { %v122_v20 = vsel %vm83_vm0, %v120_v16, %v118_v18  ;;  %v101_v21 = vsel %vm83_vm0, %v99_v17, %v97_v19  ;;  %v139_v24 = vld [vmem:[#allocation0 + $0x1] ss:$8 sm:$0xf]   ;;  %v81_v32 = vld [vmem:[#allocation0] ss:$8 sm:$0xf]  }
   0xf   :  { %123 = vrot.lane.b32.xlu1 %v122_v20, %s195_s0  ;;  %102 = vrot.lane.b32.xlu0 %v101_v21, %s196_s9  ;;  %v141_v25 = vld [vmem:[#allocation0 + $0x1] ss:$8 sm:$0xf0]   ;;  %v82_v33 = vld [vmem:[#allocation0] ss:$8 sm:$0xf0]  }
  0x10   :  { %v130_v22 = vld [vmem:[#allocation0 + $0x42] ss:$8 sm:$0xf0]   ;;  %v109_v23 = vld [vmem:[#allocation0 + $0x43] ss:$8 sm:$0xf0]   ;;  %v84_v34 = vsel %vm83_vm0, %v82_v33, %v81_v32  ;;  %v143_v38 = vsel %vm83_vm0, %v141_v25, %v139_v24 }
  0x11   :  { %v151_v31 = vld [vmem:[#allocation0 + $0x41] ss:$8 sm:$0xf0]   ;;  %v90_v36 = vld [vmem:[#allocation0 + $0x40] ss:$8 sm:$0xf0]  }
  0x12   :  { %v128_v26 = vld [vmem:[#allocation0 + $0x42] ss:$8 sm:$0xf]   ;;  %v107_v27 = vld [vmem:[#allocation0 + $0x43] ss:$8 sm:$0xf]  }
  0x13   :  { %v132_v28 = vsel %vm83_vm0, %v130_v22, %v128_v26  ;;  %v111_v29 = vsel %vm83_vm0, %v109_v23, %v107_v27  ;;  %v149_v30 = vld [vmem:[#allocation0 + $0x41] ss:$8 sm:$0xf]   ;;  %v88_v35 = vld [vmem:[#allocation0 + $0x40] ss:$8 sm:$0xf]  }
  0x14   :  { %133 = vrot.lane.b32.xlu1 %v132_v28, %s195_s0  ;;  %112 = vrot.lane.b32.xlu0 %v111_v29, %s196_s9  ;;  %v153_v37 = vsel %vm83_vm0, %v151_v31, %v149_v30  ;;  %86 = vst.msk [vmem:[%s291_s1] sm:$0xff] %vm85_vm1, %v84_v34   ;;  %v92_v39 = vsel %vm83_vm0, %v90_v36, %v88_v35 }
  0x15   :  { %188 = vst.msk [vmem:[%s291_s1 + $0x8] sm:$0xff] %vm85_vm1, %v92_v39  }
  0x18   :  { %154 = vrot.lane.b32.xlu1 %v153_v37, %s197_s14  ;;  %144 = vrot.lane.b32.xlu0 %v143_v38, %s197_s14 }
  0x81   :  { %v124_v40 = vpop.permute.xlu1 %123   ;;  %v103_v41 = vpop.permute.xlu0 %102  }
  0x82   :  { %105 = vst.msk [vmem:[%s291_s1] sm:$0xff] %vm104_vm2, %v103_v41  }
  0x83   :  { %126 = vst.msk [vmem:[%s291_s1] sm:$0xff] %vm125_vm3, %v124_v40  }
  0x86   :  { %v134_v42 = vpop.permute.xlu1 %133   ;;  %v113_v43 = vpop.permute.xlu0 %112  }
  0x87   :  { %189 = vst.msk [vmem:[%s291_s1 + $0x8] sm:$0xff] %vm104_vm2, %v113_v43  }
  0x88   :  { %190 = vst.msk [vmem:[%s291_s1 + $0x8] sm:$0xff] %vm125_vm3, %v134_v42  }
  0x8a   :  { %v155_v44 = vpop.permute.xlu1 %154   ;;  %v145_v45 = vpop.permute.xlu0 %144  }
  0x8b   :  { %191 = vst.msk [vmem:[%s291_s1 + $0x8] sm:$0xff] %vm146_vm4, %v155_v44   ;;  %147 = vst.msk [vmem:[%s291_s1] sm:$0xff] %vm146_vm4, %v145_v45  }

// kernel: fit_forward.1
= control target key start
LH: loop header
LB: loop body
LE: loop exit
PB: predicated region body
PF: predicated region fallthrough
CT: control target
= control target key end

     0   :  { %s6049_s0 = inlined_call_operand.vmem [shape: f32[16,16], index: 0, kind: input, shape index: {}]   ;;  %s6050_s1 = inlined_call_operand.vmem [shape: f32[16,256], index: 1, kind: input, shape index: {}]   ;;  %s6051_s2 = inlined_call_operand.vmem [shape: f32[16,32], index: 2, kind: input, shape index: {}]   ;;  %s6052_s3 = inlined_call_operand.vmem [shape: f32[16,64], index: 3, kind: input, shape index: {}]   ;;  %s6053_s4 = inlined_call_operand.vmem [shape: f32[16,64], index: 4, kind: input, shape index: {}]   ;;  %s6054_s5 = inlined_call_operand.vmem [shape: f32[16,64], index: 5, kind: input, shape index: {}]   ;;  %s6055_s6 = inlined_call_operand.vmem [shape: f32[16,16], index: 6, kind: input, shape index: {}]   ;;  %s6056_s7 = inlined_call_operand.vmem [shape: f32[16,1], index: 7, kind: input, shape index: {}]   ;;  %s6057_s8 = inlined_call_operand.vmem [shape: f32[16,32], index: 8, kind: input, shape index: {}]   ;;  %s6058_s9 = inlined_call_operand.vmem [shape: f32[1,32], index: 9, kind: input, shape index: {}]   ;;  %s6059_s10 = inlined_call_operand.vmem [shape: f32[256,32], index: 10, kind: input, shape index: {}]   ;;  %s6060_s11 = inlined_call_operand.vmem [shape: f32[1,32], index: 11, kind: input, shape index: {}]   ;;  %s6061_s12 = inlined_call_operand.vmem [shape: f32[32,32], index: 12, kind: input, shape index: {}]   ;;  %s6062_s13 = inlined_call_operand.vmem [shape: f32[1,32], index: 13, kind: input, shape index: {}]   ;;  %s6063_s14 = inlined_call_operand.vmem [shape: f32[2,32,192], index: 14, kind: input, shape index: {}]   ;;  %s6064_s15 = inlined_call_operand.vmem [shape: f32[2,1,192], index: 15, kind: input, shape index: {}]   ;;  %s6065_s16 = inlined_call_operand.vmem [shape: f32[2,32,96], index: 16, kind: input, shape index: {}]   ;;  %s6066_s17 = inlined_call_operand.vmem [shape: f32[2,1,96], index: 17, kind: input, shape index: {}]   ;;  %s6067_s18 = inlined_call_operand.vmem [shape: f32[2,32,32], index: 18, kind: input, shape index: {}]   ;;  %s6068_s19 = inlined_call_operand.vmem [shape: f32[2,1,32], index: 19, kind: input, shape index: {}]   ;;  %s6069_s20 = inlined_call_operand.vmem [shape: f32[2,32,128], index: 20, kind: input, shape index: {}]   ;;  %s6070_s21 = inlined_call_operand.vmem [shape: f32[2,1,128], index: 21, kind: input, shape index: {}]   ;;  %s6071_s22 = inlined_call_operand.vmem [shape: f32[2,128,32], index: 22, kind: input, shape index: {}]   ;;  %s6072_s23 = inlined_call_operand.vmem [shape: f32[2,1,32], index: 23, kind: input, shape index: {}]   ;;  %s6073_s24 = inlined_call_operand.vmem [shape: f32[32,64], index: 24, kind: input, shape index: {}]   ;;  %s6074_s25 = inlined_call_operand.vmem [shape: f32[1,64], index: 25, kind: input, shape index: {}]   ;;  %s6075_s26 = inlined_call_operand.vmem [shape: f32[32,32], index: 26, kind: input, shape index: {}]   ;;  %s6076_s27 = inlined_call_operand.vmem [shape: f32[1,32], index: 27, kind: input, shape index: {}]   ;;  %s6077_s28 = inlined_call_operand.hbm [shape: f32[16,32], index: 28, kind: output, shape index: {}]  }
   0x1   :  { %6108 = sst [smem:[#allocation5_spill]] %s6049_s0 }
   0x2   :  { %6109 = sst [smem:[#allocation6_spill]] %s6050_s1 }
   0x3   :  { %6110 = sst [smem:[#allocation7_spill]] %s6051_s2 }
   0x4   :  { %6111 = sst [smem:[#allocation8_spill]] %s6052_s3 }
   0x5   :  { %6112 = sst [smem:[#allocation9_spill]] %s6053_s4 }
   0x6   :  { %6113 = sst [smem:[#allocation10_spill]] %s6054_s5 }
   0x7   :  { %6114 = sst [smem:[#allocation11_spill]] %s6055_s6 }
   0x8   :  { %6115 = sst [smem:[#allocation12_spill]] %s6056_s7 }
   0x9   :  { %6116 = sst [smem:[#allocation13_spill]] %s6057_s8 }
   0xa   :  { %6117 = sst [smem:[#allocation14_spill]] %s6058_s9 }
   0xb   :  { %6118 = sst [smem:[#allocation15_spill]] %s6059_s10 }
   0xc   :  { %6119 = sst [smem:[#allocation16_spill]] %s6060_s11 }
   0xd   :  { %6120 = sst [smem:[#allocation17_spill]] %s6061_s12 }
   0xe   :  { %6121 = sst [smem:[#allocation18_spill]] %s6072_s23 }
   0xf   :  { %s6122_s9 = sld [smem:[#allocation13_spill]]  ;;  %vm101_vm0 = vcmask 130048  }
  0x10   :  { %s6123_s23 = sld [smem:[#allocation15_spill]] }
  0x11   :  { %s6124_s1 = sld [smem:[#allocation5_spill]] }
  0x12   :  { %s6125_s2 = sld [smem:[#allocation6_spill]] }
  0x15   :  { %v93_v0 = vld [vmem:[%s6122_s9 + $0x8] sm:$0xff]  ;;  %v92_v3 = vld [vmem:[%s6122_s9] sm:$0xff] }
  0x16   :  { %v218_v1 = vld [vmem:[%s6123_s23 + $0xf8] sm:$0xff]  ;;  %4458 = vmatprep.subr.mxu0 %v93_v0  ;;  %v217_v4 = vld [vmem:[%s6123_s23 + $0xf0] sm:$0xff]  ;;  %v216_v8 = vld [vmem:[%s6123_s23 + $0xe8] sm:$0xff] }
  0x17   :  { %v202_v2 = vld [vmem:[%s6123_s23 + $0x78] sm:$0xff]  ;;  %4254 = vmatprep.subr.mxu1 %v218_v1  ;;  %v90_v5 = vld [vmem:[%s6124_s1] sm:$0xff]  ;;  %4459 = vmatpush3.msra.mxu0 %v93_v0  ;;  %v201_v6 = vld [vmem:[%s6123_s23 + $0x70] sm:$0xff] }
  0x18   :  { %4255 = vmatpush3.msra.mxu1 %v202_v2  ;;  %v91_v7 = vld [vmem:[%s6124_s1 + $0x8] sm:$0xff]  ;;  %4460 = vmatprep.subr.mxu0 %v92_v3  ;;  %v215_v10 = vld [vmem:[%s6123_s23 + $0xe0] sm:$0xff]  ;;  %v214_v12 = vld [vmem:[%s6123_s23 + $0xd8] sm:$0xff] }
  0x19   :  { %4256 = vmatprep.subr.mxu1 %v217_v4  ;;  %4461 = vmatpush3.msra.mxu0 %v92_v3  ;;  %v200_v9 = vld [vmem:[%s6123_s23 + $0x68] sm:$0xff]  ;;  %v199_v11 = vld [vmem:[%s6123_s23 + $0x60] sm:$0xff]  ;;  %v198_v13 = vld [vmem:[%s6123_s23 + $0x58] sm:$0xff] }
  0x1a   :  { %4462 = vmatprep.mubr.msk.f32.mxu0 %vm101_vm0, %v90_v5  ;;  %4257 = vmatpush3.msra.mxu1 %v201_v6  ;;  %v213_v14 = vld [vmem:[%s6123_s23 + $0xd0] sm:$0xff]  ;;  %v212_v16 = vld [vmem:[%s6123_s23 + $0xc8] sm:$0xff]  ;;  %v211_v19 = vld [vmem:[%s6123_s23 + $0xc0] sm:$0xff] }
  0x1b   :  { %4463 = vmatmul.mubr.msk.f32.vlgmr.msra.gmra.mxu0 %vm101_vm0, %v91_v7  ;;  %4258 = vmatprep.subr.mxu1 %v216_v8  ;;  %v197_v15 = vld [vmem:[%s6123_s23 + $0x50] sm:$0xff]  ;;  %v196_v17 = vld [vmem:[%s6123_s23 + $0x48] sm:$0xff] }
  0x1c   :  { %4259 = vmatpush3.msra.mxu1 %v200_v9  ;;  %v184_v18 = vld [vmem:[%s6125_s2 + $0x8] sm:$0xff] }
  0x1d   :  { %4260 = vmatprep.subr.mxu1 %v215_v10  ;;  %290 = vmatprep.mubr.f32.mxu1 %v184_v18 }
  0x1e   :  { %4261 = vmatpush3.msra.mxu1 %v199_v11 }
  0x1f   :  { %4262 = vmatprep.subr.mxu1 %v214_v12 }
  0x20   :  { %4263 = vmatpush3.msra.mxu1 %v198_v13 }
  0x21   :  { %4264 = vmatprep.subr.mxu1 %v213_v14 }
  0x22   :  { %4265 = vmatpush3.msra.mxu1 %v197_v15 }
  0x23   :  { %33 = vsyncpa [#allocation3], 0  ;;  %4266 = vmatprep.subr.mxu1 %v212_v16  ;;  %v195_v20 = vld [vmem:[%s6123_s23 + $0x40] sm:$0xff]  ;;  %v210_v21 = vld [vmem:[%s6123_s23 + $0xb8] sm:$0xff]  ;;  %s6126_s12 = sld [smem:[#allocation17_spill]]  ;;  %vm326_vm1 = vcmask 261120  }
  0x24   :  { %4267 = vmatpush3.msra.mxu1 %v196_v17  ;;  %v194_v22 = vld [vmem:[%s6123_s23 + $0x38] sm:$0xff]  ;;  %v209_v23 = vld [vmem:[%s6123_s23 + $0xb0] sm:$0xff]  ;;  %v208_v25 = vld [vmem:[%s6123_s23 + $0xa8] sm:$0xff]  ;;  %s6127_s6 = sld [smem:[#allocation14_spill]]  ;;  %s4924_s29 = smov 96   ;;  %vm707_vm2 = vcmask 515072  }
  0x25   :  { %4268 = vmatprep.subr.mxu1 %v211_v19  ;;  %v193_v24 = vld [vmem:[%s6123_s23 + $0x30] sm:$0xff]  ;;  %v192_v26 = vld [vmem:[%s6123_s23 + $0x28] sm:$0xff]  ;;  %v207_v27 = vld [vmem:[%s6123_s23 + $0xa0] sm:$0xff]  ;;  %s6128_s11 = sld [smem:[#allocation16_spill]]  ;;  %vm716_vm3 = vcmask 7168   ;;  %vm735_vm4 = vcmask 64512  }
  0x26   :  { %4269 = vmatpush3.msra.mxu1 %v195_v20  ;;  %v191_v28 = vld [vmem:[%s6123_s23 + $0x20] sm:$0xff]  ;;  %v206_v29 = vld [vmem:[%s6123_s23 + $0x98] sm:$0xff]  ;;  %v205_v31 = vld [vmem:[%s6123_s23 + $0x90] sm:$0xff]  ;;  %s6129_s1 = sld [smem:[#allocation7_spill]]  ;;  %s6106_s10 = smov 88  }
  0x27   :  { %4270 = vmatprep.subr.mxu1 %v210_v21  ;;  %v190_v30 = vld [vmem:[%s6123_s23 + $0x18] sm:$0xff]  ;;  %v189_v32 = vld [vmem:[%s6123_s23 + $0x10] sm:$0xff]  ;;  %v204_v33 = vld [vmem:[%s6123_s23 + $0x88] sm:$0xff]  ;;  %s6131_s30 = sld [smem:[#allocation8_spill]]  ;;  %s6102_s7 = smov 80  }
  0x28   :  { %4271 = vmatpush3.msra.mxu1 %v194_v22  ;;  %v188_v34 = vld [vmem:[%s6123_s23 + $0x8] sm:$0xff]  ;;  %v203_v35 = vld [vmem:[%s6123_s23 + $0x80] sm:$0xff]  ;;  %v186_v38 = vld [vmem:[%s6125_s2 + $0x18] sm:$0xff]  ;;  %s6132_s0 = sld [smem:[#allocation10_spill]]  ;;  %s6098_s5 = smov 56  }
  0x29   :  { %4272 = vmatprep.subr.mxu1 %v209_v23  ;;  %v187_v36 = vld [vmem:[%s6123_s23] sm:$0xff]  ;;  %v185_v39 = vld [vmem:[%s6125_s2 + $0x10] sm:$0xff]  ;;  %v318_v40 = vld [vmem:[%s6126_s12 + $0x18] sm:$0xff]  ;;  %s6100_s23 = smov 112   ;;  %s6096_s9 = smov 72  }
  0x2a   :  { %4273 = vmatpush3.msra.mxu1 %v193_v24  ;;  %v183_v37 = vld [vmem:[%s6125_s2] sm:$0xff]  ;;  %4465 = vmatprep.subr.mxu0 %v318_v40  ;;  %v317_v41 = vld [vmem:[%s6126_s12 + $0x10] sm:$0xff]  ;;  %v316_v42 = vld [vmem:[%s6126_s12 + $0x8] sm:$0xff]  ;;  %v4923_v24 = vmov 0.0   ;;  %s6133_s2 = sld [smem:[#allocation11_spill]]  ;;  %s6090_s3 = smov 104  }
  0x2b   :  { %4274 = vmatprep.subr.mxu1 %v208_v25  ;;  %4466 = vmatpush3.msra.mxu0 %v318_v40  ;;  %v315_v43 = vld [vmem:[%s6126_s12] sm:$0xff]  ;;  %v443_v16 = vld [vmem:[%s6063_s14 + $0x38] sm:$0xff]  ;;  %v442_v17 = vld [vmem:[%s6063_s14 + $0x30] sm:$0xff]  ;;  %s4925_s12 = smov 127   ;;  %s6092_s4 = smov 48  }
  0x2c   :  { %4275 = vmatpush3.msra.mxu1 %v192_v26  ;;  %4467 = vmatprep.subr.mxu0 %v317_v41  ;;  %v4108_v45 = vld [vmem:[%s6127_s6] ss:$0 sm:$0xff]  ;;  %v441_v18 = vld [vmem:[%s6063_s14 + $0x28] sm:$0xff]  ;;  %v439_v20 = vld [vmem:[%s6063_s14 + $0x18] sm:$0xff]  ;;  %s4927_s6 = smov 64   ;;  %s6134_s8 = sld [smem:[#allocation18_spill]] }
  0x2d   :  { %4276 = vmatprep.subr.mxu1 %v207_v27  ;;  %4468 = vmatpush3.msra.mxu0 %v317_v41  ;;  %v4111_v52 = vld [vmem:[%s6128_s11] ss:$0 sm:$0xff]  ;;  %v438_v21 = vld [vmem:[%s6063_s14 + $0x10] sm:$0xff]  ;;  %v437_v22 = vld [vmem:[%s6063_s14 + $0x8] sm:$0xff]  ;;  %s6104_s11 = smov 120  }
  0x2e   :  { %4277 = vmatpush3.msra.mxu1 %v191_v28  ;;  %4469 = vmatprep.subr.mxu0 %v316_v42  ;;  %v440_v19 = vld [vmem:[%s6063_s14 + $0x20] sm:$0xff]  ;;  %v409_v27 = vld [vmem:[%s6129_s1 + $0x8] sm:$0xff] }
  0x2f   :  { %4278 = vmatprep.subr.mxu1 %v206_v29  ;;  %4470 = vmatpush3.msra.mxu0 %v316_v42  ;;  %v436_v23 = vld [vmem:[%s6063_s14] sm:$0xff] }
  0x30   :  { %4279 = vmatpush3.msra.mxu1 %v190_v30  ;;  %4471 = vmatprep.subr.mxu0 %v315_v43  ;;  %v4114_v25 = vld [vmem:[%s6062_s13] ss:$0 sm:$0xff]  ;;  %s6130_s13 = sld [smem:[#allocation9_spill]] }
  0x31   :  { %4280 = vmatprep.subr.mxu1 %v205_v31  ;;  %4472 = vmatpush3.msra.mxu0 %v315_v43  ;;  %v408_v30 = vld [vmem:[%s6129_s1] sm:$0xff]  ;;  %s4926_s1 = smov 1  }
  0x32   :  { %4281 = vmatpush3.msra.mxu1 %v189_v32  ;;  %518 = vmatprep.subr.mxu0 %v443_v16 }
  0x33   :  { %4282 = vmatprep.subr.mxu1 %v204_v33 }
  0x34   :  { %4283 = vmatpush3.msra.mxu1 %v188_v34 }
  0x35   :  { %4284 = vmatprep.subr.mxu1 %v203_v35 }
  0x36   :  { %4285 = vmatpush3.msra.mxu1 %v187_v36 }
  0x37   :  { %291 = vmatmul.mubr.f32.vlgmr.msra.gmra.mxu1 %v183_v37 }
  0x38   :  { %295 = vmatprep.mubr.f32.mxu1 %v186_v38 }
  0x3b   :  { %296 = vmatmul.mubr.f32.gmra.mxu1 %v185_v39 }
  0xdb   :  { %v4464_v44 = vpop.f32.mrf.mxu0 }
  0xdc   :  { %v5224_v47 = vadd.f32 %v4464_v44, %v4108_v45  ;;  %v448_v44 = vld [vmem:[%s6065_s16 + $0x18] sm:$0xff] }
  0xdd   :  { %v174_v46 = vpop.f32.mrf.mxu0 }
  0xde   :  { %v5226_v48 = vadd.f32 %v4108_v45, %v174_v46  ;;  %v574_v50 = vsel %vm326_vm1, %v5224_v47, 0.0  ;;  %v478_v45 = vlaneseq }
  0xe0   :  { %v571_v49 = vsel %vm326_vm1, %v5226_v48, 0.0  ;;  %v5295_v46 = vshrl.u32 %v478_v45, 7 }
  0xe1   :  { %572 = vadd.xlane.f32.xlu0 %v571_v49 }
  0xe2   :  { %v480_v49 = vsub.s32 0, %v5295_v46 }
  0xe5   :  { %575 = vadd.xlane.f32.xlu0 %v574_v50  ;;  %v447_v50 = vld [vmem:[%s6065_s16 + $0x10] sm:$0xff] }
  0xf7   :  { %v4286_v51 = vpop.f32.mrf.mxu1 }
  0xf9   :  { %v4287_v53 = vpop.f32.mrf.mxu1 }
  0xfa   :  { %v4288_v54 = vadd.f32 %v4287_v53, %v4286_v51  ;;  %v5304_v51 = vld [vmem:[%s6064_s15] sm:$0x3] }
  0xfb   :  { %v4289_v55 = vpop.f32.mrf.mxu1  ;;  %v481_v53 = vrot.slane %v5304_v51, %v480_v49 }
  0xfc   :  { %v293_v56 = vadd.f32 %v4288_v54, %v4111_v52  ;;  %v445_v54 = vld [vmem:[%s6065_s16] sm:$0xff] }
  0xfd   :  { %v4290_v57 = vpop.f32.mrf.mxu1 }
  0xfe   :  { %v4112_v58 = vmul.f32 -1.442695, %v293_v56  ;;  %v4291_v59 = vadd.f32 %v4290_v57, %v4289_v55 }
 0x100   :  { %4785 = vpow2.f32 %v4112_v58  ;;  %v298_v60 = vadd.f32 %v4291_v59, %v4111_v52  ;;  %v446_v52 = vld [vmem:[%s6065_s16 + $0x8] sm:$0xff] }
 0x102   :  { %v4113_v61 = vmul.f32 -1.442695, %v298_v60 }
 0x104   :  { %4787 = vpow2.f32 %v4113_v61 }
 0x10d   :  { %v4786_v62 = vpop.eup %4785 }
 0x10e   :  { %v307_v63 = vadd.f32 1.0, %v4786_v62 }
 0x110   :  { %4789 = vrcp.f32 %v307_v63 }
 0x111   :  { %v4788_v0 = vpop.eup %4787 }
 0x112   :  { %v308_v1 = vadd.f32 1.0, %v4788_v0 }
 0x114   :  { %4791 = vrcp.f32 %v308_v1 }
 0x11d   :  { %v4790_v2 = vpop.eup %4789 }
 0x11e   :  { %v313_v3 = vmul.f32 %v4790_v2, %v293_v56 }
 0x120   :  { %4473 = vmatprep.mubr.msk.f32.mxu0 %vm326_vm1, %v313_v3 }
 0x121   :  { %v4792_v4 = vpop.eup %4791 }
 0x122   :  { %v314_v5 = vmul.f32 %v4792_v4, %v298_v60 }
 0x124   :  { %4474 = vmatmul.mubr.msk.f32.vlgmr.msra.gmra.mxu0 %vm326_vm1, %v314_v5 }
 0x125   :  { %519 = vmatpush1.msra.mxu0 %v442_v17  ;;  %558 = vmatprep.mubr.f32.mxu0 %v4923_v24 }
 0x126   :  { %520 = vmatprep.subr.mxu0 %v441_v18 }
 0x127   :  { %521 = vmatpush1.msra.mxu0 %v440_v19 }
 0x128   :  { %522 = vmatprep.subr.mxu0 %v439_v20 }
 0x129   :  { %523 = vmatpush1.msra.mxu0 %v438_v21 }
 0x12a   :  { %524 = vmatprep.subr.mxu0 %v437_v22  ;;  %v427_v22 = vld [vmem:[%s6131_s30 + $0x8] sm:$0xff] }
 0x12b   :  { %525 = vmatpush1.msra.mxu0 %v436_v23 }
 0x12c   :  { %4476 = vmatprep.subr.mxu0 %v448_v44 }
 0x16a   :  { %v573_v6 = vpop.xlane.xlu0 %572 }
 0x16b   :  { %v578_v7 = vmul.f32 0.03125, %v573_v6 }
 0x16d   :  { %v5238_v9 = vsub.f32 %v5226_v48, %v578_v7 }
 0x16e   :  { %v576_v8 = vpop.xlane.xlu0 %575 }
 0x16f   :  { %v579_v10 = vmul.f32 0.03125, %v576_v8  ;;  %v582_v13 = vmul.f32 %v5238_v9, %v5238_v9 }
 0x171   :  { %v5241_v11 = vsub.f32 %v5224_v47, %v579_v10  ;;  %v584_v15 = vsel %vm326_vm1, %v582_v13, 0.0 }
 0x173   :  { %v583_v12 = vmul.f32 %v5241_v11, %v5241_v11 }
 0x175   :  { %v587_v14 = vsel %vm326_vm1, %v583_v12, 0.0 }
 0x176   :  { %588 = vadd.xlane.f32.xlu1 %v587_v14 }
 0x17a   :  { %585 = vadd.xlane.f32.xlu1 %v584_v15 }
 0x1e4   :  { %v4475_v26 = vpop.f32.mrf.mxu0 }
 0x1e5   :  { %v405_v28 = vadd.f32 %v4475_v26, %v4114_v25 }
 0x1e6   :  { %v399_v29 = vpop.f32.mrf.mxu0 }
 0x1e7   :  { %v411_v31 = vadd.f32 %v409_v27, %v405_v28  ;;  %v400_v32 = vadd.f32 %v4114_v25, %v399_v29  ;;  %v428_v27 = vld [vmem:[%s6130_s13] sm:$0xff]  ;;  %v431_v29 = vld [vmem:[%s6132_s0 + $0x8] sm:$0xff] }
 0x1e9   :  { %v4118_v33 = vmul.f32 -1.442695, %v411_v31  ;;  %v410_v34 = vadd.f32 %v408_v30, %v400_v32  ;;  %v426_v32 = vld [vmem:[%s6131_s30] sm:$0xff] }
 0x1eb   :  { %4793 = vpow2.f32 %v4118_v33  ;;  %v4117_v35 = vmul.f32 -1.442695, %v410_v34 }
 0x1ed   :  { %4795 = vpow2.f32 %v4117_v35 }
 0x1f8   :  { %v4794_v36 = vpop.eup %4793 }
 0x1f9   :  { %v419_v38 = vadd.f32 1.0, %v4794_v36 }
 0x1fa   :  { %v4796_v37 = vpop.eup %4795 }
 0x1fb   :  { %v418_v39 = vadd.f32 1.0, %v4796_v37  ;;  %v430_v37 = vld [vmem:[%s6132_s0] sm:$0xff] }
 0x1fd   :  { %4797 = vrcp.f32 %v418_v39 }
 0x1fe   :  { %4799 = vrcp.f32 %v419_v38 }
 0x1ff   :  { %v589_v62 = vpop.xlane.xlu1 %588 }
 0x200   :  { %v591_v1 = vmul.f32 0.03125, %v589_v62 }
 0x202   :  { %v593_v3 = vadd.f32 1e-06, %v591_v1 }
 0x203   :  { %v586_v63 = vpop.xlane.xlu1 %585 }
 0x204   :  { %v590_v0 = vmul.f32 0.03125, %v586_v63 }
 0x206   :  { %v592_v2 = vadd.f32 1e-06, %v590_v0 }
 0x208   :  { %4801 = vrsqrt.f32 %v592_v2 }
 0x209   :  { %4803 = vrsqrt.f32 %v593_v3 }
 0x20a   :  { %v4798_v40 = vpop.eup %4797 }
 0x20b   :  { %v5283_v41 = vmul.f32 %v4798_v40, %v410_v34  ;;  %v4800_v42 = vpop.eup %4799 }
 0x20c   :  { %v5288_v43 = vmul.f32 %v4800_v42, %v411_v31 }
 0x20d   :  { %4119 = vmatmul.mubr.msk.f32.vlgmr.msra.gmra.mxu0 %vm326_vm1, %v5283_v41 }
 0x20e   :  { %564 = vmatprep.mubr.f32.mxu0 %v4923_v24  ;;  %4477 = vmatpush3.msra.mxu0 %v448_v44 }
 0x20f   :  { %4478 = vmatprep.subr.mxu0 %v447_v50 }
 0x210   :  { %4479 = vmatpush3.msra.mxu0 %v447_v50 }
 0x211   :  { %4120 = vmatmul.mubr.msk.f32.gmra.mxu0 %vm326_vm1, %v5288_v43  ;;  %4480 = vmatprep.subr.mxu0 %v446_v52 }
 0x212   :  { %4481 = vmatpush3.msra.mxu0 %v446_v52 }
 0x213   :  { %4482 = vmatprep.subr.mxu0 %v445_v54 }
 0x214   :  { %4483 = vmatpush3.msra.mxu0 %v445_v54 }
 0x215   :  { %v4802_v4 = vpop.eup %4801 }
 0x216   :  { %v596_v5 = vmul.f32 %v4802_v4, %v5238_v9  ;;  %v4804_v6 = vpop.eup %4803  ;;  %v4121_v9 = vld [vmem:[%s6066_s17] ss:$0 sm:$0xff] }
 0x217   :  { %v597_v12 = vmul.f32 %v4804_v6, %v5241_v11  ;;  %v429_v11 = vld [vmem:[%s6130_s13 + $0x8] sm:$0xff] }
 0x2cd   :  { %v560_v55 = vpop.f32.mrf.mxu0 }
 0x2ce   :  { %v5315_v56 = vadd.f32 %v560_v55, %v481_v53  ;;  %v5391_v55 = vld [vmem:[%s6133_s2 + $0x8] sm:$0xff] }
 0x2cf   :  { %v5317_v57 = vpop.f32.mrf.mxu0 }
 0x2d0   :  { %v598_v58 = vadd.f32 1.0, %v5315_v56 }
 0x2d1   :  { %v566_v59 = vpop.f32.mrf.mxu0 }
 0x2d2   :  { %v5320_v60 = vadd.f32 %v566_v59, %v481_v53  ;;  %602 = vrot.lane.b32.xlu0 %v598_v58, %s4924_s29 }
 0x2d3   :  { %v5331_v16 = vpop.f32.mrf.mxu0 }
 0x2d4   :  { %v599_v61 = vadd.f32 1.0, %v5320_v60 }
 0x2d6   :  { %604 = vrot.lane.b32.xlu1 %v599_v61, %s4924_s29  ;;  %v5396_v61 = vld [vmem:[%s6133_s2] sm:$0xff] }
 0x344   :  { %v603_v7 = vpop.permute.xlu0 %602 }
 0x345   :  { %v608_v8 = vmul.f32 %v603_v7, %v596_v5 }
 0x347   :  { %v610_v10 = vadd.f32 %v608_v8, %v5315_v56 }
 0x348   :  { %v605_v13 = vpop.permute.xlu1 %604 }
 0x349   :  { %v609_v14 = vmul.f32 %v605_v13, %v597_v12  ;;  %4484 = vmatprep.mubr.msk.f32.mxu0 %vm326_vm1, %v610_v10 }
 0x34b   :  { %v611_v15 = vadd.f32 %v609_v14, %v5320_v60 }
 0x34d   :  { %4485 = vmatmul.mubr.msk.f32.vlgmr.msra.gmra.mxu0 %vm326_vm1, %v611_v15 }
 0x40d   :  { %v4486_v17 = vpop.f32.mrf.mxu0 }
 0x40e   :  { %v5336_v18 = vadd.f32 %v4486_v17, %v4121_v9 }
 0x40f   :  { %v690_v19 = vpop.f32.mrf.mxu0 }
 0x410   :  { %v5338_v20 = vadd.f32 %v4121_v9, %v690_v19  ;;  %703 = vrot.lane.b32.xlu1 %v5336_v18, %s4925_s12  ;;  %v720_v30 = vmul.f32 %v5336_v18, %v427_v22 }
 0x412   :  { %701 = vrot.lane.b32.xlu0 %v5338_v20, %s4925_s12  ;;  %v719_v38 = vmul.f32 %v5338_v20, %v426_v32 }
 0x414   :  { %712 = vrot.lane.b32.xlu1 %v5336_v18, %s4926_s1 }
 0x418   :  { %710 = vrot.lane.b32.xlu1 %v5338_v20, %s4926_s1 }
 0x482   :  { %v704_v21 = vpop.permute.xlu1 %703 }
 0x483   :  { %v709_v23 = vsel %vm707_vm2, %v704_v21, 0.0 }
 0x484   :  { %v722_v25 = vmul.f32 %v709_v23, %v429_v11  ;;  %v702_v26 = vpop.permute.xlu0 %701  ;;  %v450_v11 = vld [vmem:[%s6067_s18] sm:$0xff] }
 0x485   :  { %v708_v28 = vsel %vm707_vm2, %v702_v26, 0.0 }
 0x486   :  { %v713_v31 = vpop.permute.xlu1 %712  ;;  %v724_v34 = vadd.f32 %v722_v25, %v720_v30  ;;  %v721_v35 = vmul.f32 %v708_v28, %v428_v27 }
 0x487   :  { %v718_v33 = vsel %vm716_vm3, 0.0, %v713_v31 }
 0x488   :  { %v726_v36 = vmul.f32 %v718_v33, %v431_v29  ;;  %v723_v44 = vadd.f32 %v721_v35, %v719_v38 }
 0x48a   :  { %v5371_v39 = vadd.f32 %v726_v36, %v724_v34  ;;  %v711_v40 = vpop.permute.xlu1 %710 }
 0x48b   :  { %v717_v42 = vsel %vm716_vm3, 0.0, %v711_v40 }
 0x48c   :  { %v725_v45 = vmul.f32 %v717_v42, %v430_v37  ;;  %733 = vrot.lane.b32.xlu0 %v5371_v39, %s4924_s29 }
 0x48e   :  { %v5376_v50 = vadd.f32 %v725_v45, %v723_v44 }
 0x490   :  { %731 = vrot.lane.b32.xlu1 %v5376_v50, %s4924_s29  ;;  %4491 = vmatprep.mubr.msk.f32.mxu0 %vm735_vm4, %v5376_v50 }
 0x4fe   :  { %v734_v52 = vpop.permute.xlu0 %733 }
 0x4ff   :  { %4487 = vmatprep.subr.msk.mxu0 %vm735_vm4, %v734_v52 }
 0x500   :  { %4488 = vmatpush3.xpose.msk.msra.mxu0 %vm735_vm4, %v734_v52 }
 0x502   :  { %v732_v53 = vpop.permute.xlu1 %731 }
 0x503   :  { %4489 = vmatprep.subr.msk.mxu0 %vm735_vm4, %v732_v53 }
 0x504   :  { %4490 = vmatpush3.xpose.msk.msra.mxu0 %vm735_vm4, %v732_v53 }
 0x507   :  { %4492 = vmatmul.mubr.msk.f32.vlgmr.msra.gmra.mxu0 %vm735_vm4, %v5371_v39 }
 0x5c7   :  { %v4493_v54 = vpop.f32.mrf.mxu0 }
 0x5c8   :  { %v820_v58 = vmul.f32 0.35355338, %v4493_v54 }
 0x5c9   :  { %v810_v59 = vpop.f32.mrf.mxu0 }
 0x5ca   :  { %v819_v62 = vmul.f32 0.35355338, %v810_v59  ;;  %v822_v63 = vadd.f32 %v820_v58, %v5391_v55 }
 0x5cc   :  { %v826_v0 = vsel %vm101_vm0, %v822_v63, -inf  ;;  %v821_v1 = vadd.f32 %v819_v62, %v5396_v61 }
 0x5cd   :  { %827 = vmax.xlane.f32.xlu1 %v826_v0 }
 0x5ce   :  { %v823_v2 = vsel %vm101_vm0, %v821_v1, -inf }
 0x5cf   :  { %824 = vmax.xlane.f32.xlu0 %v823_v2 }
 0x5de   :  { %845 = vrot.lane.b32.xlu1 %v5338_v20, %s4927_s6 }
 0x5e2   :  { %1027 = vrot.lane.b32.xlu1 %v5371_v39, %s6106_s10 }
 0x5e6   :  { %1025 = vrot.lane.b32.xlu1 %v5376_v50, %s6106_s10  ;;  %s6136_s10 = smov 120  }
 0x5ea   :  { %1023 = vrot.lane.b32.xlu1 %v5371_v39, %s6104_s11 }
 0x5ee   :  { %1312 = vrot.lane.b32.xlu1 %v5376_v50, %s6102_s7 }
 0x5f2   :  { %1310 = vrot.lane.b32.xlu1 %v5371_v39, %s6100_s23 }
 0x656   :  { %v828_v3 = vpop.xlane.xlu1 %827 }
 0x657   :  { %v830_v4 = vsub.f32 %v822_v63, %v828_v3 }
 0x658   :  { %v825_v5 = vpop.xlane.xlu0 %824 }
 0x659   :  { %v833_v6 = vmul.f32 1.442695, %v830_v4  ;;  %v829_v7 = vsub.f32 %v821_v1, %v825_v5 }
 0x65a   :  { %v846_v19 = vpop.permute.xlu1 %845 }
 0x65b   :  { %4805 = vpow2.f32 %v833_v6  ;;  %v831_v8 = vmul.f32 1.442695, %v829_v7 }
 0x65d   :  { %4807 = vpow2.f32 %v831_v8 }
 0x65e   :  { %v1028_v26 = vpop.permute.xlu1 %1027 }
 0x662   :  { %v1026_v29 = vpop.permute.xlu1 %1025 }
 0x666   :  { %v1024_v32 = vpop.permute.xlu1 %1023 }
 0x668   :  { %v4806_v10 = vpop.eup %4805 }
 0x669   :  { %v838_v12 = vsel %vm101_vm0, %v4806_v10, 0.0 }
 0x66a   :  { %v4808_v13 = vpop.eup %4807  ;;  %839 = vadd.xlane.f32.xlu0 %v838_v12  ;;  %v1313_v34 = vpop.permute.xlu1 %1312 }
 0x66b   :  { %v835_v14 = vsel %vm101_vm0, %v4808_v13, 0.0 }
 0x66e   :  { %836 = vadd.xlane.f32.xlu0 %v835_v14  ;;  %v1311_v35 = vpop.permute.xlu1 %1310 }
 0x684   :  { %847 = vrot.lane.b32.xlu0 %v5336_v18, %s4927_s6 }
 0x688   :  { %1021 = vrot.lane.b32.xlu0 %v5376_v50, %s6104_s11  ;;  %s6138_s11 = smov 112  }
 0x68c   :  { %1314 = vrot.lane.b32.xlu0 %v5371_v39, %s6102_s7  ;;  %s6140_s7 = smov 72  }
 0x690   :  { %1308 = vrot.lane.b32.xlu0 %v5376_v50, %s6100_s23  ;;  %s6141_s23 = smov 104  }
 0x6f3   :  { %v840_v15 = vpop.xlane.xlu0 %839 }
 0x6f4   :  { %4809 = vrcp.f32 %v840_v15 }
 0x6f7   :  { %v837_v9 = vpop.xlane.xlu0 %836 }
 0x6f8   :  { %4811 = vrcp.f32 %v837_v9 }
 0x6fb   :  { %v848_v17 = vpop.permute.xlu0 %847 }
 0x6fc   :  { %4494 = vmatprep.subr.mxu0 %v848_v17 }
 0x6fd   :  { %4495 = vmatpush3.msra.mxu0 %v848_v17 }
 0x6fe   :  { %4496 = vmatprep.subr.mxu0 %v846_v19 }
 0x6ff   :  { %4497 = vmatpush3.msra.mxu0 %v846_v19  ;;  %v1022_v27 = vpop.permute.xlu0 %1021 }
 0x700   :  { %4501 = vmatprep.subr.mxu0 %v450_v11 }
 0x701   :  { %v4810_v21 = vpop.eup %4809 }
 0x702   :  { %v844_v25 = vmul.f32 %v4810_v21, %v4806_v10 }
 0x703   :  { %v1315_v31 = vpop.permute.xlu0 %1314 }
 0x705   :  { %v4812_v22 = vpop.eup %4811 }
 0x706   :  { %v843_v23 = vmul.f32 %v4812_v22, %v4808_v13 }
 0x707   :  { %v1309_v33 = vpop.permute.xlu0 %1308 }
 0x708   :  { %4498 = vmatprep.mubr.msk.f32.mxu0 %vm101_vm0, %v843_v23 }
 0x709   :  { %4499 = vmatmul.mubr.msk.f32.vlgmr.msra.gmra.mxu0 %vm101_vm0, %v844_v25 }
 0x70a   :  { %4502 = vmatpush3.msra.mxu0 %v450_v11 }
 0x70b   :  { %4506 = vmatprep.subr.msk.mxu0 %vm735_vm4, %v1028_v26 }
 0x7c9   :  { %v4500_v28 = vpop.f32.mrf.mxu0 }
 0x7cb   :  { %v923_v30 = vpop.f32.mrf.mxu0 }
 0x7cc   :  { %4503 = vmatprep.mubr.msk.f32.mxu0 %vm735_vm4, %v923_v30 }
 0x7cd   :  { %4504 = vmatmul.mubr.msk.f32.vlgmr.msra.gmra.mxu0 %vm735_vm4, %v4500_v28 }
 0x7ce   :  { %4507 = vmatpush3.xpose.msk.msra.mxu0 %vm735_vm4, %v1028_v26  ;;  %4510 = vmatprep.mubr.msk.f32.mxu0 %vm735_vm4, %v1022_v27 }
 0x7cf   :  { %4508 = vmatprep.subr.msk.mxu0 %vm735_vm4, %v1026_v29 }
 0x7d2   :  { %4509 = vmatpush3.xpose.msk.msra.mxu0 %vm735_vm4, %v1026_v29 }
 0x7d3   :  { %4525 = vmatprep.subr.msk.mxu0 %vm735_vm4, %v1315_v31 }
 0x7d5   :  { %4511 = vmatmul.mubr.msk.f32.vlgmr.msra.gmra.mxu0 %vm735_vm4, %v1024_v32 }
 0x7d6   :  { %4526 = vmatpush3.xpose.msk.msra.mxu0 %vm735_vm4, %v1315_v31  ;;  %4529 = vmatprep.mubr.msk.f32.mxu0 %vm735_vm4, %v1309_v33 }
 0x7d7   :  { %4527 = vmatprep.subr.msk.mxu0 %vm735_vm4, %v1313_v34 }
 0x7da   :  { %4528 = vmatpush3.xpose.msk.msra.mxu0 %vm735_vm4, %v1313_v34 }
 0x7dd   :  { %4530 = vmatmul.mubr.msk.f32.vlgmr.msra.gmra.mxu0 %vm735_vm4, %v1311_v35 }
 0x88d   :  { %v5443_v36 = vpop.f32.mrf.mxu0 }
 0x88f   :  { %v5445_v37 = vpop.f32.mrf.mxu0 }
 0x895   :  { %v4512_v38 = vpop.f32.mrf.mxu0 }
 0x896   :  { %v1113_v40 = vmul.f32 0.35355338, %v4512_v38 }
 0x897   :  { %v1103_v42 = vpop.f32.mrf.mxu0 }
 0x898   :  { %v1112_v44 = vmul.f32 0.35355338, %v1103_v42  ;;  %v1115_v45 = vadd.f32 %v1113_v40, %v5391_v55  ;;  %v451_v42 = vld [vmem:[%s6067_s18 + $0x8] sm:$0xff] }
 0x89a   :  { %v1119_v52 = vsel %vm101_vm0, %v1115_v45, -inf  ;;  %v1114_v53 = vadd.f32 %v1112_v44, %v5396_v61 }
 0x89b   :  { %1120 = vmax.xlane.f32.xlu1 %v1119_v52 }
 0x89c   :  { %v1116_v54 = vsel %vm101_vm0, %v1114_v53, -inf }
 0x89d   :  { %1117 = vmax.xlane.f32.xlu0 %v1116_v54  ;;  %v4531_v58 = vpop.f32.mrf.mxu0 }
 0x89e   :  { %v1400_v59 = vmul.f32 0.35355338, %v4531_v58 }
 0x89f   :  { %v1390_v19 = vpop.f32.mrf.mxu0 }
 0x8a0   :  { %v1402_v62 = vadd.f32 %v1400_v59, %v5391_v55  ;;  %v1399_v11 = vmul.f32 0.35355338, %v1390_v19 }
 0x8a2   :  { %v1406_v63 = vsel %vm101_vm0, %v1402_v62, -inf  ;;  %v1401_v21 = vadd.f32 %v1399_v11, %v5396_v61  ;;  %v4132_v11 = vld [vmem:[%s6068_s19] ss:$0 sm:$0xff] }
 0x8a4   :  { %v1403_v22 = vsel %vm101_vm0, %v1401_v21, -inf }
 0x8ac   :  { %1138 = vrot.lane.b32.xlu1 %v5338_v20, %s6098_s5 }
 0x8b0   :  { %1601 = vrot.lane.b32.xlu1 %v5371_v39, %s6096_s9 }
 0x8b4   :  { %1599 = vrot.lane.b32.xlu1 %v5376_v50, %s6096_s9 }
 0x8b8   :  { %1597 = vrot.lane.b32.xlu1 %v5371_v39, %s6090_s3 }
 0x8dc   :  { %1407 = vmax.xlane.f32.xlu1 %v1406_v63 }
 0x8ed   :  { %1425 = vrot.lane.b32.xlu1 %v5338_v20, %s6092_s4 }
 0x924   :  { %v1121_v0 = vpop.xlane.xlu1 %1120 }
 0x925   :  { %v1123_v1 = vsub.f32 %v1115_v45, %v1121_v0 }
 0x926   :  { %v1118_v2 = vpop.xlane.xlu0 %1117 }
 0x927   :  { %v1126_v3 = vmul.f32 1.442695, %v1123_v1  ;;  %v1122_v4 = vsub.f32 %v1114_v53, %v1118_v2 }
 0x928   :  { %v1139_v5 = vpop.permute.xlu1 %1138 }
 0x929   :  { %4813 = vpow2.f32 %v1126_v3  ;;  %v1124_v6 = vmul.f32 1.442695, %v1122_v4 }
 0x92b   :  { %4815 = vpow2.f32 %v1124_v6 }
 0x92c   :  { %v1602_v39 = vpop.permute.xlu1 %1601 }
 0x92d   :  { %4544 = vmatprep.subr.msk.mxu0 %vm735_vm4, %v1602_v39 }
 0x92e   :  { %4545 = vmatpush3.xpose.msk.msra.mxu0 %vm735_vm4, %v1602_v39  ;;  %v452_v39 = vld [vmem:[%s6067_s18 + $0x10] sm:$0xff] }
 0x930   :  { %v1600_v7 = vpop.permute.xlu1 %1599 }
 0x931   :  { %4546 = vmatprep.subr.msk.mxu0 %vm735_vm4, %v1600_v7 }
 0x932   :  { %4547 = vmatpush3.xpose.msk.msra.mxu0 %vm735_vm4, %v1600_v7 }
 0x934   :  { %v1598_v14 = vpop.permute.xlu1 %1597 }
 0x936   :  { %v4814_v8 = vpop.eup %4813 }
 0x937   :  { %v1131_v10 = vsel %vm101_vm0, %v4814_v8, 0.0 }
 0x938   :  { %v4816_v12 = vpop.eup %4815  ;;  %1132 = vadd.xlane.f32.xlu0 %v1131_v10 }
 0x939   :  { %v1128_v13 = vsel %vm101_vm0, %v4816_v12, 0.0 }
 0x93c   :  { %1129 = vadd.xlane.f32.xlu0 %v1128_v13 }
 0x952   :  { %1140 = vrot.lane.b32.xlu0 %v5336_v18, %s6098_s5  ;;  %s6142_s5 = smov 48  }
 0x956   :  { %1595 = vrot.lane.b32.xlu0 %v5376_v50, %s6090_s3  ;;  %s6094_s3 = smov 40  }
 0x965   :  { %v1408_v15 = vpop.xlane.xlu1 %1407 }
 0x966   :  { %v1410_v9 = vsub.f32 %v1402_v62, %v1408_v15 }
 0x968   :  { %v1413_v17 = vmul.f32 1.442695, %v1410_v9 }
 0x96a   :  { %4817 = vpow2.f32 %v1413_v17 }
 0x975   :  { %1404 = vmax.xlane.f32.xlu0 %v1403_v22 }
 0x977   :  { %v4818_v23 = vpop.eup %4817 }
 0x978   :  { %v1418_v25 = vsel %vm101_vm0, %v4818_v23, 0.0 }
 0x979   :  { %1419 = vadd.xlane.f32.xlu0 %v1418_v25 }
 0x9c1   :  { %v1133_v26 = vpop.xlane.xlu0 %1132 }
 0x9c2   :  { %4819 = vrcp.f32 %v1133_v26 }
 0x9c5   :  { %v1130_v27 = vpop.xlane.xlu0 %1129 }
 0x9c6   :  { %4821 = vrcp.f32 %v1130_v27 }
 0x9c9   :  { %v1141_v50 = vpop.permute.xlu0 %1140 }
 0x9ca   :  { %4513 = vmatprep.subr.mxu1 %v1141_v50 }
 0x9cb   :  { %4514 = vmatpush3.msra.mxu1 %v1141_v50 }
 0x9cc   :  { %4515 = vmatprep.subr.mxu1 %v1139_v5 }
 0x9cd   :  { %4516 = vmatpush3.msra.mxu1 %v1139_v5  ;;  %v1596_v28 = vpop.permute.xlu0 %1595 }
 0x9ce   :  { %4548 = vmatprep.mubr.msk.f32.mxu0 %vm735_vm4, %v1596_v28  ;;  %4520 = vmatprep.subr.mxu1 %v451_v42 }
 0x9cf   :  { %4549 = vmatmul.mubr.msk.f32.vlgmr.msra.gmra.mxu0 %vm735_vm4, %v1598_v14  ;;  %v4820_v29 = vpop.eup %4819 }
 0x9d0   :  { %v1137_v32 = vmul.f32 %v4820_v29, %v4814_v8 }
 0x9d3   :  { %v4822_v30 = vpop.eup %4821 }
 0x9d4   :  { %v1136_v31 = vmul.f32 %v4822_v30, %v4816_v12 }
 0x9d6   :  { %4517 = vmatprep.mubr.msk.f32.mxu1 %vm101_vm0, %v1136_v31 }
 0x9d7   :  { %4518 = vmatmul.mubr.msk.f32.vlgmr.msra.gmra.mxu1 %vm101_vm0, %v1137_v32 }
 0x9d8   :  { %4521 = vmatpush3.msra.mxu1 %v451_v42 }
 0x9fe   :  { %v1405_v33 = vpop.xlane.xlu0 %1404 }
 0x9ff   :  { %v1409_v34 = vsub.f32 %v1401_v21, %v1405_v33  ;;  %v1020_v21 = vadd.f32 %v5443_v36, %v4132_v11  ;;  %v453_v36 = vld [vmem:[%s6067_s18 + $0x18] sm:$0xff] }
 0xa01   :  { %v1411_v35 = vmul.f32 1.442695, %v1409_v34 }
 0xa02   :  { %v1420_v63 = vpop.xlane.xlu0 %1419 }
 0xa03   :  { %4823 = vpow2.f32 %v1411_v35 }
 0xa04   :  { %4825 = vrcp.f32 %v1420_v63 }
 0xa10   :  { %v4824_v38 = vpop.eup %4823 }
 0xa11   :  { %v1415_v40 = vsel %vm101_vm0, %v4824_v38, 0.0 }
 0xa12   :  { %1416 = vadd.xlane.f32.xlu0 %v1415_v40 }
 0xa28   :  { %1427 = vrot.lane.b32.xlu0 %v5336_v18, %s6092_s4  ;;  %s4937_s4 = smov 32  }
 0xa8f   :  { %v4550_v44 = vpop.f32.mrf.mxu0 }
 0xa90   :  { %v1687_v45 = vmul.f32 0.35355338, %v4550_v44 }
 0xa91   :  { %v1677_v52 = vpop.f32.mrf.mxu0 }
 0xa92   :  { %v1686_v53 = vmul.f32 0.35355338, %v1677_v52  ;;  %v1689_v54 = vadd.f32 %v1687_v45, %v5391_v55  ;;  %v1426_v55 = vpop.permute.xlu1 %1425 }
 0xa94   :  { %v1693_v58 = vsel %vm101_vm0, %v1689_v54, -inf  ;;  %v1688_v59 = vadd.f32 %v1686_v53, %v5396_v61  ;;  %v4826_v61 = vpop.eup %4825 }
 0xa95   :  { %1694 = vmax.xlane.f32.xlu0 %v1693_v58  ;;  %v1424_v6 = vmul.f32 %v4826_v61, %v4818_v23  ;;  %v1019_v23 = vadd.f32 %v4132_v11, %v5445_v37 }
 0xa96   :  { %v1690_v62 = vsel %vm101_vm0, %v1688_v59, -inf }
 0xa97   :  { %v4519_v0 = vpop.f32.mrf.mxu1  ;;  %1691 = vmax.xlane.f32.xlu1 %v1690_v62 }
 0xa99   :  { %v1216_v1 = vpop.f32.mrf.mxu1 }
 0xa9a   :  { %4522 = vmatprep.mubr.msk.f32.mxu1 %vm735_vm4, %v1216_v1 }
 0xa9b   :  { %4523 = vmatmul.mubr.msk.f32.vlgmr.msra.gmra.mxu1 %vm735_vm4, %v4519_v0  ;;  %v1417_v2 = vpop.xlane.xlu0 %1416 }
 0xa9c   :  { %4827 = vrcp.f32 %v1417_v2 }
 0xa9f   :  { %v1428_v3 = vpop.permute.xlu0 %1427 }
 0xaa0   :  { %4532 = vmatprep.subr.mxu1 %v1428_v3 }
 0xaa1   :  { %4533 = vmatpush3.msra.mxu1 %v1428_v3 }
 0xaa2   :  { %4534 = vmatprep.subr.mxu1 %v1426_v55 }
 0xaa3   :  { %4535 = vmatpush3.msra.mxu1 %v1426_v55 }
 0xaa4   :  { %4539 = vmatprep.subr.mxu1 %v452_v39 }
 0xaa9   :  { %v4828_v4 = vpop.eup %4827 }
 0xaaa   :  { %v1423_v5 = vmul.f32 %v4828_v4, %v4824_v38 }
 0xaac   :  { %4536 = vmatprep.mubr.msk.f32.mxu1 %vm101_vm0, %v1423_v5 }
 0xaad   :  { %4537 = vmatmul.mubr.msk.f32.vlgmr.msra.gmra.mxu1 %vm101_vm0, %v1424_v6 }
 0xaae   :  { %4540 = vmatpush3.msra.mxu1 %v452_v39 }
 0xb1e   :  { %v1695_v7 = vpop.xlane.xlu0 %1694 }
 0xb1f   :  { %v1697_v8 = vsub.f32 %v1689_v54, %v1695_v7 }
 0xb20   :  { %v1692_v10 = vpop.xlane.xlu1 %1691 }
 0xb21   :  { %v1700_v12 = vmul.f32 1.442695, %v1697_v8  ;;  %v1696_v13 = vsub.f32 %v1688_v59, %v1692_v10 }
 0xb23   :  { %4829 = vpow2.f32 %v1700_v12  ;;  %v1698_v14 = vmul.f32 1.442695, %v1696_v13  ;;  %v457_v13 = vld [vmem:[%s6069_s20 + $0x10] sm:$0xff] }
 0xb25   :  { %4831 = vpow2.f32 %v1698_v14  ;;  %v456_v14 = vld [vmem:[%s6069_s20 + $0x8] sm:$0xff] }
 0xb30   :  { %v4830_v15 = vpop.eup %4829 }
 0xb31   :  { %v1705_v9 = vsel %vm101_vm0, %v4830_v15, 0.0 }
 0xb32   :  { %v4832_v17 = vpop.eup %4831  ;;  %1706 = vadd.xlane.f32.xlu1 %v1705_v9 }
 0xb33   :  { %v1702_v19 = vsel %vm101_vm0, %v4832_v17, 0.0 }
 0xb34   :  { %1703 = vadd.xlane.f32.xlu0 %v1702_v19 }
 0xb43   :  { %1712 = vrot.lane.b32.xlu1 %v5338_v20, %s6094_s3 }
 0xb4a   :  { %1714 = vrot.lane.b32.xlu0 %v5336_v18, %s6094_s3  ;;  %s4939_s3 = smov [#allocation2]  }
 0xb5b   :  { %v4524_v22 = vpop.f32.mrf.mxu1 }
 0xb5c   :  { %v1307_v25 = vadd.f32 %v4524_v22, %v1020_v21  ;;  %v484_v22 = vsub.s32 1, %v5295_v46 }
 0xb5d   :  { %v1297_v26 = vpop.f32.mrf.mxu1 }
 0xb5e   :  { %v1306_v27 = vadd.f32 %v1297_v26, %v1019_v23 }
 0xb6d   :  { %v4538_v50 = vpop.f32.mrf.mxu1 }
 0xb6f   :  { %v1503_v28 = vpop.f32.mrf.mxu1 }
 0xb70   :  { %4541 = vmatprep.mubr.msk.f32.mxu1 %vm735_vm4, %v1503_v28 }
 0xb71   :  { %4542 = vmatmul.mubr.msk.f32.vlgmr.msra.gmra.mxu1 %vm735_vm4, %v4538_v50 }
 0xbbb   :  { %v1707_v20 = vpop.xlane.xlu1 %1706 }
 0xbbc   :  { %4833 = vrcp.f32 %v1707_v20 }
 0xbbd   :  { %v1704_v18 = vpop.xlane.xlu0 %1703 }
 0xbbe   :  { %4835 = vrcp.f32 %v1704_v18 }
 0xbbf   :  { %v1713_v30 = vpop.permute.xlu1 %1712 }
 0xbc1   :  { %v1715_v29 = vpop.permute.xlu0 %1714 }
 0xbc2   :  { %4551 = vmatprep.subr.mxu1 %v1715_v29 }
 0xbc3   :  { %4552 = vmatpush3.msra.mxu1 %v1715_v29 }
 0xbc4   :  { %4553 = vmatprep.subr.mxu1 %v1713_v30 }
 0xbc5   :  { %4554 = vmatpush3.msra.mxu1 %v1713_v30 }
 0xbc6   :  { %4558 = vmatprep.subr.mxu1 %v453_v36 }
 0xbc9   :  { %v4834_v37 = vpop.eup %4833 }
 0xbca   :  { %v1711_v33 = vmul.f32 %v4834_v37, %v4830_v15  ;;  %v4168_v15 = vld [vmem:[%s6063_s14 + $0x78] sm:$0xff] }
 0xbcb   :  { %v4836_v31 = vpop.eup %4835 }
 0xbcc   :  { %v1710_v32 = vmul.f32 %v4836_v31, %v4832_v17 }
 0xbce   :  { %4555 = vmatprep.mubr.msk.f32.mxu1 %vm101_vm0, %v1710_v32 }
 0xbcf   :  { %4556 = vmatmul.mubr.msk.f32.vlgmr.msra.gmra.mxu1 %vm101_vm0, %v1711_v33  ;;  %v4167_v33 = vld [vmem:[%s6063_s14 + $0x70] sm:$0xff] }
 0xbd0   :  { %4559 = vmatpush3.msra.mxu1 %v453_v36 }
 0xc31   :  { %v4543_v34 = vpop.f32.mrf.mxu1 }
 0xc32   :  { %v1594_v35 = vadd.f32 %v4543_v34, %v1307_v25  ;;  %v485_v25 = vrot.slane %v5304_v51, %v484_v22  ;;  %v4165_v34 = vld [vmem:[%s6063_s14 + $0x60] sm:$0xff] }
 0xc33   :  { %v1584_v38 = vpop.f32.mrf.mxu1 }
 0xc34   :  { %v1593_v45 = vadd.f32 %v1584_v38, %v1306_v27  ;;  %v5561_v26 = vadd.f32 %v5317_v57, %v485_v25  ;;  %v5565_v28 = vadd.f32 %v5331_v16, %v485_v25  ;;  %v4166_v16 = vld [vmem:[%s6063_s14 + $0x68] sm:$0xff]  ;;  %v4163_v38 = vld [vmem:[%s6063_s14 + $0x50] sm:$0xff] }
 0xc36   :  { %v1928_v50 = vadd.f32 1.0, %v5561_v26  ;;  %v1929_v36 = vadd.f32 1.0, %v5565_v28 }
 0xc8f   :  { %v4557_v40 = vpop.f32.mrf.mxu1 }
 0xc91   :  { %v1790_v42 = vpop.f32.mrf.mxu1 }
 0xc92   :  { %4560 = vmatprep.mubr.msk.f32.mxu1 %vm735_vm4, %v1790_v42  ;;  %v4161_v42 = vld [vmem:[%s6063_s14 + $0x40] sm:$0xff] }
 0xc93   :  { %4561 = vmatmul.mubr.msk.f32.vlgmr.msra.gmra.mxu1 %vm735_vm4, %v4557_v40  ;;  %v4162_v40 = vld [vmem:[%s6063_s14 + $0x48] sm:$0xff] }
 0xd53   :  { %v4562_v44 = vpop.f32.mrf.mxu1 }
 0xd54   :  { %v1881_v54 = vadd.f32 %v4562_v44, %v1594_v35  ;;  %v4164_v35 = vld [vmem:[%s6063_s14 + $0x58] sm:$0xff] }
 0xd55   :  { %v1871_v52 = vpop.f32.mrf.mxu1  ;;  %v475_v44 = vld [vmem:[%s6071_s22 + $0x78] sm:$0xff] }
 0xd56   :  { %v1880_v53 = vadd.f32 %v1871_v52, %v1593_v45  ;;  %4574 = vmatprep.subr.mxu1 %v475_v44  ;;  %v474_v45 = vld [vmem:[%s6071_s22 + $0x70] sm:$0xff]  ;;  %v473_v52 = vld [vmem:[%s6071_s22 + $0x68] sm:$0xff] }
 0xd57   :  { %4575 = vmatpush3.msra.mxu1 %v475_v44 }
 0xd58   :  { %1884 = vrot.lane.b32.xlu1 %v1880_v53, %s4927_s6  ;;  %4576 = vmatprep.subr.mxu1 %v474_v45  ;;  %v471_v53 = vld [vmem:[%s6071_s22 + $0x58] sm:$0xff] }
 0xd59   :  { %4577 = vmatpush3.msra.mxu1 %v474_v45 }
 0xd5a   :  { %4578 = vmatprep.subr.mxu1 %v473_v52 }
 0xd5b   :  { %4579 = vmatpush3.msra.mxu1 %v473_v52 }
 0xd5c   :  { %1886 = vrot.lane.b32.xlu1 %v1881_v54, %s4927_s6  ;;  %v470_v54 = vld [vmem:[%s6071_s22 + $0x50] sm:$0xff] }
 0xdca   :  { %v1885_v58 = vpop.permute.xlu1 %1884 }
 0xdcb   :  { %v1890_v59 = vmul.f32 %v1885_v58, %v5315_v56  ;;  %v469_v58 = vld [vmem:[%s6071_s22 + $0x48] sm:$0xff] }
 0xdcd   :  { %1894 = vrot.lane.b32.xlu0 %v1890_v59, %s4927_s6  ;;  %v468_v59 = vld [vmem:[%s6071_s22 + $0x40] sm:$0xff] }
 0xdce   :  { %v1887_v62 = vpop.permute.xlu1 %1886 }
 0xdcf   :  { %v1891_v63 = vmul.f32 %v1887_v62, %v5320_v60  ;;  %v467_v62 = vld [vmem:[%s6071_s22 + $0x38] sm:$0xff] }
 0xdd1   :  { %1896 = vrot.lane.b32.xlu1 %v1891_v63, %s4927_s6  ;;  %v466_v63 = vld [vmem:[%s6071_s22 + $0x30] sm:$0xff] }
 0xe3f   :  { %v1895_v0 = vpop.permute.xlu0 %1894 }
 0xe40   :  { %v5524_v1 = vadd.f32 %v1895_v0, %v5226_v48  ;;  %v465_v0 = vld [vmem:[%s6071_s22 + $0x28] sm:$0xff] }
 0xe42   :  { %v1902_v2 = vsel %vm326_vm1, %v5524_v1, 0.0 }
 0xe43   :  { %1903 = vadd.xlane.f32.xlu0 %v1902_v2  ;;  %v1897_v3 = vpop.permute.xlu1 %1896  ;;  %v464_v2 = vld [vmem:[%s6071_s22 + $0x20] sm:$0xff] }
 0xe44   :  { %v5529_v55 = vadd.f32 %v1897_v3, %v5224_v47  ;;  %v463_v3 = vld [vmem:[%s6071_s22 + $0x18] sm:$0xff] }
 0xe46   :  { %v1905_v61 = vsel %vm326_vm1, %v5529_v55, 0.0 }
 0xe47   :  { %1906 = vadd.xlane.f32.xlu1 %v1905_v61  ;;  %v462_v61 = vld [vmem:[%s6071_s22 + $0x10] sm:$0xff] }
 0xe58   :  { %1936 = vrot.lane.b32.xlu1 %v5320_v60, %s4937_s4  ;;  %v458_v60 = vld [vmem:[%s6069_s20 + $0x18] sm:$0xff] }
 0xe59   :  { %4563 = vmatprep.subr.mxu0 %v458_v60 }
 0xe5a   :  { %4564 = vmatpush3.msra.mxu0 %v458_v60 }
 0xe5b   :  { %4565 = vmatprep.subr.mxu0 %v457_v13 }
 0xe5c   :  { %4566 = vmatpush3.msra.mxu0 %v457_v13 }
 0xe5d   :  { %4567 = vmatprep.subr.mxu0 %v456_v14 }
 0xe5e   :  { %4568 = vmatpush3.msra.mxu0 %v456_v14 }
 0xecc   :  { %v1904_v4 = vpop.xlane.xlu0 %1903 }
 0xecd   :  { %v1908_v5 = vmul.f32 0.03125, %v1904_v4  ;;  %v461_v4 = vld [vmem:[%s6071_s22 + $0x8] sm:$0xff] }
 0xecf   :  { %v1910_v48 = vsub.f32 %v5524_v1, %v1908_v5  ;;  %v460_v5 = vld [vmem:[%s6071_s22] sm:$0xff] }
 0xed0   :  { %v1907_v6 = vpop.xlane.xlu1 %1906 }
 0xed1   :  { %v1909_v39 = vmul.f32 0.03125, %v1907_v6  ;;  %v1912_v7 = vmul.f32 %v1910_v48, %v1910_v48 }
 0xed3   :  { %v1911_v8 = vsub.f32 %v5529_v55, %v1909_v39  ;;  %v1914_v47 = vsel %vm326_vm1, %v1912_v7, 0.0 }
 0xed4   :  { %1915 = vadd.xlane.f32.xlu0 %v1914_v47  ;;  %v1937_v32 = vpop.permute.xlu1 %1936 }
 0xed5   :  { %v1913_v10 = vmul.f32 %v1911_v8, %v1911_v8 }
 0xed7   :  { %v1917_v12 = vsel %vm326_vm1, %v1913_v10, 0.0 }
 0xed8   :  { %1918 = vadd.xlane.f32.xlu0 %v1917_v12 }
 0xeee   :  { %1934 = vrot.lane.b32.xlu0 %v5315_v56, %s4937_s4  ;;  %v455_v56 = vld [vmem:[%s6069_s20] sm:$0xff] }
 0xeef   :  { %4569 = vmatprep.subr.mxu0 %v455_v56 }
 0xef0   :  { %4570 = vmatpush3.msra.mxu0 %v455_v56 }
 0xef1   :  { %2234 = vmatprep.subr.mxu0 %v4168_v15 }
 0xf5d   :  { %v1916_v9 = vpop.xlane.xlu0 %1915 }
 0xf5e   :  { %v1920_v17 = vmul.f32 0.03125, %v1916_v9 }
 0xf60   :  { %v1922_v19 = vadd.f32 1e-06, %v1920_v17 }
 0xf61   :  { %v1919_v11 = vpop.xlane.xlu0 %1918 }
 0xf62   :  { %4837 = vrsqrt.f32 %v1922_v19  ;;  %v1921_v21 = vmul.f32 0.03125, %v1919_v11 }
 0xf64   :  { %v1923_v23 = vadd.f32 1e-06, %v1921_v21 }
 0xf65   :  { %v1935_v30 = vpop.permute.xlu0 %1934 }
 0xf66   :  { %4839 = vrsqrt.f32 %v1923_v23 }
 0xf6f   :  { %v4838_v27 = vpop.eup %4837 }
 0xf70   :  { %v1926_v20 = vmul.f32 %v4838_v27, %v1910_v48  ;;  %v4157_v48 = vld [vmem:[%s6070_s21] ss:$0 sm:$0xff] }
 0xf72   :  { %v1930_v18 = vmul.f32 %v1928_v50, %v1926_v20 }
 0xf73   :  { %v4840_v29 = vpop.eup %4839 }
 0xf74   :  { %v1927_v37 = vmul.f32 %v4840_v29, %v1911_v8  ;;  %v1940_v31 = vadd.f32 %v1935_v30, %v1930_v18  ;;  %v4169_v8 = vld [vmem:[%s6064_s15 + $0x2] sm:$0x3] }
 0xf75   :  { %v2203_v13 = vrot.slane %v4169_v8, %v480_v49  ;;  %v5655_v15 = vrot.slane %v4169_v8, %v484_v22 }
 0xf76   :  { %4571 = vmatprep.mubr.msk.f32.mxu0 %vm326_vm1, %v1940_v31  ;;  %v1931_v51 = vmul.f32 %v1929_v36, %v1927_v37  ;;  %v4160_v31 = vld [vmem:[%s6134_s8] ss:$0 sm:$0xff] }
 0xf78   :  { %v1941_v57 = vadd.f32 %v1937_v32, %v1931_v51 }
 0xf7a   :  { %4572 = vmatmul.mubr.msk.f32.vlgmr.msra.gmra.mxu0 %vm326_vm1, %v1941_v57 }
 0xf7b   :  { %2235 = vmatpush1.msra.mxu0 %v4167_v33  ;;  %2274 = vmatprep.mubr.f32.mxu0 %v4923_v24 }
 0xf7c   :  { %2236 = vmatprep.subr.mxu0 %v4166_v16 }
 0xf7d   :  { %2237 = vmatpush1.msra.mxu0 %v4165_v34 }
 0xf7e   :  { %2238 = vmatprep.subr.mxu0 %v4164_v35 }
 0xf7f   :  { %2239 = vmatpush1.msra.mxu0 %v4163_v38 }
 0xf80   :  { %2240 = vmatprep.subr.mxu0 %v4162_v40 }
 0xf81   :  { %2241 = vmatpush1.msra.mxu0 %v4161_v42 }
 0xf82   :  { %4202 = vmatmul.mubr.msk.f32.vlgmr.msra.gmra.mxu0 %vm326_vm1, %v5283_v41 }
 0xf83   :  { %2280 = vmatprep.mubr.f32.mxu0 %v4923_v24  ;;  %v472_v24 = vld [vmem:[%s6071_s22 + $0x60] sm:$0xff] }
 0xf84   :  { %4580 = vmatprep.subr.mxu1 %v472_v24 }
 0xf85   :  { %4581 = vmatpush3.msra.mxu1 %v472_v24 }
 0xf86   :  { %4203 = vmatmul.mubr.msk.f32.gmra.mxu0 %vm326_vm1, %v5288_v43  ;;  %4582 = vmatprep.subr.mxu1 %v471_v53 }
 0xf87   :  { %4583 = vmatpush3.msra.mxu1 %v471_v53 }
 0xf88   :  { %4584 = vmatprep.subr.mxu1 %v470_v54 }
 0xf89   :  { %4585 = vmatpush3.msra.mxu1 %v470_v54 }
 0xf8a   :  { %4586 = vmatprep.subr.mxu1 %v469_v58 }
 0xf8b   :  { %4587 = vmatpush3.msra.mxu1 %v469_v58 }
 0xf8c   :  { %4588 = vmatprep.subr.mxu1 %v468_v59 }
 0xf8d   :  { %4589 = vmatpush3.msra.mxu1 %v468_v59 }
 0xf8e   :  { %4590 = vmatprep.subr.mxu1 %v467_v62 }
 0xf8f   :  { %4591 = vmatpush3.msra.mxu1 %v467_v62 }
 0xf90   :  { %4592 = vmatprep.subr.mxu1 %v466_v63 }
 0xf91   :  { %4593 = vmatpush3.msra.mxu1 %v466_v63 }
 0xf92   :  { %4594 = vmatprep.subr.mxu1 %v465_v0 }
 0xf93   :  { %4595 = vmatpush3.msra.mxu1 %v465_v0 }
 0xf94   :  { %4596 = vmatprep.subr.mxu1 %v464_v2 }
 0xf95   :  { %4597 = vmatpush3.msra.mxu1 %v464_v2 }
 0xf96   :  { %4598 = vmatprep.subr.mxu1 %v463_v3 }
 0xf97   :  { %4599 = vmatpush3.msra.mxu1 %v463_v3 }
 0xf98   :  { %4600 = vmatprep.subr.mxu1 %v462_v61 }
 0xf99   :  { %4601 = vmatpush3.msra.mxu1 %v462_v61  ;;  %v4173_v61 = vld [vmem:[%s6065_s16 + $0x38] sm:$0xff] }
 0xf9a   :  { %4602 = vmatprep.subr.mxu1 %v461_v4  ;;  %4609 = vmatprep.subr.mxu0 %v4173_v61 }
 0xf9b   :  { %4603 = vmatpush3.msra.mxu1 %v461_v4  ;;  %4610 = vmatpush3.msra.mxu0 %v4173_v61  ;;  %v4172_v4 = vld [vmem:[%s6065_s16 + $0x30] sm:$0xff]  ;;  %v5767_v61 = vld [vmem:[%s6133_s2 + $0x8] sm:$0xff] }
 0xf9c   :  { %4604 = vmatprep.subr.mxu1 %v460_v5  ;;  %4611 = vmatprep.subr.mxu0 %v4172_v4 }
 0xf9d   :  { %4605 = vmatpush3.msra.mxu1 %v460_v5  ;;  %4612 = vmatpush3.msra.mxu0 %v4172_v4  ;;  %v4171_v5 = vld [vmem:[%s6065_s16 + $0x28] sm:$0xff] }
 0xf9e   :  { %4613 = vmatprep.subr.mxu0 %v4171_v5 }
 0xf9f   :  { %4614 = vmatpush3.msra.mxu0 %v4171_v5 }
0x103a   :  { %v4573_v6 = vpop.f32.mrf.mxu0 }
0x103b   :  { %v2026_v39 = vadd.f32 %v4573_v6, %v4157_v48 }
0x103c   :  { %v2020_v7 = vpop.f32.mrf.mxu0 }
0x103d   :  { %v2030_v47 = vmul.f32 %v2026_v39, %v2026_v39  ;;  %v2021_v10 = vadd.f32 %v4157_v48, %v2020_v7  ;;  %v4170_v48 = vld [vmem:[%s6065_s16 + $0x20] sm:$0xff] }
0x103e   :  { %4615 = vmatprep.subr.mxu0 %v4170_v48 }
0x103f   :  { %v2032_v12 = vmul.f32 %v2030_v47, %v2026_v39  ;;  %v2029_v60 = vmul.f32 %v2021_v10, %v2021_v10  ;;  %4616 = vmatpush3.msra.mxu0 %v4170_v48  ;;  %v5774_v48 = vld [vmem:[%s6133_s2] sm:$0xff]  ;;  %s6137_s2 = smov 80  }
0x1041   :  { %v2034_v14 = vmul.f32 0.044715, %v2032_v12  ;;  %v2031_v56 = vmul.f32 %v2029_v60, %v2021_v10 }
0x1042   :  { %v2276_v9 = vpop.f32.mrf.mxu0 }
0x1043   :  { %v2036_v17 = vadd.f32 %v2034_v14, %v2026_v39  ;;  %v2033_v19 = vmul.f32 0.044715, %v2031_v56  ;;  %v5657_v11 = vadd.f32 %v2276_v9, %v2203_v13 }
0x1044   :  { %v2278_v21 = vpop.f32.mrf.mxu0 }
0x1045   :  { %v2038_v23 = vmul.f32 0.7978846, %v2036_v17  ;;  %v2035_v25 = vadd.f32 %v2033_v19, %v2021_v10  ;;  %v5660_v27 = vadd.f32 %v2278_v21, %v5655_v15  ;;  %v2313_v3 = vadd.f32 1.0, %v5657_v11 }
0x1046   :  { %v2282_v52 = vpop.f32.mrf.mxu0 }
0x1047   :  { %4841 = vtanh.f32 %v2038_v23  ;;  %v2037_v50 = vmul.f32 0.7978846, %v2035_v25 }
0x1048   :  { %v5707_v25 = vpop.f32.mrf.mxu0 }
0x1049   :  { %4843 = vtanh.f32 %v2037_v50  ;;  %v4204_v50 = vld [vmem:[%s6066_s17 + $0x1] ss:$0 sm:$0xff]  ;;  %s6135_s17 = smov 88  }
0x1054   :  { %v4842_v49 = vpop.eup %4841 }
0x1055   :  { %v2042_v20 = vadd.f32 1.0, %v4842_v49 }
0x1056   :  { %v4844_v18 = vpop.eup %4843 }
0x1057   :  { %v2041_v46 = vadd.f32 1.0, %v4844_v18  ;;  %v2044_v22 = vmul.f32 0.5, %v2042_v20 }
0x1059   :  { %v2043_v29 = vmul.f32 0.5, %v2041_v46  ;;  %v2046_v36 = vmul.f32 %v2044_v22, %v2026_v39 }
0x105b   :  { %v2045_v30 = vmul.f32 %v2043_v29, %v2021_v10 }
0x105d   :  { %4606 = vmatprep.mubr.f32.mxu1 %v2045_v30  ;;  %v4893_v30 = vld [vmem:[%s6130_s13 + $0x8] sm:$0xff] }
0x105e   :  { %4607 = vmatmul.mubr.f32.vlgmr.msra.gmra.mxu1 %v2046_v36 }
0x111e   :  { %v4608_v37 = vpop.f32.mrf.mxu1 }
0x111f   :  { %v2125_v57 = vadd.f32 %v4608_v37, %v4160_v31 }
0x1120   :  { %v2119_v51 = vpop.f32.mrf.mxu1 }
0x1121   :  { %v2120_v32 = vadd.f32 %v4160_v31, %v2119_v51  ;;  %v4894_v51 = vld [vmem:[%s6131_s30 + $0x8] sm:$0xff] }
0x1123   :  { %2130 = vrot.lane.b32.xlu1 %v2120_v32, %s4937_s4 }
0x1127   :  { %2132 = vrot.lane.b32.xlu1 %v2125_v57, %s4937_s4 }
0x1195   :  { %v2131_v33 = vpop.permute.xlu1 %2130 }
0x1196   :  { %v2136_v16 = vmul.f32 %v2131_v33, %v5561_v26 }
0x1198   :  { %2140 = vrot.lane.b32.xlu0 %v2136_v16, %s4924_s29 }
0x1199   :  { %v2133_v34 = vpop.permute.xlu1 %2132 }
0x119a   :  { %v2137_v35 = vmul.f32 %v2133_v34, %v5565_v28  ;;  %v5681_v28 = vadd.f32 %v2282_v52, %v2203_v13  ;;  %v4895_v34 = vld [vmem:[%s6130_s13] sm:$0xff]  ;;  %s6144_s13 = sld [smem:[#allocation12_spill]] }
0x119c   :  { %2142 = vrot.lane.b32.xlu1 %v2137_v35, %s4924_s29  ;;  %v2314_v24 = vadd.f32 1.0, %v5681_v28 }
0x120a   :  { %v2141_v38 = vpop.permute.xlu0 %2140 }
0x120b   :  { %v5672_v40 = vadd.f32 %v2141_v38, %v5524_v1  ;;  %v4896_v38 = vld [vmem:[%s6132_s0 + $0x8] sm:$0xff] }
0x120d   :  { %v2287_v42 = vsel %vm326_vm1, %v5672_v40, 0.0 }
0x120e   :  { %2288 = vadd.xlane.f32.xlu0 %v2287_v42  ;;  %v2143_v44 = vpop.permute.xlu1 %2142 }
0x120f   :  { %v5677_v45 = vadd.f32 %v2143_v44, %v5529_v55  ;;  %v4897_v44 = vld [vmem:[%s6131_s30] sm:$0xff] }
0x1211   :  { %v2290_v26 = vsel %vm326_vm1, %v5677_v45, 0.0 }
0x1212   :  { %2291 = vadd.xlane.f32.xlu1 %v2290_v26 }
0x1223   :  { %2319 = vrot.lane.b32.xlu1 %v2314_v24, %s4924_s29 }
0x1297   :  { %v2289_v1 = vpop.xlane.xlu0 %2288 }
0x1298   :  { %v2293_v53 = vmul.f32 0.03125, %v2289_v1 }
0x129a   :  { %v2295_v54 = vsub.f32 %v5672_v40, %v2293_v53 }
0x129b   :  { %v2292_v58 = vpop.xlane.xlu1 %2291 }
0x129c   :  { %v2294_v59 = vmul.f32 0.03125, %v2292_v58  ;;  %v2297_v62 = vmul.f32 %v2295_v54, %v2295_v54 }
0x129e   :  { %v2296_v55 = vsub.f32 %v5677_v45, %v2294_v59  ;;  %v2299_v63 = vsel %vm326_vm1, %v2297_v62, 0.0 }
0x129f   :  { %2300 = vadd.xlane.f32.xlu0 %v2299_v63  ;;  %v2320_v19 = vpop.permute.xlu1 %2319 }
0x12a0   :  { %v2298_v0 = vmul.f32 %v2296_v55, %v2296_v55 }
0x12a2   :  { %v2302_v2 = vsel %vm326_vm1, %v2298_v0, 0.0 }
0x12a3   :  { %2303 = vadd.xlane.f32.xlu0 %v2302_v2 }
0x12b9   :  { %2317 = vrot.lane.b32.xlu0 %v2313_v3, %s4924_s29 }
0x1328   :  { %v2301_v6 = vpop.xlane.xlu0 %2300 }
0x1329   :  { %v2305_v39 = vmul.f32 0.03125, %v2301_v6 }
0x132b   :  { %v2307_v7 = vadd.f32 1e-06, %v2305_v39 }
0x132c   :  { %v2304_v8 = vpop.xlane.xlu0 %2303 }
0x132d   :  { %4845 = vrsqrt.f32 %v2307_v7  ;;  %v2306_v47 = vmul.f32 0.03125, %v2304_v8 }
0x132f   :  { %v2308_v10 = vadd.f32 1e-06, %v2306_v47 }
0x1330   :  { %v2318_v13 = vpop.permute.xlu0 %2317 }
0x1331   :  { %4847 = vrsqrt.f32 %v2308_v10 }
0x133a   :  { %v4846_v12 = vpop.eup %4845 }
0x133b   :  { %v2311_v60 = vmul.f32 %v4846_v12, %v2295_v54  ;;  %v4898_v54 = vld [vmem:[%s6132_s0] sm:$0xff]  ;;  %s6143_s0 = smov 40  }
0x133d   :  { %v2323_v14 = vmul.f32 %v2318_v13, %v2311_v60 }
0x133e   :  { %v4848_v56 = vpop.eup %4847 }
0x133f   :  { %v2312_v9 = vmul.f32 %v4848_v56, %v2296_v55  ;;  %v2325_v17 = vadd.f32 %v2323_v14, %v5657_v11 }
0x1341   :  { %v2324_v21 = vmul.f32 %v2320_v19, %v2312_v9  ;;  %4617 = vmatprep.mubr.msk.f32.mxu0 %vm326_vm1, %v2325_v17 }
0x1343   :  { %v2326_v23 = vadd.f32 %v2324_v21, %v5681_v28 }
0x1345   :  { %4618 = vmatmul.mubr.msk.f32.vlgmr.msra.gmra.mxu0 %vm326_vm1, %v2326_v23 }
0x1405   :  { %v4619_v49 = vpop.f32.mrf.mxu0 }
0x1406   :  { %v5712_v20 = vadd.f32 %v4619_v49, %v4204_v50 }
0x1407   :  { %v2405_v18 = vpop.f32.mrf.mxu0 }
0x1408   :  { %v5714_v46 = vadd.f32 %v4204_v50, %v2405_v18  ;;  %2418 = vrot.lane.b32.xlu1 %v5712_v20, %s4925_s12  ;;  %v2433_v32 = vmul.f32 %v4894_v51, %v5712_v20 }
0x140a   :  { %2416 = vrot.lane.b32.xlu0 %v5714_v46, %s4925_s12  ;;  %v2432_v26 = vmul.f32 %v4897_v44, %v5714_v46 }
0x140c   :  { %2426 = vrot.lane.b32.xlu1 %v5712_v20, %s4926_s1 }
0x1410   :  { %2424 = vrot.lane.b32.xlu1 %v5714_v46, %s4926_s1  ;;  %s6139_s1 = smov 56  }
0x147a   :  { %v2419_v22 = vpop.permute.xlu1 %2418 }
0x147b   :  { %v2423_v29 = vsel %vm707_vm2, %v2419_v22, 0.0 }
0x147c   :  { %v2435_v36 = vmul.f32 %v4893_v30, %v2423_v29  ;;  %v2417_v37 = vpop.permute.xlu0 %2416 }
0x147d   :  { %v2422_v31 = vsel %vm707_vm2, %v2417_v37, 0.0 }
0x147e   :  { %v2427_v57 = vpop.permute.xlu1 %2426  ;;  %v2437_v16 = vadd.f32 %v2435_v36, %v2433_v32  ;;  %v2434_v35 = vmul.f32 %v4895_v34, %v2422_v31 }
0x147f   :  { %v2431_v33 = vsel %vm716_vm3, 0.0, %v2427_v57 }
0x1480   :  { %v2439_v42 = vmul.f32 %v4896_v38, %v2431_v33  ;;  %v2436_v53 = vadd.f32 %v2434_v35, %v2432_v26  ;;  %v4175_v33 = vld [vmem:[%s6067_s18 + $0x20] sm:$0xff] }
0x1481   :  { %4634 = vmatprep.subr.mxu1 %v4175_v33 }
0x1482   :  { %v5744_v52 = vadd.f32 %v2439_v42, %v2437_v16  ;;  %v2425_v24 = vpop.permute.xlu1 %2424  ;;  %4635 = vmatpush3.msra.mxu1 %v4175_v33  ;;  %v4176_v33 = vld [vmem:[%s6067_s18 + $0x28] sm:$0xff] }
0x1483   :  { %v2430_v1 = vsel %vm716_vm3, 0.0, %v2425_v24 }
0x1484   :  { %v2438_v58 = vmul.f32 %v4898_v54, %v2430_v1  ;;  %2446 = vrot.lane.b32.xlu0 %v5744_v52, %s4924_s29 }
0x1486   :  { %v5752_v59 = vadd.f32 %v2438_v58, %v2436_v53 }
0x1488   :  { %2444 = vrot.lane.b32.xlu1 %v5752_v59, %s4924_s29  ;;  %4624 = vmatprep.mubr.msk.f32.mxu0 %vm735_vm4, %v5752_v59 }
0x14f6   :  { %v2447_v62 = vpop.permute.xlu0 %2446 }
0x14f7   :  { %4620 = vmatprep.subr.msk.mxu0 %vm735_vm4, %v2447_v62 }
0x14f8   :  { %4621 = vmatpush3.xpose.msk.msra.mxu0 %vm735_vm4, %v2447_v62 }
0x14fa   :  { %v2445_v55 = vpop.permute.xlu1 %2444 }
0x14fb   :  { %4622 = vmatprep.subr.msk.mxu0 %vm735_vm4, %v2445_v55 }
0x14fc   :  { %4623 = vmatpush3.xpose.msk.msra.mxu0 %vm735_vm4, %v2445_v55 }
0x14ff   :  { %4625 = vmatmul.mubr.msk.f32.vlgmr.msra.gmra.mxu0 %vm735_vm4, %v5744_v52 }
0x15bf   :  { %v4626_v63 = vpop.f32.mrf.mxu0 }
0x15c0   :  { %v2532_v0 = vmul.f32 0.35355338, %v4626_v63 }
0x15c1   :  { %v2522_v2 = vpop.f32.mrf.mxu0 }
0x15c2   :  { %v2531_v3 = vmul.f32 0.35355338, %v2522_v2  ;;  %v2534_v4 = vadd.f32 %v5767_v61, %v2532_v0 }
0x15c4   :  { %v2538_v5 = vsel %vm101_vm0, %v2534_v4, -inf  ;;  %v2533_v6 = vadd.f32 %v5774_v48, %v2531_v3 }
0x15c5   :  { %2539 = vmax.xlane.f32.xlu1 %v2538_v5 }
0x15c6   :  { %v2535_v39 = vsel %vm101_vm0, %v2533_v6, -inf }
0x15c7   :  { %2536 = vmax.xlane.f32.xlu0 %v2535_v39 }
0x15d6   :  { %2557 = vrot.lane.b32.xlu1 %v5714_v46, %s4927_s6 }
0x15da   :  { %2739 = vrot.lane.b32.xlu1 %v5744_v52, %s6135_s17 }
0x15de   :  { %2737 = vrot.lane.b32.xlu1 %v5752_v59, %s6135_s17  ;;  %s4097_s17 = sshll.u32 %s4939_s3, 4  ;;  %s4098_s17 = int_to_ptr.vmem [resolvable:$true] %s4097_s17 }
0x15df   :  { %p4906_p1 = scmp.lt.s32.totalorder %s4098_s17, %s4098_s17 }
0x15e2   :  { %2735 = vrot.lane.b32.xlu1 %v5744_v52, %s6136_s10 }
0x15e6   :  { %3024 = vrot.lane.b32.xlu1 %v5752_v59, %s6137_s2 }
0x15ea   :  { %3022 = vrot.lane.b32.xlu1 %v5744_v52, %s6138_s11 }
0x164e   :  { %v2540_v7 = vpop.xlane.xlu1 %2539 }
0x164f   :  { %v2542_v8 = vsub.f32 %v2534_v4, %v2540_v7 }
0x1650   :  { %v2537_v47 = vpop.xlane.xlu0 %2536 }
0x1651   :  { %v2545_v10 = vmul.f32 1.442695, %v2542_v8  ;;  %v2541_v12 = vsub.f32 %v2533_v6, %v2537_v47 }
0x1652   :  { %v2558_v21 = vpop.permute.xlu1 %2557 }
0x1653   :  { %4849 = vpow2.f32 %v2545_v10  ;;  %v2543_v60 = vmul.f32 1.442695, %v2541_v12 }
0x1655   :  { %4851 = vpow2.f32 %v2543_v60 }
0x1656   :  { %v2740_v50 = vpop.permute.xlu1 %2739 }
0x165a   :  { %v2738_v29 = vpop.permute.xlu1 %2737 }
0x165e   :  { %v2736_v31 = vpop.permute.xlu1 %2735 }
0x1660   :  { %v4850_v13 = vpop.eup %4849 }
0x1661   :  { %v2550_v14 = vsel %vm101_vm0, %v4850_v13, 0.0 }
0x1662   :  { %v4852_v56 = vpop.eup %4851  ;;  %2551 = vadd.xlane.f32.xlu0 %v2550_v14  ;;  %v3025_v32 = vpop.permute.xlu1 %3024 }
0x1663   :  { %v2547_v9 = vsel %vm101_vm0, %v4852_v56, 0.0 }
0x1666   :  { %2548 = vadd.xlane.f32.xlu0 %v2547_v9  ;;  %v3023_v57 = vpop.permute.xlu1 %3022 }
0x167c   :  { %2559 = vrot.lane.b32.xlu0 %v5712_v20, %s4927_s6 }
0x1680   :  { %2733 = vrot.lane.b32.xlu0 %v5752_v59, %s6136_s10 }
0x1684   :  { %3026 = vrot.lane.b32.xlu0 %v5744_v52, %s6137_s2 }
0x1688   :  { %3020 = vrot.lane.b32.xlu0 %v5752_v59, %s6138_s11 }
0x16eb   :  { %v2552_v17 = vpop.xlane.xlu0 %2551 }
0x16ec   :  { %4853 = vrcp.f32 %v2552_v17 }
0x16ef   :  { %v2549_v19 = vpop.xlane.xlu0 %2548 }
0x16f0   :  { %4855 = vrcp.f32 %v2549_v19 }
0x16f3   :  { %v2560_v23 = vpop.permute.xlu0 %2559 }
0x16f4   :  { %4627 = vmatprep.subr.mxu0 %v2560_v23 }
0x16f5   :  { %4628 = vmatpush3.msra.mxu0 %v2560_v23 }
0x16f6   :  { %4629 = vmatprep.subr.mxu0 %v2558_v21 }
0x16f7   :  { %4630 = vmatpush3.msra.mxu0 %v2558_v21  ;;  %v2734_v22 = vpop.permute.xlu0 %2733 }
0x16f8   :  { %4639 = vmatprep.subr.msk.mxu0 %vm735_vm4, %v2740_v50 }
0x16f9   :  { %v4854_v49 = vpop.eup %4853 }
0x16fa   :  { %v2556_v36 = vmul.f32 %v4854_v49, %v4850_v13 }
0x16fb   :  { %v3027_v37 = vpop.permute.xlu0 %3026 }
0x16fd   :  { %v4856_v18 = vpop.eup %4855 }
0x16fe   :  { %v2555_v30 = vmul.f32 %v4856_v18, %v4852_v56 }
0x16ff   :  { %v3021_v51 = vpop.permute.xlu0 %3020 }
0x1700   :  { %4631 = vmatprep.mubr.msk.f32.mxu0 %vm101_vm0, %v2555_v30 }
0x1701   :  { %4632 = vmatmul.mubr.msk.f32.vlgmr.msra.gmra.mxu0 %vm101_vm0, %v2556_v36 }
0x1702   :  { %4640 = vmatpush3.xpose.msk.msra.mxu0 %vm735_vm4, %v2740_v50  ;;  %4643 = vmatprep.mubr.msk.f32.mxu0 %vm735_vm4, %v2734_v22 }
0x1703   :  { %4641 = vmatprep.subr.msk.mxu0 %vm735_vm4, %v2738_v29 }
0x1706   :  { %4642 = vmatpush3.xpose.msk.msra.mxu0 %vm735_vm4, %v2738_v29 }
0x1707   :  { %4658 = vmatprep.subr.msk.mxu0 %vm735_vm4, %v3027_v37 }
0x1709   :  { %4644 = vmatmul.mubr.msk.f32.vlgmr.msra.gmra.mxu0 %vm735_vm4, %v2736_v31 }
0x170a   :  { %4659 = vmatpush3.xpose.msk.msra.mxu0 %vm735_vm4, %v3027_v37  ;;  %4662 = vmatprep.mubr.msk.f32.mxu0 %vm735_vm4, %v3021_v51 }
0x170b   :  { %4660 = vmatprep.subr.msk.mxu0 %vm735_vm4, %v3025_v32 }
0x170e   :  { %4661 = vmatpush3.xpose.msk.msra.mxu0 %vm735_vm4, %v3025_v32 }
0x1711   :  { %4663 = vmatmul.mubr.msk.f32.vlgmr.msra.gmra.mxu0 %vm735_vm4, %v3023_v57 }
0x17c1   :  { %v4633_v16 = vpop.f32.mrf.mxu0 }
0x17c3   :  { %v2635_v34 = vpop.f32.mrf.mxu0 }
0x17c4   :  { %4636 = vmatprep.mubr.msk.f32.mxu1 %vm735_vm4, %v2635_v34 }
0x17c5   :  { %4637 = vmatmul.mubr.msk.f32.vlgmr.msra.gmra.mxu1 %vm735_vm4, %v4633_v16 }
0x17c9   :  { %v4645_v35 = vpop.f32.mrf.mxu0 }
0x17ca   :  { %v2825_v38 = vmul.f32 0.35355338, %v4645_v35 }
0x17cb   :  { %v2815_v42 = vpop.f32.mrf.mxu0 }
0x17cc   :  { %v2824_v44 = vmul.f32 0.35355338, %v2815_v42  ;;  %v2827_v26 = vadd.f32 %v5767_v61, %v2825_v38 }
0x17ce   :  { %v2831_v24 = vsel %vm101_vm0, %v2827_v26, -inf  ;;  %v2826_v1 = vadd.f32 %v5774_v48, %v2824_v44 }
0x17cf   :  { %2832 = vmax.xlane.f32.xlu1 %v2831_v24 }
0x17d0   :  { %v2828_v53 = vsel %vm101_vm0, %v2826_v1, -inf }
0x17d1   :  { %2829 = vmax.xlane.f32.xlu0 %v2828_v53  ;;  %v4664_v54 = vpop.f32.mrf.mxu0 }
0x17d2   :  { %v3112_v58 = vmul.f32 0.35355338, %v4664_v54 }
0x17d3   :  { %v3102_v56 = vpop.f32.mrf.mxu0 }
0x17d4   :  { %v3114_v62 = vadd.f32 %v5767_v61, %v3112_v58  ;;  %v3111_v9 = vmul.f32 0.35355338, %v3102_v56 }
0x17d6   :  { %v3118_v55 = vsel %vm101_vm0, %v3114_v62, -inf  ;;  %v3113_v17 = vadd.f32 %v5774_v48, %v3111_v9 }
0x17d8   :  { %v3115_v19 = vsel %vm101_vm0, %v3113_v17, -inf }
0x17e0   :  { %2850 = vrot.lane.b32.xlu1 %v5714_v46, %s6139_s1 }
0x17e4   :  { %3313 = vrot.lane.b32.xlu1 %v5744_v52, %s6140_s7 }
0x17e8   :  { %3311 = vrot.lane.b32.xlu1 %v5752_v59, %s6140_s7 }
0x17ec   :  { %3309 = vrot.lane.b32.xlu1 %v5744_v52, %s6141_s23 }
0x1810   :  { %3119 = vmax.xlane.f32.xlu1 %v3118_v55 }
0x1821   :  { %3137 = vrot.lane.b32.xlu1 %v5714_v46, %s6142_s5 }
0x1858   :  { %v2833_v63 = vpop.xlane.xlu1 %2832 }
0x1859   :  { %v2835_v0 = vsub.f32 %v2827_v26, %v2833_v63 }
0x185a   :  { %v2830_v2 = vpop.xlane.xlu0 %2829 }
0x185b   :  { %v2838_v3 = vmul.f32 1.442695, %v2835_v0  ;;  %v2834_v4 = vsub.f32 %v2826_v1, %v2830_v2 }
0x185c   :  { %v2851_v5 = vpop.permute.xlu1 %2850 }
0x185d   :  { %4857 = vpow2.f32 %v2838_v3  ;;  %v2836_v6 = vmul.f32 1.442695, %v2834_v4  ;;  %v4177_v4 = vld [vmem:[%s6067_s18 + $0x30] sm:$0xff] }
0x185f   :  { %4859 = vpow2.f32 %v2836_v6 }
0x1860   :  { %v3314_v52 = vpop.permute.xlu1 %3313 }
0x1861   :  { %4677 = vmatprep.subr.msk.mxu0 %vm735_vm4, %v3314_v52 }
0x1862   :  { %4678 = vmatpush3.xpose.msk.msra.mxu0 %vm735_vm4, %v3314_v52 }
0x1864   :  { %v3312_v39 = vpop.permute.xlu1 %3311 }
0x1865   :  { %4679 = vmatprep.subr.msk.mxu0 %vm735_vm4, %v3312_v39 }
0x1866   :  { %4680 = vmatpush3.xpose.msk.msra.mxu0 %vm735_vm4, %v3312_v39 }
0x1868   :  { %v3310_v12 = vpop.permute.xlu1 %3309 }
0x186a   :  { %v4858_v7 = vpop.eup %4857 }
0x186b   :  { %v2843_v8 = vsel %vm101_vm0, %v4858_v7, 0.0 }
0x186c   :  { %v4860_v47 = vpop.eup %4859  ;;  %2844 = vadd.xlane.f32.xlu0 %v2843_v8 }
0x186d   :  { %v2840_v10 = vsel %vm101_vm0, %v4860_v47, 0.0 }
0x1870   :  { %2841 = vadd.xlane.f32.xlu0 %v2840_v10 }
0x1885   :  { %v4638_v35 = vpop.f32.mrf.mxu1 }
0x1886   :  { %2852 = vrot.lane.b32.xlu0 %v5712_v20, %s6139_s1 }
0x1887   :  { %v5861_v1 = vpop.f32.mrf.mxu1 }
0x188a   :  { %3307 = vrot.lane.b32.xlu0 %v5752_v59, %s6141_s23 }
0x1899   :  { %v3120_v60 = vpop.xlane.xlu1 %3119 }
0x189a   :  { %v3122_v13 = vsub.f32 %v3114_v62, %v3120_v60 }
0x189c   :  { %v3125_v14 = vmul.f32 1.442695, %v3122_v13  ;;  %v4215_v13 = vld [vmem:[%s6068_s19 + $0x1] ss:$0 sm:$0xff] }
0x189e   :  { %4861 = vpow2.f32 %v3125_v14  ;;  %v2732_v14 = vadd.f32 %v4638_v35, %v4215_v13 }
0x18a9   :  { %3116 = vmax.xlane.f32.xlu0 %v3115_v19 }
0x18ab   :  { %v4862_v21 = vpop.eup %4861 }
0x18ac   :  { %v3130_v23 = vsel %vm101_vm0, %v4862_v21, 0.0 }
0x18ad   :  { %3131 = vadd.xlane.f32.xlu0 %v3130_v23 }
0x18f5   :  { %v2845_v50 = vpop.xlane.xlu0 %2844 }
0x18f6   :  { %4863 = vrcp.f32 %v2845_v50 }
0x18f9   :  { %v2842_v49 = vpop.xlane.xlu0 %2841 }
0x18fa   :  { %4865 = vrcp.f32 %v2842_v49  ;;  %v4178_v49 = vld [vmem:[%s6067_s18 + $0x38] sm:$0xff] }
0x18fd   :  { %v2853_v59 = vpop.permute.xlu0 %2852 }
0x18fe   :  { %4646 = vmatprep.subr.mxu1 %v2853_v59 }
0x18ff   :  { %4647 = vmatpush3.msra.mxu1 %v2853_v59 }
0x1900   :  { %4648 = vmatprep.subr.mxu1 %v2851_v5 }
0x1901   :  { %4649 = vmatpush3.msra.mxu1 %v2851_v5  ;;  %v3308_v18 = vpop.permute.xlu0 %3307 }
0x1902   :  { %4681 = vmatprep.mubr.msk.f32.mxu0 %vm735_vm4, %v3308_v18  ;;  %4653 = vmatprep.subr.mxu1 %v4176_v33 }
0x1903   :  { %4682 = vmatmul.mubr.msk.f32.vlgmr.msra.gmra.mxu0 %vm735_vm4, %v3310_v12  ;;  %v4864_v22 = vpop.eup %4863 }
0x1904   :  { %v2849_v36 = vmul.f32 %v4864_v22, %v4858_v7 }
0x1907   :  { %v4866_v29 = vpop.eup %4865 }
0x1908   :  { %v2848_v30 = vmul.f32 %v4866_v29, %v4860_v47 }
0x190a   :  { %4650 = vmatprep.mubr.msk.f32.mxu1 %vm101_vm0, %v2848_v30 }
0x190b   :  { %4651 = vmatmul.mubr.msk.f32.vlgmr.msra.gmra.mxu1 %vm101_vm0, %v2849_v36 }
0x190c   :  { %4654 = vmatpush3.msra.mxu1 %v4176_v33 }
0x1932   :  { %v3117_v37 = vpop.xlane.xlu0 %3116 }
0x1933   :  { %v3121_v31 = vsub.f32 %v3113_v17, %v3117_v37 }
0x1935   :  { %v3123_v51 = vmul.f32 1.442695, %v3121_v31 }
0x1936   :  { %v3132_v54 = vpop.xlane.xlu0 %3131 }
0x1937   :  { %4867 = vpow2.f32 %v3123_v51 }
0x1938   :  { %4869 = vrcp.f32 %v3132_v54 }
0x1944   :  { %v4868_v32 = vpop.eup %4867 }
0x1945   :  { %v3127_v57 = vsel %vm101_vm0, %v4868_v32, 0.0  ;;  %v4870_v63 = vpop.eup %4869 }
0x1946   :  { %3128 = vadd.xlane.f32.xlu0 %v3127_v57  ;;  %v3136_v3 = vmul.f32 %v4870_v63, %v4862_v21 }
0x195c   :  { %3139 = vrot.lane.b32.xlu0 %v5712_v20, %s6142_s5 }
0x19c3   :  { %v4683_v16 = vpop.f32.mrf.mxu0 }
0x19c4   :  { %v3399_v34 = vmul.f32 0.35355338, %v4683_v16 }
0x19c5   :  { %v3389_v38 = vpop.f32.mrf.mxu0 }
0x19c6   :  { %v3401_v42 = vadd.f32 %v5767_v61, %v3399_v34  ;;  %v3398_v44 = vmul.f32 0.35355338, %v3389_v38 }
0x19c8   :  { %v3400_v26 = vadd.f32 %v5774_v48, %v3398_v44  ;;  %v3405_v24 = vsel %vm101_vm0, %v3401_v42, -inf  ;;  %v3138_v48 = vpop.permute.xlu1 %3137 }
0x19c9   :  { %3406 = vmax.xlane.f32.xlu0 %v3405_v24 }
0x19ca   :  { %v3402_v53 = vsel %vm101_vm0, %v3400_v26, -inf }
0x19cb   :  { %v4652_v58 = vpop.f32.mrf.mxu1  ;;  %3403 = vmax.xlane.f32.xlu1 %v3402_v53 }
0x19cd   :  { %v2928_v62 = vpop.f32.mrf.mxu1 }
0x19ce   :  { %4655 = vmatprep.mubr.msk.f32.mxu1 %vm735_vm4, %v2928_v62 }
0x19cf   :  { %4656 = vmatmul.mubr.msk.f32.vlgmr.msra.gmra.mxu1 %vm735_vm4, %v4652_v58  ;;  %v3129_v61 = vpop.xlane.xlu0 %3128 }
0x19d0   :  { %4871 = vrcp.f32 %v3129_v61 }
0x19d3   :  { %v3140_v55 = vpop.permute.xlu0 %3139 }
0x19d4   :  { %4665 = vmatprep.subr.mxu1 %v3140_v55 }
0x19d5   :  { %4666 = vmatpush3.msra.mxu1 %v3140_v55 }
0x19d6   :  { %4667 = vmatprep.subr.mxu1 %v3138_v48 }
0x19d7   :  { %4668 = vmatpush3.msra.mxu1 %v3138_v48 }
0x19d8   :  { %4672 = vmatprep.subr.mxu1 %v4177_v4 }
0x19dd   :  { %v4872_v0 = vpop.eup %4871 }
0x19de   :  { %v3135_v2 = vmul.f32 %v4872_v0, %v4868_v32  ;;  %v2731_v32 = vadd.f32 %v4215_v13, %v5861_v1 }
0x19e0   :  { %4669 = vmatprep.mubr.msk.f32.mxu1 %vm101_vm0, %v3135_v2 }
0x19e1   :  { %4670 = vmatmul.mubr.msk.f32.vlgmr.msra.gmra.mxu1 %vm101_vm0, %v3136_v3 }
0x19e2   :  { %4673 = vmatpush3.msra.mxu1 %v4177_v4 }
0x1a52   :  { %v3407_v5 = vpop.xlane.xlu0 %3406 }
0x1a53   :  { %v3409_v6 = vsub.f32 %v3401_v42, %v3407_v5 }
0x1a54   :  { %v3404_v52 = vpop.xlane.xlu1 %3403 }
0x1a55   :  { %v3412_v39 = vmul.f32 1.442695, %v3409_v6  ;;  %v3408_v7 = vsub.f32 %v3400_v26, %v3404_v52  ;;  %v4182_v6 = vld [vmem:[%s6069_s20 + $0x30] sm:$0xff]  ;;  %v4181_v52 = vld [vmem:[%s6069_s20 + $0x28] sm:$0xff] }
0x1a57   :  { %4873 = vpow2.f32 %v3412_v39  ;;  %v3410_v8 = vmul.f32 1.442695, %v3408_v7  ;;  %v3863_v39 = vld [vmem:[%s6073_s24 + $0x18] sm:$0xff] }
0x1a59   :  { %4875 = vpow2.f32 %v3410_v8 }
0x1a64   :  { %v4874_v47 = vpop.eup %4873 }
0x1a65   :  { %v3417_v10 = vsel %vm101_vm0, %v4874_v47, 0.0 }
0x1a66   :  { %v4876_v12 = vpop.eup %4875  ;;  %3418 = vadd.xlane.f32.xlu1 %v3417_v10 }
0x1a67   :  { %v3414_v60 = vsel %vm101_vm0, %v4876_v12, 0.0 }
0x1a68   :  { %3415 = vadd.xlane.f32.xlu0 %v3414_v60 }
0x1a77   :  { %3424 = vrot.lane.b32.xlu1 %v5714_v46, %s6143_s0 }
0x1a7e   :  { %3426 = vrot.lane.b32.xlu0 %v5712_v20, %s6143_s0 }
0x1a8f   :  { %v4657_v56 = vpop.f32.mrf.mxu1 }
0x1a90   :  { %v3019_v9 = vadd.f32 %v4657_v56, %v2732_v14  ;;  %v3640_v14 = vadd.f32 1.0, %v5660_v27  ;;  %v5932_v56 = vadd.f32 %v5707_v25, %v5655_v15  ;;  %v3861_v15 = vld [vmem:[%s6073_s24 + $0x8] sm:$0xff]  ;;  %v3860_v25 = vld [vmem:[%s6073_s24] sm:$0xff] }
0x1a91   :  { %v3009_v17 = vpop.f32.mrf.mxu1 }
0x1a92   :  { %v3018_v57 = vadd.f32 %v3009_v17, %v2731_v32  ;;  %v4191_v32 = vld [vmem:[%s6071_s22 + $0xb0] sm:$0xff] }
0x1aa1   :  { %v4671_v19 = vpop.f32.mrf.mxu1 }
0x1aa3   :  { %v3215_v21 = vpop.f32.mrf.mxu1 }
0x1aa4   :  { %4674 = vmatprep.mubr.msk.f32.mxu1 %vm735_vm4, %v3215_v21 }
0x1aa5   :  { %4675 = vmatmul.mubr.msk.f32.vlgmr.msra.gmra.mxu1 %vm735_vm4, %v4671_v19 }
0x1aef   :  { %v3419_v23 = vpop.xlane.xlu1 %3418 }
0x1af0   :  { %4877 = vrcp.f32 %v3419_v23  ;;  %v3641_v23 = vadd.f32 1.0, %v5932_v56 }
0x1af1   :  { %v3416_v46 = vpop.xlane.xlu0 %3415 }
0x1af2   :  { %4879 = vrcp.f32 %v3416_v46 }
0x1af3   :  { %v3425_v20 = vpop.permute.xlu1 %3424 }
0x1af5   :  { %v3427_v50 = vpop.permute.xlu0 %3426 }
0x1af6   :  { %4684 = vmatprep.subr.mxu1 %v3427_v50 }
0x1af7   :  { %4685 = vmatpush3.msra.mxu1 %v3427_v50 }
0x1af8   :  { %4686 = vmatprep.subr.mxu1 %v3425_v20 }
0x1af9   :  { %4687 = vmatpush3.msra.mxu1 %v3425_v20 }
0x1afa   :  { %4691 = vmatprep.subr.mxu1 %v4178_v49 }
0x1afd   :  { %v4878_v59 = vpop.eup %4877 }
0x1afe   :  { %v3423_v29 = vmul.f32 %v4878_v59, %v4874_v47 }
0x1aff   :  { %v4880_v18 = vpop.eup %4879 }
0x1b00   :  { %v3422_v22 = vmul.f32 %v4880_v18, %v4876_v12  ;;  %v3862_v18 = vld [vmem:[%s6073_s24 + $0x10] sm:$0xff]  ;;  %s4901_s24 = scalar_lea.vmem %s4098_s17, 256 }
0x1b01   :  { %p4902_p0 = scmp.ne.s32.totalorder %s4098_s17, %s4901_s24  ;;  %p4907_p2 = scmp.lt.s32.totalorder %s4901_s24, %s4901_s24 }
0x1b02   :  { %4688 = vmatprep.mubr.msk.f32.mxu1 %vm101_vm0, %v3422_v22  ;;  %v4199_v22 = vld [vmem:[%s6071_s22 + $0xf0] sm:$0xff] }
0x1b03   :  { %4689 = vmatmul.mubr.msk.f32.vlgmr.msra.gmra.mxu1 %vm101_vm0, %v3423_v29  ;;  %v4198_v29 = vld [vmem:[%s6071_s22 + $0xe8] sm:$0xff]  ;;  %p4908_p3 = por %p4907_p2, %p4906_p1 }
0x1b04   :  { %4692 = vmatpush3.msra.mxu1 %v4178_v49 }
0x1b05   :  { %p4909_p4 = pnand %p4908_p3, %p4902_p0 }
0x1b65   :  { %v4676_v30 = vpop.f32.mrf.mxu1 }
0x1b66   :  { %v3306_v36 = vadd.f32 %v4676_v30, %v3019_v9  ;;  %v4196_v30 = vld [vmem:[%s6071_s22 + $0xd8] sm:$0xff] }
0x1b67   :  { %v3296_v37 = vpop.f32.mrf.mxu1 }
0x1b68   :  { %v3305_v16 = vadd.f32 %v3296_v37, %v3018_v57  ;;  %v4194_v37 = vld [vmem:[%s6071_s22 + $0xc8] sm:$0xff] }
0x1b69   :  { %v4190_v57 = vld [vmem:[%s6071_s22 + $0xa8] sm:$0xff] }
0x1bc3   :  { %v4690_v31 = vpop.f32.mrf.mxu1 }
0x1bc5   :  { %v3502_v51 = vpop.f32.mrf.mxu1 }
0x1bc6   :  { %4693 = vmatprep.mubr.msk.f32.mxu1 %vm735_vm4, %v3502_v51  ;;  %v4192_v51 = vld [vmem:[%s6071_s22 + $0xb8] sm:$0xff] }
0x1bc7   :  { %4694 = vmatmul.mubr.msk.f32.vlgmr.msra.gmra.mxu1 %vm735_vm4, %v4690_v31  ;;  %v4193_v31 = vld [vmem:[%s6071_s22 + $0xc0] sm:$0xff] }
0x1c87   :  { %v4695_v33 = vpop.f32.mrf.mxu1 }
0x1c88   :  { %v3593_v38 = vadd.f32 %v4695_v33, %v3306_v36  ;;  %v4195_v36 = vld [vmem:[%s6071_s22 + $0xd0] sm:$0xff]  ;;  %v4189_v33 = vld [vmem:[%s6071_s22 + $0xa0] sm:$0xff] }
0x1c89   :  { %v3583_v34 = vpop.f32.mrf.mxu1 }
0x1c8a   :  { %v3592_v35 = vadd.f32 %v3583_v34, %v3305_v16  ;;  %v4188_v16 = vld [vmem:[%s6071_s22 + $0x98] sm:$0xff]  ;;  %v4187_v34 = vld [vmem:[%s6071_s22 + $0x90] sm:$0xff] }
0x1c8c   :  { %3596 = vrot.lane.b32.xlu1 %v3592_v35, %s4927_s6  ;;  %v4186_v35 = vld [vmem:[%s6071_s22 + $0x88] sm:$0xff] }
0x1c90   :  { %3598 = vrot.lane.b32.xlu1 %v3593_v38, %s4927_s6  ;;  %v4185_v38 = vld [vmem:[%s6071_s22 + $0x80] sm:$0xff] }
0x1cfe   :  { %v3597_v42 = vpop.permute.xlu1 %3596 }
0x1cff   :  { %v3602_v44 = vmul.f32 %v3597_v42, %v5657_v11  ;;  %v4240_v42 = vld [vmem:[%s6070_s21 + $0x1] ss:$0 sm:$0xff] }
0x1d01   :  { %3606 = vrot.lane.b32.xlu0 %v3602_v44, %s4927_s6 }
0x1d02   :  { %v3599_v26 = vpop.permute.xlu1 %3598 }
0x1d03   :  { %v3603_v24 = vmul.f32 %v3599_v26, %v5681_v28 }
0x1d05   :  { %3608 = vrot.lane.b32.xlu1 %v3603_v24, %s4927_s6 }
0x1d73   :  { %v3607_v1 = vpop.permute.xlu0 %3606 }
0x1d74   :  { %v5897_v53 = vadd.f32 %v3607_v1, %v5672_v40 }
0x1d76   :  { %v3614_v54 = vsel %vm326_vm1, %v5897_v53, 0.0 }
0x1d77   :  { %3615 = vadd.xlane.f32.xlu0 %v3614_v54  ;;  %v3609_v58 = vpop.permute.xlu1 %3608 }
0x1d78   :  { %v5902_v62 = vadd.f32 %v3609_v58, %v5677_v45 }
0x1d7a   :  { %v3617_v61 = vsel %vm326_vm1, %v5902_v62, 0.0 }
0x1d7b   :  { %3618 = vadd.xlane.f32.xlu1 %v3617_v61 }
0x1d8c   :  { %3648 = vrot.lane.b32.xlu1 %v5681_v28, %s4937_s4  ;;  %v4183_v28 = vld [vmem:[%s6069_s20 + $0x38] sm:$0xff] }
0x1d8d   :  { %4696 = vmatprep.subr.mxu0 %v4183_v28 }
0x1d8e   :  { %4697 = vmatpush3.msra.mxu0 %v4183_v28 }
0x1d8f   :  { %4698 = vmatprep.subr.mxu0 %v4182_v6 }
0x1d90   :  { %4699 = vmatpush3.msra.mxu0 %v4182_v6 }
0x1d91   :  { %4700 = vmatprep.subr.mxu0 %v4181_v52 }
0x1d92   :  { %4701 = vmatpush3.msra.mxu0 %v4181_v52 }
0x1e00   :  { %v3616_v55 = vpop.xlane.xlu0 %3615 }
0x1e01   :  { %v3620_v48 = vmul.f32 0.03125, %v3616_v55 }
0x1e03   :  { %v3622_v40 = vsub.f32 %v5897_v53, %v3620_v48 }
0x1e04   :  { %v3619_v63 = vpop.xlane.xlu1 %3618 }
0x1e05   :  { %v3621_v0 = vmul.f32 0.03125, %v3619_v63  ;;  %v3624_v2 = vmul.f32 %v3622_v40, %v3622_v40 }
0x1e07   :  { %v3623_v3 = vsub.f32 %v5902_v62, %v3621_v0  ;;  %v3626_v4 = vsel %vm326_vm1, %v3624_v2, 0.0 }
0x1e08   :  { %3627 = vadd.xlane.f32.xlu0 %v3626_v4  ;;  %v3649_v49 = vpop.permute.xlu1 %3648 }
0x1e09   :  { %v3625_v45 = vmul.f32 %v3623_v3, %v3623_v3 }
0x1e0b   :  { %v3629_v5 = vsel %vm326_vm1, %v3625_v45, 0.0 }
0x1e0c   :  { %3630 = vadd.xlane.f32.xlu0 %v3629_v5 }
0x1e22   :  { %3646 = vrot.lane.b32.xlu0 %v5657_v11, %s4937_s4  ;;  %v4180_v11 = vld [vmem:[%s6069_s20 + $0x20] sm:$0xff] }
0x1e23   :  { %4702 = vmatprep.subr.mxu0 %v4180_v11 }
0x1e24   :  { %4703 = vmatpush3.msra.mxu0 %v4180_v11 }
0x1e25   :  { %4742 = vmatprep.subr.mxu0 %v3863_v39 }
0x1e91   :  { %v3628_v7 = vpop.xlane.xlu0 %3627 }
0x1e92   :  { %v3632_v8 = vmul.f32 0.03125, %v3628_v7 }
0x1e94   :  { %v3634_v47 = vadd.f32 1e-06, %v3632_v8  ;;  %v4243_v8 = vld [vmem:[%s6134_s8 + $0x1] ss:$0 sm:$0xff] }
0x1e95   :  { %v3631_v10 = vpop.xlane.xlu0 %3630 }
0x1e96   :  { %4881 = vrsqrt.f32 %v3634_v47  ;;  %v3633_v12 = vmul.f32 0.03125, %v3631_v10 }
0x1e98   :  { %v3635_v60 = vadd.f32 1e-06, %v3633_v12 }
0x1e99   :  { %v3647_v21 = vpop.permute.xlu0 %3646 }
0x1e9a   :  { %4883 = vrsqrt.f32 %v3635_v60 }
0x1ea3   :  { %v4882_v13 = vpop.eup %4881 }
0x1ea4   :  { %v3638_v9 = vmul.f32 %v4882_v13, %v3622_v40 }
0x1ea6   :  { %v3642_v17 = vmul.f32 %v3640_v14, %v3638_v9 }
0x1ea7   :  { %v4884_v19 = vpop.eup %4883 }
0x1ea8   :  { %v3639_v46 = vmul.f32 %v4884_v19, %v3623_v3  ;;  %v3652_v50 = vadd.f32 %v3647_v21, %v3642_v17 }
0x1eaa   :  { %4704 = vmatprep.mubr.msk.f32.mxu0 %vm326_vm1, %v3652_v50  ;;  %v3643_v20 = vmul.f32 %v3641_v23, %v3639_v46 }
0x1eac   :  { %v3653_v59 = vadd.f32 %v3649_v49, %v3643_v20  ;;  %v4244_v20 = vld [vmem:[%s6074_s25] ss:$0 sm:$0xff] }
0x1eae   :  { %4705 = vmatmul.mubr.msk.f32.vlgmr.msra.gmra.mxu0 %vm326_vm1, %v3653_v59 }
0x1eaf   :  { %4743 = vmatpush3.msra.mxu0 %v3863_v39  ;;  %4750 = vmatprep.mubr.msk.f32.mxu0 %vm326_vm1, %v5283_v41  ;;  %v4200_v41 = vld [vmem:[%s6071_s22 + $0xf8] sm:$0xff] }
0x1eb0   :  { %4744 = vmatprep.subr.mxu0 %v3862_v18  ;;  %4707 = vmatprep.subr.mxu1 %v4200_v41 }
0x1eb1   :  { %4745 = vmatpush3.msra.mxu0 %v3862_v18  ;;  %4708 = vmatpush3.msra.mxu1 %v4200_v41 }
0x1eb2   :  { %4746 = vmatprep.subr.mxu0 %v3861_v15  ;;  %4709 = vmatprep.subr.mxu1 %v4199_v22 }
0x1eb3   :  { %4747 = vmatpush3.msra.mxu0 %v3861_v15  ;;  %4710 = vmatpush3.msra.mxu1 %v4199_v22 }
0x1eb4   :  { %4748 = vmatprep.subr.mxu0 %v3860_v25  ;;  %4711 = vmatprep.subr.mxu1 %v4198_v29 }
0x1eb5   :  { %4749 = vmatpush3.msra.mxu0 %v3860_v25  ;;  %4712 = vmatpush3.msra.mxu1 %v4198_v29 }
0x1eb6   :  { %4751 = vmatmul.mubr.msk.f32.vlgmr.msra.gmra.mxu0 %vm326_vm1, %v5288_v43  ;;  %v4197_v43 = vld [vmem:[%s6071_s22 + $0xe0] sm:$0xff] }
0x1eb7   :  { %4713 = vmatprep.subr.mxu1 %v4197_v43 }
0x1eb8   :  { %4714 = vmatpush3.msra.mxu1 %v4197_v43 }
0x1eb9   :  { %4715 = vmatprep.subr.mxu1 %v4196_v30 }
0x1eba   :  { %4716 = vmatpush3.msra.mxu1 %v4196_v30 }
0x1ebb   :  { %4717 = vmatprep.subr.mxu1 %v4195_v36 }
0x1ebc   :  { %4718 = vmatpush3.msra.mxu1 %v4195_v36 }
0x1ebd   :  { %4719 = vmatprep.subr.mxu1 %v4194_v37 }
0x1ebe   :  { %4720 = vmatpush3.msra.mxu1 %v4194_v37 }
0x1ebf   :  { %4721 = vmatprep.subr.mxu1 %v4193_v31 }
0x1ec0   :  { %4722 = vmatpush3.msra.mxu1 %v4193_v31  ;;  %v3989_v31 = vld [vmem:[%s6075_s26 + $0x18] sm:$0xff] }
0x1ec1   :  { %4723 = vmatprep.subr.mxu1 %v4192_v51  ;;  %4753 = vmatprep.subr.mxu0 %v3989_v31 }
0x1ec2   :  { %4724 = vmatpush3.msra.mxu1 %v4192_v51  ;;  %4754 = vmatpush3.msra.mxu0 %v3989_v31  ;;  %v3988_v51 = vld [vmem:[%s6075_s26 + $0x10] sm:$0xff] }
0x1ec3   :  { %4725 = vmatprep.subr.mxu1 %v4191_v32  ;;  %4755 = vmatprep.subr.mxu0 %v3988_v51 }
0x1ec4   :  { %4726 = vmatpush3.msra.mxu1 %v4191_v32  ;;  %v3987_v32 = vld [vmem:[%s6075_s26 + $0x8] sm:$0xff]  ;;  %4756 = vmatpush3.msra.mxu0 %v3988_v51 }
0x1ec5   :  { %4727 = vmatprep.subr.mxu1 %v4190_v57  ;;  %4757 = vmatprep.subr.mxu0 %v3987_v32 }
0x1ec6   :  { %4728 = vmatpush3.msra.mxu1 %v4190_v57  ;;  %v3986_v57 = vld [vmem:[%s6075_s26] sm:$0xff]  ;;  %4758 = vmatpush3.msra.mxu0 %v3987_v32 }
0x1ec7   :  { %4729 = vmatprep.subr.mxu1 %v4189_v33  ;;  %4759 = vmatprep.subr.mxu0 %v3986_v57 }
0x1ec8   :  { %4730 = vmatpush3.msra.mxu1 %v4189_v33  ;;  %4760 = vmatpush3.msra.mxu0 %v3986_v57  ;;  %v434_v33 = vld [vmem:[%s6144_s13] sm:$0xff] }
0x1ec9   :  { %4731 = vmatprep.subr.mxu1 %v4188_v16 }
0x1eca   :  { %4732 = vmatpush3.msra.mxu1 %v4188_v16  ;;  %v4938_v16 = vmov 0  }
0x1ecb   :  { %4733 = vmatprep.subr.mxu1 %v4187_v34  ;;  %4783 = vset.pattern.permute.xlu1 %v4938_v16 }
0x1ecc   :  { %4734 = vmatpush3.msra.mxu1 %v4187_v34  ;;  %4784 = vset.pattern.permute.xlu0 %v4938_v16  ;;  %v435_v34 = vld [vmem:[%s6144_s13 + $0x8] sm:$0xff] }
0x1ecd   :  { %4735 = vmatprep.subr.mxu1 %v4186_v35 }
0x1ece   :  { %4736 = vmatpush3.msra.mxu1 %v4186_v35 }
0x1ecf   :  { %4737 = vmatprep.subr.mxu1 %v4185_v38 }
0x1ed0   :  { %4738 = vmatpush3.msra.mxu1 %v4185_v38 }
0x1f6e   :  { %v4706_v44 = vpop.f32.mrf.mxu0 }
0x1f6f   :  { %v3738_v26 = vadd.f32 %v4706_v44, %v4240_v42 }
0x1f70   :  { %v3732_v24 = vpop.f32.mrf.mxu0 }
0x1f71   :  { %v3742_v1 = vmul.f32 %v3738_v26, %v3738_v26  ;;  %v3733_v54 = vadd.f32 %v4240_v42, %v3732_v24 }
0x1f73   :  { %v3744_v58 = vmul.f32 %v3742_v1, %v3738_v26  ;;  %v3741_v61 = vmul.f32 %v3733_v54, %v3733_v54 }
0x1f75   :  { %v3746_v55 = vmul.f32 0.044715, %v3744_v58  ;;  %v3743_v48 = vmul.f32 %v3741_v61, %v3733_v54 }
0x1f77   :  { %v3748_v40 = vadd.f32 %v3746_v55, %v3738_v26  ;;  %v3745_v63 = vmul.f32 0.044715, %v3743_v48 }
0x1f79   :  { %v3750_v0 = vmul.f32 0.7978846, %v3748_v40  ;;  %v3747_v2 = vadd.f32 %v3745_v63, %v3733_v54 }
0x1f7b   :  { %4885 = vtanh.f32 %v3750_v0  ;;  %v3749_v3 = vmul.f32 0.7978846, %v3747_v2 }
0x1f7d   :  { %4887 = vtanh.f32 %v3749_v3 }
0x1f88   :  { %v4886_v4 = vpop.eup %4885 }
0x1f89   :  { %v3754_v45 = vadd.f32 1.0, %v4886_v4  ;;  %v4247_v4 = vld [vmem:[%s6076_s27] ss:$0 sm:$0xff] }
0x1f8a   :  { %v4888_v5 = vpop.eup %4887 }
0x1f8b   :  { %v3753_v28 = vadd.f32 1.0, %v4888_v5  ;;  %v3756_v6 = vmul.f32 0.5, %v3754_v45 }
0x1f8d   :  { %v3755_v52 = vmul.f32 0.5, %v3753_v28  ;;  %v3758_v39 = vmul.f32 %v3756_v6, %v3738_v26 }
0x1f8f   :  { %v3757_v11 = vmul.f32 %v3755_v52, %v3733_v54 }
0x1f91   :  { %4739 = vmatprep.mubr.f32.mxu1 %v3757_v11 }
0x1f92   :  { %4740 = vmatmul.mubr.f32.vlgmr.msra.gmra.mxu1 %v3758_v39 }
0x2052   :  { %v4741_v7 = vpop.f32.mrf.mxu1 }
0x2053   :  { %v3837_v12 = vadd.f32 %v4741_v7, %v4243_v8 }
0x2054   :  { %v3831_v47 = vpop.f32.mrf.mxu1 }
0x2055   :  { %v3832_v10 = vadd.f32 %v4243_v8, %v3831_v47 }
0x2057   :  { %3842 = vrot.lane.b32.xlu1 %v3832_v10, %s4937_s4 }
0x205b   :  { %3844 = vrot.lane.b32.xlu1 %v3837_v12, %s4937_s4 }
0x20c9   :  { %v3843_v60 = vpop.permute.xlu1 %3842 }
0x20ca   :  { %v3848_v13 = vmul.f32 %v3843_v60, %v5660_v27  ;;  %v4752_v27 = vpop.f32.mrf.mxu0 }
0x20cc   :  { %3852 = vrot.lane.b32.xlu0 %v3848_v13, %s4924_s29  ;;  %v3937_v30 = vpop.f32.mrf.mxu0 }
0x20cd   :  { %v3845_v14 = vpop.permute.xlu1 %3844  ;;  %v3938_v36 = vadd.f32 %v4244_v20, %v3937_v30 }
0x20ce   :  { %v3849_v9 = vmul.f32 %v3845_v14, %v5932_v56  ;;  %v3943_v56 = vadd.f32 %v4752_v27, %v4244_v20 }
0x20cf   :  { %v3972_v37 = vadd.f32 1.0, %v3938_v36 }
0x20d0   :  { %3854 = vrot.lane.b32.xlu1 %v3849_v9, %s4924_s29  ;;  %v3973_v49 = vadd.f32 1.0, %v3943_v56 }
0x213e   :  { %v3853_v17 = vpop.permute.xlu0 %3852 }
0x213f   :  { %v3858_v19 = vadd.f32 %v3853_v17, %v5897_v53 }
0x2141   :  { %v3946_v21 = vsel %vm326_vm1, %v3858_v19, 0.0 }
0x2142   :  { %3947 = vadd.xlane.f32.xlu0 %v3946_v21  ;;  %v3855_v23 = vpop.permute.xlu1 %3854 }
0x2143   :  { %v3859_v46 = vadd.f32 %v3855_v23, %v5902_v62 }
0x2145   :  { %v3949_v50 = vsel %vm326_vm1, %v3859_v46, 0.0 }
0x2146   :  { %3950 = vadd.xlane.f32.xlu1 %v3949_v50 }
0x2157   :  { %3978 = vrot.lane.b32.xlu1 %v3973_v49, %s4924_s29 }
0x215b   :  { %4080 = vperm.xlu1 %4783, %v434_v33  }
0x215f   :  { %4085 = vperm.xlu1 %4783, %v435_v34  }
0x21cb   :  { %v3948_v59 = vpop.xlane.xlu0 %3947 }
0x21cc   :  { %v3952_v53 = vmul.f32 0.03125, %v3948_v59 }
0x21ce   :  { %v3954_v18 = vsub.f32 %v3858_v19, %v3952_v53 }
0x21cf   :  { %v3951_v15 = vpop.xlane.xlu1 %3950 }
0x21d0   :  { %v3953_v25 = vmul.f32 0.03125, %v3951_v15  ;;  %v3956_v41 = vmul.f32 %v3954_v18, %v3954_v18 }
0x21d2   :  { %v3955_v22 = vsub.f32 %v3859_v46, %v3953_v25  ;;  %v3958_v62 = vsel %vm326_vm1, %v3956_v41, 0.0 }
0x21d3   :  { %3959 = vadd.xlane.f32.xlu0 %v3958_v62  ;;  %v3979_v63 = vpop.permute.xlu1 %3978 }
0x21d4   :  { %v3957_v29 = vmul.f32 %v3955_v22, %v3955_v22 }
0x21d6   :  { %v3961_v43 = vsel %vm326_vm1, %v3957_v29, 0.0 }
0x21d7   :  { %3962 = vadd.xlane.f32.xlu0 %v3961_v43  ;;  %v4081_v3 = vpop.permute.xlu1 %4080 }
0x21db   :  { %v4086_v28 = vpop.permute.xlu1 %4085 }
0x21ed   :  { %3976 = vrot.lane.b32.xlu0 %v3972_v37, %s4924_s29 }
0x225c   :  { %v3960_v35 = vpop.xlane.xlu0 %3959 }
0x225d   :  { %v3964_v38 = vmul.f32 0.03125, %v3960_v35 }
0x225f   :  { %v3966_v42 = vadd.f32 1e-06, %v3964_v38 }
0x2260   :  { %v3963_v44 = vpop.xlane.xlu0 %3962 }
0x2261   :  { %4889 = vrsqrt.f32 %v3966_v42  ;;  %v3965_v26 = vmul.f32 0.03125, %v3963_v44 }
0x2263   :  { %v3967_v24 = vadd.f32 1e-06, %v3965_v26 }
0x2264   :  { %v3977_v58 = vpop.permute.xlu0 %3976 }
0x2265   :  { %4891 = vrsqrt.f32 %v3967_v24 }
0x226e   :  { %v4890_v1 = vpop.eup %4889 }
0x226f   :  { %v3970_v54 = vmul.f32 %v4890_v1, %v3954_v18 }
0x2271   :  { %v3982_v61 = vmul.f32 %v3977_v58, %v3970_v54 }
0x2272   :  { %v4892_v55 = vpop.eup %4891 }
0x2273   :  { %v3971_v48 = vmul.f32 %v4892_v55, %v3955_v22  ;;  %v3984_v40 = vadd.f32 %v3982_v61, %v3938_v36 }
0x2275   :  { %4761 = vmatprep.mubr.msk.f32.mxu0 %vm326_vm1, %v3984_v40  ;;  %v3983_v0 = vmul.f32 %v3979_v63, %v3971_v48 }
0x2277   :  { %v3985_v2 = vadd.f32 %v3983_v0, %v3943_v56 }
0x2279   :  { %4762 = vmatmul.mubr.msk.f32.vlgmr.msra.gmra.mxu0 %vm326_vm1, %v3985_v2 }
0x2339   :  { %v4763_v45 = vpop.f32.mrf.mxu0 }
0x233a   :  { %v4075_v5 = vadd.f32 %v4763_v45, %v4247_v4 }
0x233b   :  { %v4069_v6 = vpop.f32.mrf.mxu0 }
0x233c   :  { %v4089_v52 = vmul.f32 %v4086_v28, %v4075_v5  ;;  %v4070_v11 = vadd.f32 %v4247_v4, %v4069_v6 }
0x233e   :  { %4091 = vst.msk [vmem:[#allocation2 + $0x8] sm:$0xff] %vm326_vm1, %v4089_v52  ;;  %v4088_v39 = vmul.f32 %v4081_v3, %v4070_v11 }
0x2340   :  { %4090 = vst.msk [vmem:[#allocation2] sm:$0xff] %vm326_vm1, %v4088_v39 }
0x2341   :  { %4912 = shalt.err (!%p4909_p4)
}
0x2342   :  { %s4940_s27 = smov 128   ;;  %s4941_s19 = smov 8  }
0x2343   :  { %4103 = dma.vmem_to_hbm [thread:$0]  %s4098_s17, 256, %s6077_s28, [#allocation3], %s4940_s27, %s4940_s27, %s4941_s19  }
0x2344   :  { %4921 = dma.done.wait [#allocation3], 256  }
0x2345   :  { %4922 = vsyncadd [#allocation3], 4294967040 }
0x2346   :  { %4107 = vsyncpa [#allocation3], 1 }

</bundles_post_ra>
